<compile_context>
chip_gen: v7x
topology: tpu7x:2x2x1
jax: 0.10.0
libtpu: 0.0.40
codegen_flags: <defaults>
</compile_context>

<pallas_src>
import functools

import jax
import jax.numpy as jnp
import numpy as np
from jax.experimental import pallas as pl
from jax.experimental.pallas import tpu as pltpu

EPS = 1e-5  # nn.InstanceNorm2d default


def _make_fused_kernel(H, W, C, compute_dtype):
    """out = x + IN(Conv3x3(pad(ReLU(IN(Conv3x3(pad(x))))))), one image per step."""

    def reflect_pad(t):
        # ReflectionPad2d(1) on an (H', W', C) value: slices + concatenates,
        # everything stays on-chip (no HBM traffic, no scratch needed).
        t = jnp.concatenate([t[1:2], t, t[-2:-1]], axis=0)          # pad H
        t = jnp.concatenate([t[:, 1:2], t, t[:, -2:-1]], axis=1)    # pad W
        return t

    def conv3x3_instance_norm(tpad, w_ref, b_ref):
        # im2col: 9 shifted (H, W, C) views -> (H*W, 9C); ONE MXU matmul.
        taps = [tpad[kh:kh + H, kw:kw + W, :]
                for kh in range(3) for kw in range(3)]
        patches = jnp.concatenate(taps, axis=-1).reshape(H * W, 9 * C)
        acc = jnp.dot(patches.astype(compute_dtype), w_ref[...],
                      preferred_element_type=jnp.float32)           # (H*W, C) f32
        acc = acc + b_ref[0]                                        # conv bias
        # InstanceNorm2d (affine=False): per-channel stats over H*W,
        # biased variance, eps inside the rsqrt. All in f32.
        mean = jnp.mean(acc, axis=0, keepdims=True)
        cen = acc - mean
        var = jnp.mean(cen * cen, axis=0, keepdims=True)
        return cen * jax.lax.rsqrt(var + EPS)                       # (H*W, C) f32

    def kernel(x_ref, w1_ref, b1_ref, w2_ref, b2_ref, out_ref):
        x = x_ref[0].astype(jnp.float32)                            # (H, W, C)
        h = conv3x3_instance_norm(reflect_pad(x), w1_ref, b1_ref)
        h = jnp.maximum(h, 0.0)                                     # ReLU
        y = conv3x3_instance_norm(reflect_pad(h.reshape(H, W, C)),
                                  w2_ref, b2_ref)
        out_ref[0] = (y.reshape(H, W, C) + x).astype(out_ref.dtype)

    return kernel


def _to_slab(w_oihw, dtype):
    # (O, I, 3, 3) -> (3, 3, I, O) -> (9*I, O); row = (kh*3 + kw)*I + i,
    # matching the in-kernel im2col channel-concatenation order.
    O, I, KH, KW = w_oihw.shape
    return jnp.transpose(w_oihw, (2, 3, 1, 0)).reshape(KH * KW * I, O).astype(dtype)


@functools.partial(jax.jit, static_argnames=("use_bf16_matmul",))
def residual_block_nhwc(x_nhwc, w1, b1, w2, b2, *, use_bf16_matmul=True):
    """ResidualBlock forward in NHWC (use this between blocks: no transposes)."""
    N, H, W, C = x_nhwc.shape
    cdt = jnp.bfloat16 if use_bf16_matmul else jnp.float32

    w1s = _to_slab(w1, cdt)
    w2s = _to_slab(w2, cdt)
    b1r = b1.reshape(1, C).astype(jnp.float32)
    b2r = b2.reshape(1, C).astype(jnp.float32)

    # Explicit scoped-VMEM budget (v5e's default is only 16 MiB).
    elt = jnp.dtype(x_nhwc.dtype).itemsize
    block_bytes = (2 * H * W * C * elt                                  # x + out blocks
                   + 2 * (9 * C * C * jnp.dtype(cdt).itemsize + 4 * C)  # weight slabs + biases
                   + 12 * (H + 2) * (W + 2) * C * 4)                    # in-kernel temporaries
    vmem_limit = int(min(max(4 * block_bytes, 32 * 1024 * 1024),
                         64 * 1024 * 1024))

    kernel = _make_fused_kernel(H, W, C, cdt)
    return pl.pallas_call(
        kernel,
        out_shape=jax.ShapeDtypeStruct((N, H, W, C), x_nhwc.dtype),
        grid=(N,),
        in_specs=[
            pl.BlockSpec((1, H, W, C), lambda n: (n, 0, 0, 0)),
            pl.BlockSpec((9 * C, C), lambda n: (0, 0)),
            pl.BlockSpec((1, C), lambda n: (0, 0)),
            pl.BlockSpec((9 * C, C), lambda n: (0, 0)),
            pl.BlockSpec((1, C), lambda n: (0, 0)),
        ],
        out_specs=pl.BlockSpec((1, H, W, C), lambda n: (n, 0, 0, 0)),
        compiler_params=pltpu.CompilerParams(
            dimension_semantics=("parallel",),
            vmem_limit_bytes=vmem_limit),
    )(x_nhwc, w1s, b1r, w2s, b2r)


@functools.partial(jax.jit, static_argnames=("use_bf16_matmul",))
def residual_block(x_nchw, w1, b1, w2, b2, *, use_bf16_matmul=True):
    """NCHW wrapper matching the PyTorch module. When chaining blocks, convert
    layouts once at model boundaries and call residual_block_nhwc instead."""
    x_nhwc = jnp.transpose(x_nchw, (0, 2, 3, 1))
    y = residual_block_nhwc(x_nhwc, w1, b1, w2, b2,
                            use_bf16_matmul=use_bf16_matmul)
    return jnp.transpose(y, (0, 3, 1, 2))


def _reference(x_nchw, w1, b1, w2, b2):
    """Pure-JAX reference mirroring the PyTorch module."""
    def conv(x, w, b):
        xp = jnp.pad(x, ((0, 0), (0, 0), (1, 1), (1, 1)), mode="reflect")
        y = jax.lax.conv_general_dilated(
            xp, w, (1, 1), "VALID",
            dimension_numbers=("NCHW", "OIHW", "NCHW"))
        return y + b[None, :, None, None]

    def inorm(x):
        mean = x.mean(axis=(2, 3), keepdims=True)
        var = ((x - mean) ** 2).mean(axis=(2, 3), keepdims=True)
        return (x - mean) * jax.lax.rsqrt(var + EPS)

    h = jnp.maximum(inorm(conv(x_nchw, w1, b1)), 0.0)
    return x_nchw + inorm(conv(h, w2, b2))


if __name__ == "__main__":
    N, C, H, W = 2, 4, 16, 16  # in_features = C

    key = jax.random.PRNGKey(0)
    kx, kw1, kb1, kw2, kb2 = jax.random.split(key, 5)

    x = jax.random.normal(kx, (N, C, H, W), dtype=jnp.float32)
    scale = 1.0 / np.sqrt(C * 3 * 3)
    w1 = jax.random.uniform(kw1, (C, C, 3, 3), jnp.float32, -scale, scale)
    b1 = jax.random.uniform(kb1, (C,), jnp.float32, -scale, scale)
    w2 = jax.random.uniform(kw2, (C, C, 3, 3), jnp.float32, -scale, scale)
    b2 = jax.random.uniform(kb2, (C,), jnp.float32, -scale, scale)

    ref = jax.block_until_ready(_reference(x, w1, b1, w2, b2))

    # Exact-semantics check: f32 MXU operands.
    out_f32 = jax.block_until_ready(
        residual_block(x, w1, b1, w2, b2, use_bf16_matmul=False))
    np.testing.assert_allclose(np.asarray(out_f32), np.asarray(ref),
                               rtol=1e-4, atol=1e-4)

    # Recommended v6e/v7x config: bf16 MXU operands, f32 accumulate/epilogue.
    out_bf16 = jax.block_until_ready(
        residual_block(x, w1, b1, w2, b2, use_bf16_matmul=True))
    np.testing.assert_allclose(np.asarray(out_bf16), np.asarray(ref),
                               rtol=5e-2, atol=5e-2)

    print("KERNEL_OK")
</pallas_src>

<mosaic_0001>
module attributes {stable_mosaic.version = 11 : i64} {
  func.func @kernel(%arg0: i32, %arg1: memref<1x16x16x4xf32, #tpu.memory_space<vmem>>, %arg2: memref<36x4xf32, #tpu.memory_space<vmem>>, %arg3: memref<1x4xf32, #tpu.memory_space<vmem>>, %arg4: memref<36x4xf32, #tpu.memory_space<vmem>>, %arg5: memref<1x4xf32, #tpu.memory_space<vmem>>, %arg6: memref<1x16x16x4xf32, #tpu.memory_space<vmem>>) attributes {dimension_semantics = [#tpu.dimension_semantics<parallel>], iteration_bounds = array<i64: 2>, scalar_prefetch = 0 : i64, scratch_operands = 0 : i64, tpu.core_type = #tpu.core_type<tc>, window_params = [{transform_indices = @transform_0, window_bounds = array<i64: 1, 16, 16, 4>}, {pipeline_mode = #tpu.pipeline_mode<synchronous>, transform_indices = @transform_1, window_bounds = array<i64: 36, 4>}, {pipeline_mode = #tpu.pipeline_mode<synchronous>, transform_indices = @transform_2, window_bounds = array<i64: 1, 4>}, {pipeline_mode = #tpu.pipeline_mode<synchronous>, transform_indices = @transform_3, window_bounds = array<i64: 36, 4>}, {pipeline_mode = #tpu.pipeline_mode<synchronous>, transform_indices = @transform_4, window_bounds = array<i64: 1, 4>}, {transform_indices = @transform_5, window_bounds = array<i64: 1, 16, 16, 4>}]} {
    %c0 = arith.constant 0 : index
    %c0_0 = arith.constant 0 : index
    %c0_1 = arith.constant 0 : index
    %c0_2 = arith.constant 0 : index
    %0 = vector.load %arg1[%c0, %c0_0, %c0_1, %c0_2] : memref<1x16x16x4xf32, #tpu.memory_space<vmem>>, vector<1x16x16x4xf32>
    %1 = vector.shape_cast %0 : vector<1x16x16x4xf32> to vector<16x16x4xf32>
    %2 = vector.extract_strided_slice %1 {offsets = [1, 0, 0], sizes = [1, 16, 4], strides = [1, 1, 1]} : vector<16x16x4xf32> to vector<1x16x4xf32>
    %3 = vector.extract_strided_slice %1 {offsets = [14, 0, 0], sizes = [1, 16, 4], strides = [1, 1, 1]} : vector<16x16x4xf32> to vector<1x16x4xf32>
    %4 = tpu.concatenate %2, %1, %3 in 0 : vector<1x16x4xf32>, vector<16x16x4xf32>, vector<1x16x4xf32> -> vector<18x16x4xf32>
    %5 = vector.extract_strided_slice %4 {offsets = [0, 1, 0], sizes = [18, 1, 4], strides = [1, 1, 1]} : vector<18x16x4xf32> to vector<18x1x4xf32>
    %6 = vector.extract_strided_slice %4 {offsets = [0, 14, 0], sizes = [18, 1, 4], strides = [1, 1, 1]} : vector<18x16x4xf32> to vector<18x1x4xf32>
    %7 = tpu.concatenate %5, %4, %6 in 1 : vector<18x1x4xf32>, vector<18x16x4xf32>, vector<18x1x4xf32> -> vector<18x18x4xf32>
    %8 = vector.extract_strided_slice %7 {offsets = [0, 0, 0], sizes = [16, 16, 4], strides = [1, 1, 1]} : vector<18x18x4xf32> to vector<16x16x4xf32>
    %9 = vector.extract_strided_slice %7 {offsets = [0, 1, 0], sizes = [16, 16, 4], strides = [1, 1, 1]} : vector<18x18x4xf32> to vector<16x16x4xf32>
    %10 = vector.extract_strided_slice %7 {offsets = [0, 2, 0], sizes = [16, 16, 4], strides = [1, 1, 1]} : vector<18x18x4xf32> to vector<16x16x4xf32>
    %11 = vector.extract_strided_slice %7 {offsets = [1, 0, 0], sizes = [16, 16, 4], strides = [1, 1, 1]} : vector<18x18x4xf32> to vector<16x16x4xf32>
    %12 = vector.extract_strided_slice %7 {offsets = [1, 1, 0], sizes = [16, 16, 4], strides = [1, 1, 1]} : vector<18x18x4xf32> to vector<16x16x4xf32>
    %13 = vector.extract_strided_slice %7 {offsets = [1, 2, 0], sizes = [16, 16, 4], strides = [1, 1, 1]} : vector<18x18x4xf32> to vector<16x16x4xf32>
    %14 = vector.extract_strided_slice %7 {offsets = [2, 0, 0], sizes = [16, 16, 4], strides = [1, 1, 1]} : vector<18x18x4xf32> to vector<16x16x4xf32>
    %15 = vector.extract_strided_slice %7 {offsets = [2, 1, 0], sizes = [16, 16, 4], strides = [1, 1, 1]} : vector<18x18x4xf32> to vector<16x16x4xf32>
    %16 = vector.extract_strided_slice %7 {offsets = [2, 2, 0], sizes = [16, 16, 4], strides = [1, 1, 1]} : vector<18x18x4xf32> to vector<16x16x4xf32>
    %17 = tpu.concatenate %8, %9, %10, %11, %12, %13, %14, %15, %16 in 2 : vector<16x16x4xf32>, vector<16x16x4xf32>, vector<16x16x4xf32>, vector<16x16x4xf32>, vector<16x16x4xf32>, vector<16x16x4xf32>, vector<16x16x4xf32>, vector<16x16x4xf32>, vector<16x16x4xf32> -> vector<16x16x36xf32>
    %18 = vector.shape_cast %17 : vector<16x16x36xf32> to vector<256x36xf32>
    %c0_3 = arith.constant 0 : index
    %c0_4 = arith.constant 0 : index
    %19 = vector.load %arg2[%c0_3, %c0_4] : memref<36x4xf32, #tpu.memory_space<vmem>>, vector<36x4xf32>
    %cst = arith.constant dense<0.000000e+00> : vector<256x4xf32>
    %20 = tpu.matmul %18, %19, %cst {dimension_numbers = #tpu.dot_dimension_numbers<[1], [0], [0], [1], [0, 0, 1, 1], [], []>} : vector<256x36xf32>, vector<36x4xf32>, vector<256x4xf32> -> vector<256x4xf32>
    %c0_5 = arith.constant 0 : index
    %c0_6 = arith.constant 0 : index
    %21 = vector.load %arg3[%c0_5, %c0_6] : memref<1x4xf32, #tpu.memory_space<vmem>>, vector<1x4xf32>
    %22 = vector.shape_cast %21 : vector<1x4xf32> to vector<4xf32>
    %23 = vector.shape_cast %22 : vector<4xf32> to vector<1x4xf32>
    %24 = vector.broadcast %23 : vector<1x4xf32> to vector<256x4xf32>
    %25 = arith.addf %20, %24 : vector<256x4xf32>
    %cst_7 = arith.constant dense<0.000000e+00> : vector<4xf32>
    %26 = vector.multi_reduction <add>, %25, %cst_7 [0] : vector<256x4xf32> to vector<4xf32>
    %27 = vector.shape_cast %26 : vector<4xf32> to vector<1x4xf32>
    %cst_8 = arith.constant 2.560000e+02 : f32
    %28 = vector.broadcast %cst_8 : f32 to vector<1x4xf32>
    %29 = arith.divf %27, %28 : vector<1x4xf32>
    %30 = vector.broadcast %29 : vector<1x4xf32> to vector<256x4xf32>
    %31 = arith.subf %25, %30 : vector<256x4xf32>
    %32 = arith.mulf %31, %31 : vector<256x4xf32>
    %cst_9 = arith.constant dense<0.000000e+00> : vector<4xf32>
    %33 = vector.multi_reduction <add>, %32, %cst_9 [0] : vector<256x4xf32> to vector<4xf32>
    %34 = vector.shape_cast %33 : vector<4xf32> to vector<1x4xf32>
    %cst_10 = arith.constant 2.560000e+02 : f32
    %35 = vector.broadcast %cst_10 : f32 to vector<1x4xf32>
    %36 = arith.divf %34, %35 : vector<1x4xf32>
    %cst_11 = arith.constant 9.99999974E-6 : f32
    %37 = vector.broadcast %cst_11 : f32 to vector<1x4xf32>
    %38 = arith.addf %36, %37 : vector<1x4xf32>
    %39 = math.rsqrt %38 : vector<1x4xf32>
    %40 = vector.broadcast %39 : vector<1x4xf32> to vector<256x4xf32>
    %41 = arith.mulf %31, %40 : vector<256x4xf32>
    %cst_12 = arith.constant 0.000000e+00 : f32
    %42 = vector.broadcast %cst_12 : f32 to vector<256x4xf32>
    %43 = arith.maximumf %41, %42 : vector<256x4xf32>
    %44 = vector.shape_cast %43 : vector<256x4xf32> to vector<16x16x4xf32>
    %45 = vector.extract_strided_slice %44 {offsets = [1, 0, 0], sizes = [1, 16, 4], strides = [1, 1, 1]} : vector<16x16x4xf32> to vector<1x16x4xf32>
    %46 = vector.extract_strided_slice %44 {offsets = [14, 0, 0], sizes = [1, 16, 4], strides = [1, 1, 1]} : vector<16x16x4xf32> to vector<1x16x4xf32>
    %47 = tpu.concatenate %45, %44, %46 in 0 : vector<1x16x4xf32>, vector<16x16x4xf32>, vector<1x16x4xf32> -> vector<18x16x4xf32>
    %48 = vector.extract_strided_slice %47 {offsets = [0, 1, 0], sizes = [18, 1, 4], strides = [1, 1, 1]} : vector<18x16x4xf32> to vector<18x1x4xf32>
    %49 = vector.extract_strided_slice %47 {offsets = [0, 14, 0], sizes = [18, 1, 4], strides = [1, 1, 1]} : vector<18x16x4xf32> to vector<18x1x4xf32>
    %50 = tpu.concatenate %48, %47, %49 in 1 : vector<18x1x4xf32>, vector<18x16x4xf32>, vector<18x1x4xf32> -> vector<18x18x4xf32>
    %51 = vector.extract_strided_slice %50 {offsets = [0, 0, 0], sizes = [16, 16, 4], strides = [1, 1, 1]} : vector<18x18x4xf32> to vector<16x16x4xf32>
    %52 = vector.extract_strided_slice %50 {offsets = [0, 1, 0], sizes = [16, 16, 4], strides = [1, 1, 1]} : vector<18x18x4xf32> to vector<16x16x4xf32>
    %53 = vector.extract_strided_slice %50 {offsets = [0, 2, 0], sizes = [16, 16, 4], strides = [1, 1, 1]} : vector<18x18x4xf32> to vector<16x16x4xf32>
    %54 = vector.extract_strided_slice %50 {offsets = [1, 0, 0], sizes = [16, 16, 4], strides = [1, 1, 1]} : vector<18x18x4xf32> to vector<16x16x4xf32>
    %55 = vector.extract_strided_slice %50 {offsets = [1, 1, 0], sizes = [16, 16, 4], strides = [1, 1, 1]} : vector<18x18x4xf32> to vector<16x16x4xf32>
    %56 = vector.extract_strided_slice %50 {offsets = [1, 2, 0], sizes = [16, 16, 4], strides = [1, 1, 1]} : vector<18x18x4xf32> to vector<16x16x4xf32>
    %57 = vector.extract_strided_slice %50 {offsets = [2, 0, 0], sizes = [16, 16, 4], strides = [1, 1, 1]} : vector<18x18x4xf32> to vector<16x16x4xf32>
    %58 = vector.extract_strided_slice %50 {offsets = [2, 1, 0], sizes = [16, 16, 4], strides = [1, 1, 1]} : vector<18x18x4xf32> to vector<16x16x4xf32>
    %59 = vector.extract_strided_slice %50 {offsets = [2, 2, 0], sizes = [16, 16, 4], strides = [1, 1, 1]} : vector<18x18x4xf32> to vector<16x16x4xf32>
    %60 = tpu.concatenate %51, %52, %53, %54, %55, %56, %57, %58, %59 in 2 : vector<16x16x4xf32>, vector<16x16x4xf32>, vector<16x16x4xf32>, vector<16x16x4xf32>, vector<16x16x4xf32>, vector<16x16x4xf32>, vector<16x16x4xf32>, vector<16x16x4xf32>, vector<16x16x4xf32> -> vector<16x16x36xf32>
    %61 = vector.shape_cast %60 : vector<16x16x36xf32> to vector<256x36xf32>
    %c0_13 = arith.constant 0 : index
    %c0_14 = arith.constant 0 : index
    %62 = vector.load %arg4[%c0_13, %c0_14] : memref<36x4xf32, #tpu.memory_space<vmem>>, vector<36x4xf32>
    %cst_15 = arith.constant dense<0.000000e+00> : vector<256x4xf32>
    %63 = tpu.matmul %61, %62, %cst_15 {dimension_numbers = #tpu.dot_dimension_numbers<[1], [0], [0], [1], [0, 0, 1, 1], [], []>} : vector<256x36xf32>, vector<36x4xf32>, vector<256x4xf32> -> vector<256x4xf32>
    %c0_16 = arith.constant 0 : index
    %c0_17 = arith.constant 0 : index
    %64 = vector.load %arg5[%c0_16, %c0_17] : memref<1x4xf32, #tpu.memory_space<vmem>>, vector<1x4xf32>
    %65 = vector.shape_cast %64 : vector<1x4xf32> to vector<4xf32>
    %66 = vector.shape_cast %65 : vector<4xf32> to vector<1x4xf32>
    %67 = vector.broadcast %66 : vector<1x4xf32> to vector<256x4xf32>
    %68 = arith.addf %63, %67 : vector<256x4xf32>
    %cst_18 = arith.constant dense<0.000000e+00> : vector<4xf32>
    %69 = vector.multi_reduction <add>, %68, %cst_18 [0] : vector<256x4xf32> to vector<4xf32>
    %70 = vector.shape_cast %69 : vector<4xf32> to vector<1x4xf32>
    %cst_19 = arith.constant 2.560000e+02 : f32
    %71 = vector.broadcast %cst_19 : f32 to vector<1x4xf32>
    %72 = arith.divf %70, %71 : vector<1x4xf32>
    %73 = vector.broadcast %72 : vector<1x4xf32> to vector<256x4xf32>
    %74 = arith.subf %68, %73 : vector<256x4xf32>
    %75 = arith.mulf %74, %74 : vector<256x4xf32>
    %cst_20 = arith.constant dense<0.000000e+00> : vector<4xf32>
    %76 = vector.multi_reduction <add>, %75, %cst_20 [0] : vector<256x4xf32> to vector<4xf32>
    %77 = vector.shape_cast %76 : vector<4xf32> to vector<1x4xf32>
    %cst_21 = arith.constant 2.560000e+02 : f32
    %78 = vector.broadcast %cst_21 : f32 to vector<1x4xf32>
    %79 = arith.divf %77, %78 : vector<1x4xf32>
    %cst_22 = arith.constant 9.99999974E-6 : f32
    %80 = vector.broadcast %cst_22 : f32 to vector<1x4xf32>
    %81 = arith.addf %79, %80 : vector<1x4xf32>
    %82 = math.rsqrt %81 : vector<1x4xf32>
    %83 = vector.broadcast %82 : vector<1x4xf32> to vector<256x4xf32>
    %84 = arith.mulf %74, %83 : vector<256x4xf32>
    %85 = vector.shape_cast %84 : vector<256x4xf32> to vector<16x16x4xf32>
    %86 = arith.addf %85, %1 : vector<16x16x4xf32>
    %c0_23 = arith.constant 0 : index
    %c0_24 = arith.constant 0 : index
    %c0_25 = arith.constant 0 : index
    %c0_26 = arith.constant 0 : index
    %87 = vector.load %arg6[%c0_23, %c0_24, %c0_25, %c0_26] : memref<1x16x16x4xf32, #tpu.memory_space<vmem>>, vector<1x16x16x4xf32>
    %88 = vector.shape_cast %87 : vector<1x16x16x4xf32> to vector<16x16x4xf32>
    %89 = vector.shape_cast %86 : vector<16x16x4xf32> to vector<1x16x16x4xf32>
    tpu.vector_store %arg6[%c0_23, %c0_24, %c0_25, %c0_26], %89 {strides = array<i32>} : memref<1x16x16x4xf32, #tpu.memory_space<vmem>>, vector<1x16x16x4xf32>,
    return
  }
  func.func @transform_0(%arg0: i32) -> (i32, i32, i32, i32) {
    %c0_i32 = arith.constant 0 : i32
    %c0_i32_0 = arith.constant 0 : i32
    %c0_i32_1 = arith.constant 0 : i32
    %c0_i32_2 = arith.constant 0 : i32
    return %arg0, %c0_i32, %c0_i32_0, %c0_i32_1 : i32, i32, i32, i32
  }
  func.func @transform_1(%arg0: i32) -> (i32, i32) {
    %c0_i32 = arith.constant 0 : i32
    %c0_i32_0 = arith.constant 0 : i32
    %c0_i32_1 = arith.constant 0 : i32
    return %c0_i32, %c0_i32_0 : i32, i32
  }
  func.func @transform_2(%arg0: i32) -> (i32, i32) {
    %c0_i32 = arith.constant 0 : i32
    %c0_i32_0 = arith.constant 0 : i32
    %c0_i32_1 = arith.constant 0 : i32
    return %c0_i32, %c0_i32_0 : i32, i32
  }
  func.func @transform_3(%arg0: i32) -> (i32, i32) {
    %c0_i32 = arith.constant 0 : i32
    %c0_i32_0 = arith.constant 0 : i32
    %c0_i32_1 = arith.constant 0 : i32
    return %c0_i32, %c0_i32_0 : i32, i32
  }
  func.func @transform_4(%arg0: i32) -> (i32, i32) {
    %c0_i32 = arith.constant 0 : i32
    %c0_i32_0 = arith.constant 0 : i32
    %c0_i32_1 = arith.constant 0 : i32
    return %c0_i32, %c0_i32_0 : i32, i32
  }
  func.func @transform_5(%arg0: i32) -> (i32, i32, i32, i32) {
    %c0_i32 = arith.constant 0 : i32
    %c0_i32_0 = arith.constant 0 : i32
    %c0_i32_1 = arith.constant 0 : i32
    %c0_i32_2 = arith.constant 0 : i32
    return %arg0, %c0_i32, %c0_i32_0, %c0_i32_1 : i32, i32, i32, i32
  }
}

</mosaic_0001>

<bundles_post_ra>
// kernel: residual_block_nhwc.1
= control target key start
LH: loop header
LB: loop body
LE: loop exit
PB: predicated region body
PF: predicated region fallthrough
CT: control target
= control target key end

     0   :  { %s4765_s18 = smov 0   ;;  %s8493_s0 = inlined_call_operand.vmem [shape: f32[2,16,16,4], index: 0, kind: input, shape index: {}]   ;;  %s8494_s1 = inlined_call_operand.vmem [shape: f32[36,4], index: 1, kind: input, shape index: {}]   ;;  %s8495_s2 = inlined_call_operand.vmem [shape: f32[1,4], index: 2, kind: input, shape index: {}]   ;;  %s8496_s3 = inlined_call_operand.vmem [shape: f32[36,4], index: 3, kind: input, shape index: {}]   ;;  %s8497_s4 = inlined_call_operand.vmem [shape: f32[1,4], index: 4, kind: input, shape index: {}]   ;;  %s8498_s5 = inlined_call_operand.vmem [shape: f32[2,16,16,4], index: 5, kind: output, shape index: {}]  }
   0x1 LB: > { %s4380_s19 = sadd.s32 4294967295, %s4725_s18   ;;  %p4384_p0 = scmp.ge.s32.totalorder %s4725_s18, 1  ;;  %s4725_s18 = sphi %s4765_s18, %s15_s18  }
   0x2   : > { %p187_p1 = scmp.lt.s32.totalorder %s4725_s18, 3 }
   0x4   : > { %p188_p2 = pnand %p4384_p0, %p187_p1 }
   0x6   : > { %191 = sbr.rel (%p188_p2) target bundleno = 1938 (0x792), region = 40 }
   0xd   : > { %p215_p3 = scmp.lt.s32.totalorder %s4380_s19, 1  ;;  %vm321_vm0 = vcmask 1040384   ;;  %vm511_vm1 = vcmask 1046528   ;;  %s4727_s24 = smov 4   ;;  %vm677_vm2 = vcmask 1045504   ;;  %vm1782_vm3 = vcmask 1043456  }
   0xe   : > { %s4728_s25 = smov 8   ;;  %s4729_s26 = smov 12   ;;  %vm1413_vm4 = vcmask 31744   ;;  %vm1444_vm5 = vcmask 64512   ;;  %vm1475_vm6 = vcmask 97280   ;;  %vm1508_vm7 = vcmask 130048  }
   0xf   : > { %s8702_s19 = smov (!%p215_p3, %s4380_s19), 1  ;;  %s4730_s27 = smov 16   ;;  %vm1541_vm8 = vcmask 162816   ;;  %vm1574_vm9 = vcmask 195584   ;;  %vm1607_vm10 = vcmask 228352   ;;  %vm1640_vm11 = vcmask 261120  }
  0x10   : > { %s4459_s20 = sshll.u32 %s8702_s19, 8  ;;  %s4731_s28 = smov 20   ;;  %vm1685_vm12 = vcmask 293888  }
  0x11   : > { %s4781_s23 = scalar_lea.vmem %s8493_s0, %s4459_s20  ;;  %s4732_s8 = smov 24  }
  0x12   : > { %v227_v0 = vld [vmem:[%s4781_s23 + $0x10] sm:$0xff]  ;;  %v228_v1 = vld [vmem:[%s4781_s23 + $0x18] sm:$0xff]  ;;  %v225_v2 = vld [vmem:[%s4781_s23] sm:$0xff]  ;;  %s4733_s13 = smov 28   ;;  %s4734_s16 = smov 32  }
  0x13   : > { %v273_v3 = vrot.slane %v227_v0, 1  ;;  %v322_v4 = vrot.slane %v227_v0, 7  ;;  %v323_v5 = vrot.slane %v228_v1, 7  ;;  %v226_v6 = vld [vmem:[%s4781_s23 + $0x8] sm:$0xff]  ;;  %v274_v7 = vrot.slane %v225_v2, 1  ;;  %v229_v8 = vld [vmem:[%s4781_s23 + $0x20] sm:$0xff] }
  0x14   : > { %v325_v9 = vrot.slane %v225_v2, 7  ;;  %v326_v10 = vrot.slane %v226_v6, 7  ;;  %v417_v11 = vrot.slane %v228_v1, 5  ;;  %v418_v12 = vrot.slane %v226_v6, 5  ;;  %v230_v15 = vld [vmem:[%s4781_s23 + $0x28] sm:$0xff]  ;;  %v231_v22 = vld [vmem:[%s4781_s23 + $0x30] sm:$0xff] }
  0x15   : > { %v4789_v13 = vsel %vm321_vm0, %v322_v4, %v323_v5  ;;  %v4792_v14 = vsel %vm321_vm0, %v273_v3, %v322_v4  ;;  %v275_v16 = vrot.slane %v229_v8, 1  ;;  %v328_v17 = vrot.slane %v229_v8, 7  ;;  %v232_v31 = vld [vmem:[%s4781_s23 + $0x38] sm:$0xff]  ;;  %v233_v36 = vld [vmem:[%s4781_s23 + $0x40] sm:$0xff]  ;;  %v234_v41 = vld [vmem:[%s4781_s23 + $0x48] sm:$0xff] }
  0x16   : > { %v512_v18 = vrot.slane %v4792_v14, 1  ;;  %v513_v19 = vrot.slane %v4789_v13, 1  ;;  %v4798_v20 = vsel %vm321_vm0, %v325_v9, %v326_v10  ;;  %v4801_v21 = vsel %vm321_vm0, %v274_v7, %v325_v9  ;;  %v235_v54 = vld [vmem:[%s4781_s23 + $0x50] sm:$0xff]  ;;  %v236_v59 = vld [vmem:[%s4781_s23 + $0x58] sm:$0xff]  ;;  %v237_v0 = vld [vmem:[%s4781_s23 + $0x60] sm:$0xff] }
  0x17   : > { %v517_v23 = vrot.slane %v4801_v21, 1  ;;  %v518_v24 = vrot.slane %v4798_v20, 1  ;;  %v4807_v25 = vsel %vm321_vm0, %v323_v5, %v417_v11  ;;  %v4810_v26 = vsel %vm321_vm0, %v326_v10, %v418_v12  ;;  %v238_v4 = vld [vmem:[%s4781_s23 + $0x68] sm:$0xff] }
  0x18   : > { %v4813_v27 = vsel %vm511_vm1, %v512_v18, %v513_v19  ;;  %v515_v28 = vrot.slane %v4807_v25, 1  ;;  %v520_v29 = vrot.slane %v4810_v26, 1  ;;  %v329_v30 = vrot.slane %v230_v15, 7 }
  0x19   : > { %587 = vrot.lane.b32.xlu0 %v4813_v27, %s4727_s24  ;;  %v4821_v32 = vsel %vm511_vm1, %v517_v23, %v518_v24  ;;  %v4824_v33 = vsel %vm321_vm0, %v275_v16, %v328_v17  ;;  %v419_v34 = vrot.slane %v230_v15, 5  ;;  %v276_v35 = vrot.slane %v231_v22, 1  ;;  %v240_v23 = vld [vmem:[%s4781_s23 + $0x78] sm:$0xff] }
  0x1a   : > { %591 = vrot.lane.b32.xlu1 %v4821_v32, %s4727_s24  ;;  %v4830_v37 = vsel %vm511_vm1, %v513_v19, %v515_v28  ;;  %v4833_v38 = vsel %vm511_vm1, %v518_v24, %v520_v29  ;;  %v4836_v39 = vsel %vm321_vm0, %v328_v17, %v329_v30  ;;  %v522_v40 = vrot.slane %v4824_v33, 1 }
  0x1b   : > { %v523_v42 = vrot.slane %v4836_v39, 1  ;;  %v4842_v43 = vsel %vm321_vm0, %v329_v30, %v419_v34  ;;  %v331_v44 = vrot.slane %v231_v22, 7  ;;  %v332_v45 = vrot.slane %v232_v31, 7  ;;  %v239_v22 = vld [vmem:[%s4781_s23 + $0x70] sm:$0xff]  ;;  %v241_v30 = vld [vmem:[%s4781_s23 + $0x80] sm:$0xff] }
  0x1c   : > { %v525_v46 = vrot.slane %v4842_v43, 1  ;;  %v420_v47 = vrot.slane %v232_v31, 5  ;;  %v277_v48 = vrot.slane %v233_v36, 1  ;;  %v334_v49 = vrot.slane %v233_v36, 7 }
  0x1d   : > { %589 = vrot.lane.b32.xlu0 %v4830_v37, %s4727_s24  ;;  %v4848_v50 = vsel %vm511_vm1, %v522_v40, %v523_v42  ;;  %v4851_v51 = vsel %vm321_vm0, %v331_v44, %v332_v45  ;;  %v4854_v52 = vsel %vm321_vm0, %v276_v35, %v331_v44  ;;  %v335_v53 = vrot.slane %v234_v41, 7  ;;  %v242_v40 = vld [vmem:[%s4781_s23 + $0x88] sm:$0xff] }
  0x1e   : > { %593 = vrot.lane.b32.xlu1 %v4833_v38, %s4727_s24  ;;  %v4860_v55 = vsel %vm511_vm1, %v523_v42, %v525_v46  ;;  %v527_v56 = vrot.slane %v4854_v52, 1  ;;  %v528_v57 = vrot.slane %v4851_v51, 1  ;;  %v4865_v58 = vsel %vm321_vm0, %v332_v45, %v420_v47 }
  0x1f   : > { %v530_v60 = vrot.slane %v4865_v58, 1  ;;  %v4870_v61 = vsel %vm321_vm0, %v334_v49, %v335_v53  ;;  %v4873_v62 = vsel %vm321_vm0, %v277_v48, %v334_v49  ;;  %v421_v63 = vrot.slane %v234_v41, 5 }
  0x20   : > { %v4877_v1 = vsel %vm511_vm1, %v527_v56, %v528_v57  ;;  %v532_v2 = vrot.slane %v4873_v62, 1  ;;  %v278_v3 = vrot.slane %v235_v54, 1  ;;  %v533_v5 = vrot.slane %v4870_v61, 1 }
  0x21   : > { %595 = vrot.lane.b32.xlu0 %v4848_v50, %s4727_s24  ;;  %v4885_v6 = vsel %vm321_vm0, %v335_v53, %v421_v63  ;;  %v337_v7 = vrot.slane %v235_v54, 7  ;;  %v338_v8 = vrot.slane %v236_v59, 7  ;;  %v4890_v9 = vsel %vm511_vm1, %v528_v57, %v530_v60  ;;  %v244_v60 = vld [vmem:[%s4781_s23 + $0x98] sm:$0xff] }
  0x22   : > { %597 = vrot.lane.b32.xlu1 %v4860_v55, %s4727_s24  ;;  %v535_v10 = vrot.slane %v4885_v6, 1  ;;  %v422_v11 = vrot.slane %v236_v59, 5  ;;  %v279_v12 = vrot.slane %v237_v0, 1  ;;  %v340_v17 = vrot.slane %v237_v0, 7  ;;  %v243_v59 = vld [vmem:[%s4781_s23 + $0x90] sm:$0xff] }
  0x23   : > { %v4894_v15 = vsel %vm321_vm0, %v337_v7, %v338_v8  ;;  %v4897_v16 = vsel %vm321_vm0, %v278_v3, %v337_v7  ;;  %v341_v18 = vrot.slane %v238_v4, 7  ;;  %v4907_v24 = vsel %vm511_vm1, %v532_v2, %v533_v5 }
  0x24   : > { %v4900_v19 = vsel %vm321_vm0, %v338_v8, %v422_v11  ;;  %v4910_v28 = vsel %vm511_vm1, %v533_v5, %v535_v10  ;;  %v423_v29 = vrot.slane %v238_v4, 5  ;;  %v537_v31 = vrot.slane %v4897_v16, 1 }
  0x25   : > { %599 = vrot.lane.b32.xlu0 %v4877_v1, %s4727_s24  ;;  %v538_v34 = vrot.slane %v4894_v15, 1  ;;  %v540_v35 = vrot.slane %v4900_v19, 1  ;;  %v4919_v36 = vsel %vm321_vm0, %v340_v17, %v341_v18  ;;  %v4923_v41 = vsel %vm321_vm0, %v279_v12, %v340_v17  ;;  %v245_v17 = vld [vmem:[%s4781_s23 + $0xa0] sm:$0xff] }
  0x26   : > { %601 = vrot.lane.b32.xlu1 %v4890_v9, %s4727_s24  ;;  %v280_v42 = vrot.slane %v239_v22, 1  ;;  %v343_v44 = vrot.slane %v239_v22, 7  ;;  %v344_v45 = vrot.slane %v240_v23, 7  ;;  %v4926_v46 = vsel %vm321_vm0, %v341_v18, %v423_v29  ;;  %v246_v29 = vld [vmem:[%s4781_s23 + $0xa8] sm:$0xff] }
  0x27   : > { %v424_v47 = vrot.slane %v240_v23, 5  ;;  %v281_v48 = vrot.slane %v241_v30, 1  ;;  %v346_v49 = vrot.slane %v241_v30, 7  ;;  %v347_v53 = vrot.slane %v242_v40, 7 }
  0x28   : > { %v4933_v54 = vsel %vm511_vm1, %v537_v31, %v538_v34  ;;  %v542_v56 = vrot.slane %v4923_v41, 1  ;;  %v543_v57 = vrot.slane %v4919_v36, 1  ;;  %v4940_v63 = vsel %vm511_vm1, %v538_v34, %v540_v35 }
  0x29   : > { %603 = vrot.lane.b32.xlu0 %v4907_v24, %s4727_s24  ;;  %v545_v0 = vrot.slane %v4926_v46, 1  ;;  %v4944_v2 = vsel %vm321_vm0, %v343_v44, %v344_v45  ;;  %v4947_v3 = vsel %vm321_vm0, %v280_v42, %v343_v44  ;;  %v4950_v4 = vsel %vm321_vm0, %v344_v45, %v424_v47 }
  0x2a   : > { %605 = vrot.lane.b32.xlu1 %v4910_v28, %s4727_s24  ;;  %v4953_v5 = vsel %vm321_vm0, %v281_v48, %v346_v49  ;;  %v425_v7 = vrot.slane %v242_v40, 5  ;;  %v4958_v8 = vsel %vm321_vm0, %v346_v49, %v347_v53  ;;  %v282_v10 = vrot.slane %v243_v59, 1 }
  0x2b   : > { %8565 = vst [vmem:[#allocation2_spill] sm:$0xff] %v4958_v8  ;;  %v349_v11 = vrot.slane %v243_v59, 7  ;;  %v350_v12 = vrot.slane %v244_v60, 7  ;;  %v4964_v18 = vsel %vm511_vm1, %v542_v56, %v543_v57  ;;  %v547_v22 = vrot.slane %v4947_v3, 1 }
  0x2c   : > { %v548_v23 = vrot.slane %v4944_v2, 1  ;;  %v4970_v30 = vsel %vm511_vm1, %v543_v57, %v545_v0  ;;  %v550_v31 = vrot.slane %v4950_v4, 1  ;;  %v552_v34 = vrot.slane %v4953_v5, 1  ;;  %v248_v0 = vld [vmem:[%s4781_s23 + $0xb8] sm:$0xff] }
  0x2d   : > { %607 = vrot.lane.b32.xlu0 %v4933_v54, %s4727_s24  ;;  %v553_v35 = vrot.slane %v4958_v8, 1  ;;  %v4976_v40 = vsel %vm321_vm0, %v347_v53, %v425_v7  ;;  %v426_v42 = vrot.slane %v244_v60, 5  ;;  %v283_v44 = vrot.slane %v245_v17, 1  ;;  %v247_v60 = vld [vmem:[%s4781_s23 + $0xb0] sm:$0xff]  ;;  %v250_v8 = vld [vmem:[%s4781_s23 + $0xc8] sm:$0xff] }
  0x2e   : > { %609 = vrot.lane.b32.xlu1 %v4940_v63, %s4727_s24  ;;  %8566 = vst [vmem:[#allocation3_spill] sm:$0xff] %v4976_v40  ;;  %v4981_v45 = vsel %vm321_vm0, %v349_v11, %v350_v12  ;;  %v4984_v47 = vsel %vm321_vm0, %v282_v10, %v349_v11  ;;  %v352_v48 = vrot.slane %v245_v17, 7  ;;  %v353_v49 = vrot.slane %v246_v29, 7 }
  0x2f   : > { %8567 = vst [vmem:[#allocation4_spill] sm:$0xff] %v4981_v45  ;;  %8568 = vst [vmem:[#allocation5_spill] sm:$0xff] %v4984_v47  ;;  %v4989_v56 = vsel %vm511_vm1, %v547_v22, %v548_v23  ;;  %v427_v53 = vrot.slane %v246_v29, 5  ;;  %v4992_v57 = vsel %vm511_vm1, %v548_v23, %v550_v31  ;;  %v555_v59 = vrot.slane %v4976_v40, 1 }
  0x30   : > { %v557_v7 = vrot.slane %v4984_v47, 1  ;;  %v558_v10 = vrot.slane %v4981_v45, 1  ;;  %v5000_v11 = vsel %vm321_vm0, %v350_v12, %v426_v42  ;;  %v5005_v17 = vsel %vm511_vm1, %v552_v34, %v553_v35  ;;  %v249_v45 = vld [vmem:[%s4781_s23 + $0xc0] sm:$0xff] }
  0x31   : > { %611 = vrot.lane.b32.xlu0 %v4964_v18, %s4727_s24  ;;  %8569 = vst [vmem:[#allocation6_spill] sm:$0xff] %v5000_v11  ;;  %8570 = vst [vmem:[#allocation7_spill] sm:$0xff] %v5005_v17  ;;  %v5008_v22 = vsel %vm321_vm0, %v352_v48, %v353_v49  ;;  %v5011_v23 = vsel %vm321_vm0, %v283_v44, %v352_v48  ;;  %v5016_v29 = vsel %vm321_vm0, %v353_v49, %v427_v53 }
  0x32   : > { %613 = vrot.lane.b32.xlu1 %v4970_v30, %s4727_s24  ;;  %8571 = vst [vmem:[#allocation8_spill] sm:$0xff] %v5008_v22  ;;  %8572 = vst [vmem:[#allocation9_spill] sm:$0xff] %v5011_v23  ;;  %v284_v12 = vrot.slane %v247_v60, 1  ;;  %v355_v31 = vrot.slane %v247_v60, 7  ;;  %v356_v42 = vrot.slane %v248_v0, 7  ;;  %v5020_v47 = vsel %vm511_vm1, %v553_v35, %v555_v59 }
  0x33   : > { %8573 = vst [vmem:[#allocation10_spill] sm:$0xff] %v5016_v29  ;;  %8574 = vst [vmem:[#allocation11_spill] sm:$0xff] %v5020_v47  ;;  %v560_v34 = vrot.slane %v5000_v11, 1  ;;  %v428_v40 = vrot.slane %v248_v0, 5  ;;  %v5025_v44 = vsel %vm511_vm1, %v557_v7, %v558_v10  ;;  %v562_v48 = vrot.slane %v5011_v23, 1 }
  0x34   : > { %8575 = vst [vmem:[#allocation12_spill] sm:$0xff] %v5025_v44  ;;  %v563_v49 = vrot.slane %v5008_v22, 1  ;;  %v565_v53 = vrot.slane %v5016_v29, 1  ;;  %v285_v35 = vrot.slane %v249_v45, 1  ;;  %v5035_v59 = vsel %vm321_vm0, %v355_v31, %v356_v42  ;;  %v251_v29 = vld [vmem:[%s4781_s23 + $0xd0] sm:$0xff] }
  0x35   : > { %615 = vrot.lane.b32.xlu0 %v4989_v56, %s4727_s24  ;;  %8576 = vst [vmem:[#allocation13_spill] sm:$0xff] %v5035_v59  ;;  %v5038_v60 = vsel %vm321_vm0, %v284_v12, %v355_v31  ;;  %v358_v0 = vrot.slane %v249_v45, 7  ;;  %v359_v7 = vrot.slane %v250_v8, 7  ;;  %v5041_v11 = vsel %vm511_vm1, %v558_v10, %v560_v34 }
  0x36   : > { %617 = vrot.lane.b32.xlu1 %v4992_v57, %s4727_s24  ;;  %8577 = vst [vmem:[#allocation14_spill] sm:$0xff] %v5038_v60  ;;  %8578 = vst [vmem:[#allocation15_spill] sm:$0xff] %v5041_v11  ;;  %v5044_v23 = vsel %vm321_vm0, %v356_v42, %v428_v40  ;;  %v429_v22 = vrot.slane %v250_v8, 5  ;;  %v567_v45 = vrot.slane %v5038_v60, 1  ;;  %v568_v12 = vrot.slane %v5035_v59, 1  ;;  %v253_v60 = vld [vmem:[%s4781_s23 + $0xe0] sm:$0xff] }
  0x37   : > { %8579 = vst [vmem:[#allocation16_spill] sm:$0xff] %v5044_v23  ;;  %v5058_v40 = vsel %vm511_vm1, %v563_v49, %v565_v53  ;;  %v570_v8 = vrot.slane %v5044_v23, 1  ;;  %v5062_v10 = vsel %vm321_vm0, %v358_v0, %v359_v7  ;;  %v5065_v31 = vsel %vm321_vm0, %v285_v35, %v358_v0 }
  0x38   : > { %8580 = vst [vmem:[#allocation17_spill] sm:$0xff] %v5058_v40  ;;  %8581 = vst [vmem:[#allocation18_spill] sm:$0xff] %v5065_v31  ;;  %v5068_v42 = vsel %vm321_vm0, %v359_v7, %v429_v22  ;;  %v286_v34 = vrot.slane %v251_v29, 1  ;;  %v572_v53 = vrot.slane %v5065_v31, 1 }
  0x39   : > { %619 = vrot.lane.b32.xlu0 %v5005_v17, %s4727_s24  ;;  %v252_v17 = vld [vmem:[%s4781_s23 + $0xd8] sm:$0xff]  ;;  %8582 = vst [vmem:[#allocation19_spill] sm:$0xff] %v5068_v42  ;;  %v5081_v22 = vsel %vm511_vm1, %v568_v12, %v570_v8  ;;  %v575_v35 = vrot.slane %v5068_v42, 1  ;;  %v706_v42 = vrot.slane %v4900_v19, 2 }
  0x3a   : > { %621 = vrot.lane.b32.xlu1 %v5020_v47, %s4727_s24  ;;  %v5051_v47 = vsel %vm511_vm1, %v562_v48, %v563_v49  ;;  %v361_v48 = vrot.slane %v251_v29, 7  ;;  %v362_v59 = vrot.slane %v252_v17, 7  ;;  %v5075_v49 = vsel %vm511_vm1, %v567_v45, %v568_v12 }
  0x3b   : > { %v573_v29 = vrot.slane %v5062_v10, 1  ;;  %v364_v45 = vrot.slane %v253_v60, 7 }
  0x3c   : > { %v5086_v0 = vsel %vm321_vm0, %v361_v48, %v362_v59  ;;  %v5089_v7 = vsel %vm321_vm0, %v286_v34, %v361_v48 }
  0x3d   : > { %623 = vrot.lane.b32.xlu0 %v5025_v44, %s4727_s24  ;;  %v430_v44 = vrot.slane %v252_v17, 5  ;;  %v287_v17 = vrot.slane %v253_v60, 1  ;;  %8583 = vst [vmem:[#allocation20_spill] sm:$0xff] %v5086_v0  ;;  %8584 = vst [vmem:[#allocation21_spill] sm:$0xff] %v5089_v7  ;;  %v5099_v12 = vsel %vm511_vm1, %v572_v53, %v573_v29  ;;  %v577_v8 = vrot.slane %v5089_v7, 1 }
  0x3e   : > { %625 = vrot.lane.b32.xlu1 %v5041_v11, %s4727_s24  ;;  %v254_v11 = vld [vmem:[%s4781_s23 + $0xe8] sm:$0xff]  ;;  %8586 = vst [vmem:[#allocation23_spill] sm:$0xff] %v5099_v12  ;;  %v578_v34 = vrot.slane %v5086_v0, 1  ;;  %v5104_v60 = vsel %vm511_vm1, %v573_v29, %v575_v35 }
  0x3f   : > { %v365_v23 = vrot.slane %v254_v11, 7  ;;  %v5092_v31 = vsel %vm321_vm0, %v362_v59, %v430_v44  ;;  %8587 = vst [vmem:[#allocation24_spill] sm:$0xff] %v5104_v60  ;;  %v5111_v59 = vsel %vm321_vm0, %v287_v17, %v364_v45 }
  0x40   : > { %8585 = vst [vmem:[#allocation22_spill] sm:$0xff] %v5092_v31  ;;  %v580_v44 = vrot.slane %v5092_v31, 1  ;;  %8589 = vst [vmem:[#allocation26_spill] sm:$0xff] %v5111_v59  ;;  %v5121_v53 = vsel %vm511_vm1, %v577_v8, %v578_v34  ;;  %v582_v29 = vrot.slane %v5111_v59, 1 }
  0x41   : > { %627 = vrot.lane.b32.xlu0 %v5051_v47, %s4727_s24  ;;  %8591 = vst [vmem:[#allocation28_spill] sm:$0xff] %v5121_v53 }
  0x42   : > { %629 = vrot.lane.b32.xlu1 %v5058_v40, %s4727_s24  ;;  %v431_v40 = vrot.slane %v254_v11, 5  ;;  %v5108_v11 = vsel %vm321_vm0, %v364_v45, %v365_v23  ;;  %v5126_v31 = vsel %vm511_vm1, %v578_v34, %v580_v44  ;;  %v679_v45 = vrot.slane %v4789_v13, 2 }
  0x43   : > { %8588 = vst [vmem:[#allocation25_spill] sm:$0xff] %v5108_v11  ;;  %v583_v35 = vrot.slane %v5108_v11, 1  ;;  %8592 = vst [vmem:[#allocation29_spill] sm:$0xff] %v5126_v31  ;;  %v681_v34 = vrot.slane %v4807_v25, 2  ;;  %v683_v25 = vrot.slane %v4801_v21, 2  ;;  %v696_v11 = vrot.slane %v4865_v58, 2 }
  0x44   : > { %v5114_v48 = vsel %vm321_vm0, %v365_v23, %v431_v40  ;;  %v678_v40 = vrot.slane %v4792_v14, 2 }
  0x45   : > { %631 = vrot.lane.b32.xlu0 %v5075_v49, %s4727_s24  ;;  %8590 = vst [vmem:[#allocation27_spill] sm:$0xff] %v5114_v48  ;;  %v585_v17 = vrot.slane %v5114_v48, 1  ;;  %v5134_v23 = vsel %vm511_vm1, %v582_v29, %v583_v35  ;;  %v682_v29 = vsel %vm677_vm2, %v679_v45, %v681_v34  ;;  %v1675_v34 = vld [vmem:[%s8494_s1 + $0x10] sm:$0xff] }
  0x46   : > { %633 = vrot.lane.b32.xlu1 %v5081_v22, %s4727_s24  ;;  %8593 = vst [vmem:[#allocation30_spill] sm:$0xff] %v5134_v23  ;;  %v680_v44 = vsel %vm677_vm2, %v678_v40, %v679_v45  ;;  %v686_v40 = vrot.slane %v4810_v26, 2 }
  0x47   : > { %v5139_v8 = vsel %vm511_vm1, %v583_v35, %v585_v17  ;;  %v684_v35 = vrot.slane %v4798_v20, 2 }
  0x48   : > { %8594 = vst [vmem:[#allocation31_spill] sm:$0xff] %v5139_v8 }
  0x49   : > { %635 = vrot.lane.b32.xlu0 %v5099_v12, %s4727_s24  ;;  %v685_v17 = vsel %vm677_vm2, %v683_v25, %v684_v35  ;;  %v687_v45 = vsel %vm677_vm2, %v684_v35, %v686_v40  ;;  %v1676_v25 = vld [vmem:[%s8494_s1 + $0x18] sm:$0xff] }
  0x4a   : > { %637 = vrot.lane.b32.xlu1 %v5104_v60, %s4727_s24  ;;  %v4655_v35 = vpack.c.bf16 %v1676_v25, %v1675_v34 }
  0x4d   : > { %639 = vrot.lane.b32.xlu0 %v5121_v53, %s4727_s24 }
  0x4e   : > { %641 = vrot.lane.b32.xlu1 %v5126_v31, %s4727_s24 }
  0x51   : > { %643 = vrot.lane.b32.xlu0 %v5134_v23, %s4727_s24 }
  0x52   : > { %645 = vrot.lane.b32.xlu1 %v5139_v8, %s4727_s24 }
  0x55   : > { %753 = vrot.lane.b32.xlu0 %v680_v44, %s4728_s25 }
  0x56   : > { %755 = vrot.lane.b32.xlu1 %v682_v29, %s4728_s25 }
  0x59   : > { %844 = vrot.lane.b32.xlu0 %v4801_v21, %s4729_s26 }
  0x5a   : > { %846 = vrot.lane.b32.xlu1 %v4798_v20, %s4729_s26 }
  0x5d   : > { %946 = vrot.lane.b32.xlu0 %v4821_v32, %s4730_s27  ;;  %v1673_v32 = vld [vmem:[%s8494_s1] sm:$0xff] }
  0x5e   : > { %948 = vrot.lane.b32.xlu1 %v4833_v38, %s4730_s27  ;;  %v1674_v38 = vld [vmem:[%s8494_s1 + $0x8] sm:$0xff] }
  0x5f   : > { %v4651_v26 = vpack.c.bf16 %v1674_v38, %v1673_v32 }
  0x61   : > { %1047 = vrot.lane.b32.xlu0 %v685_v17, %s4731_s28  ;;  %4652 = vmatprep.subr.bf16.mxu0 %v4651_v26 }
  0x62   : > { %757 = vrot.lane.b32.xlu1 %v685_v17, %s4728_s25  ;;  %4654 = vmatpush3.bf16.msra.mxu0 %v4651_v26  ;;  %v1677_v17 = vld [vmem:[%s8494_s1 + $0x20] sm:$0xf] }
  0x63   : > { %4656 = vmatprep.subr.bf16.mxu0 %v4655_v35 }
  0x65   : > { %1049 = vrot.lane.b32.xlu0 %v687_v45, %s4731_s28 }
  0x66   : > { %1143 = vrot.lane.b32.xlu1 %v4792_v14, %s4732_s8  ;;  %4658 = vmatpush3.bf16.msra.mxu0 %v4655_v35 }
  0x67   : > { %4543 = vmatprep.subr.msk.mxu0 %vm1782_vm3, %v1677_v17 }
  0x69   : > { %759 = vrot.lane.b32.xlu0 %v687_v45, %s4728_s25  ;;  %v691_v45 = vrot.slane %v4842_v43, 2 }
  0x6a   : > { %848 = vrot.lane.b32.xlu1 %v4792_v14, %s4729_s26  ;;  %4544 = vmatpush3.msk.msra.mxu0 %vm1782_vm3, %v1677_v17 }
  0x6d   : > { %1145 = vrot.lane.b32.xlu0 %v4789_v13, %s4732_s8 }
  0x6e   : > { %1233 = vrot.lane.b32.xlu1 %v4813_v27, %s4733_s13 }
  0x71   : > { %850 = vrot.lane.b32.xlu0 %v4789_v13, %s4729_s26 }
  0x72   : > { %950 = vrot.lane.b32.xlu1 %v4813_v27, %s4730_s27  ;;  %v688_v27 = vrot.slane %v4824_v33, 2 }
  0x75   : > { %1235 = vrot.lane.b32.xlu0 %v4830_v37, %s4733_s13 }
  0x76   : > { %1323 = vrot.lane.b32.xlu1 %v680_v44, %s4734_s16 }
  0x79   : > { %952 = vrot.lane.b32.xlu0 %v4830_v37, %s4730_s27  ;;  %v689_v37 = vrot.slane %v4836_v39, 2 }
  0x7a   : > { %1051 = vrot.lane.b32.xlu1 %v680_v44, %s4731_s28 }
  0x7d   : > { %1325 = vrot.lane.b32.xlu0 %v682_v29, %s4734_s16 }
  0x7e   : > { %1053 = vrot.lane.b32.xlu1 %v682_v29, %s4731_s28  ;;  %v690_v29 = vsel %vm677_vm2, %v688_v27, %v689_v37 }
  0x81   : > { %1147 = vrot.lane.b32.xlu0 %v4824_v33, %s4732_s8 }
  0x82   : > { %852 = vrot.lane.b32.xlu1 %v4824_v33, %s4729_s26 }
  0x85   : > { %1149 = vrot.lane.b32.xlu0 %v4836_v39, %s4732_s8 }
  0x86   : > { %1237 = vrot.lane.b32.xlu1 %v4848_v50, %s4733_s13 }
  0x89   : > { %854 = vrot.lane.b32.xlu0 %v4836_v39, %s4729_s26 }
  0x8a   : > { %954 = vrot.lane.b32.xlu1 %v4848_v50, %s4730_s27  ;;  %v692_v50 = vsel %vm677_vm2, %v689_v37, %v691_v45  ;;  %v694_v45 = vrot.slane %v4851_v51, 2 }
  0x8b   : > { %v5218_v44 = vpop.permute.xlu0 %587 }
  0x8c   : > { %v5221_v40 = vpop.permute.xlu1 %591 }
  0x8d   : > { %1239 = vrot.lane.b32.xlu0 %v4860_v55, %s4733_s13 }
  0x8e   : > { %1327 = vrot.lane.b32.xlu1 %v690_v29, %s4734_s16 }
  0x8f   : > { %v5227_v32 = vpop.permute.xlu0 %589 }
  0x90   : > { %v5229_v38 = vpop.permute.xlu1 %593 }
  0x91   : > { %956 = vrot.lane.b32.xlu0 %v4860_v55, %s4730_s27 }
  0x92   : > { %1055 = vrot.lane.b32.xlu1 %v690_v29, %s4731_s28 }
  0x93   : > { %v5235_v26 = vpop.permute.xlu0 %595 }
  0x94   : > { %v5237_v34 = vpop.permute.xlu1 %597 }
  0x95   : > { %1329 = vrot.lane.b32.xlu0 %v692_v50, %s4734_s16 }
  0x96   : > { %761 = vrot.lane.b32.xlu1 %v690_v29, %s4728_s25  ;;  %v693_v29 = vrot.slane %v4854_v52, 2 }
  0x97   : > { %v5241_v43 = vpop.permute.xlu0 %599 }
  0x98   : > { %v5243_v25 = vpop.permute.xlu1 %601  ;;  %v695_v8 = vsel %vm677_vm2, %v693_v29, %v694_v45 }
  0x99   : > { %1057 = vrot.lane.b32.xlu0 %v692_v50, %s4731_s28 }
  0x9a   : > { %1151 = vrot.lane.b32.xlu1 %v4854_v52, %s4732_s8 }
  0x9b   : > { %v5248_v55 = vpop.permute.xlu0 %603 }
  0x9c   : > { %v5250_v35 = vpop.permute.xlu1 %605 }
  0x9d   : > { %763 = vrot.lane.b32.xlu0 %v692_v50, %s4728_s25 }
  0x9e   : > { %856 = vrot.lane.b32.xlu1 %v4854_v52, %s4729_s26 }
  0x9f   : > { %v5255_v17 = vpop.permute.xlu0 %607 }
  0xa0   : > { %v5257_v27 = vpop.permute.xlu1 %609 }
  0xa1   : > { %1153 = vrot.lane.b32.xlu0 %v4851_v51, %s4732_s8 }
  0xa2   : > { %1241 = vrot.lane.b32.xlu1 %v4877_v1, %s4733_s13 }
  0xa3   : > { %v5263_v37 = vpop.permute.xlu0 %611 }
  0xa4   : > { %8595 = vst [vmem:[#allocation32_spill] sm:$0xff] %v5263_v37  ;;  %v5267_v50 = vpop.permute.xlu1 %613 }
  0xa5   : > { %8596 = vst [vmem:[#allocation33_spill] sm:$0xff] %v5267_v50  ;;  %858 = vrot.lane.b32.xlu0 %v4851_v51, %s4729_s26  ;;  %v1414_v50 = vsel %vm1413_vm4, %v4792_v14, %v5218_v44 }
  0xa6   : > { %958 = vrot.lane.b32.xlu1 %v4877_v1, %s4730_s27  ;;  %v697_v1 = vsel %vm677_vm2, %v694_v45, %v696_v11 }
  0xa7   : > { %v5273_v48 = vpop.permute.xlu0 %615 }
  0xa8   : > { %8597 = vst [vmem:[#allocation34_spill] sm:$0xff] %v5273_v48  ;;  %v5276_v23 = vpop.permute.xlu1 %617  ;;  %v704_v48 = vrot.slane %v4894_v15, 2 }
  0xa9   : > { %8598 = vst [vmem:[#allocation35_spill] sm:$0xff] %v5276_v23  ;;  %1243 = vrot.lane.b32.xlu0 %v4890_v9, %s4733_s13 }
  0xaa   : > { %1331 = vrot.lane.b32.xlu1 %v695_v8, %s4734_s16  ;;  %v707_v19 = vsel %vm677_vm2, %v704_v48, %v706_v42 }
  0xab   : > { %v5282_v59 = vpop.permute.xlu0 %619 }
  0xac   : > { %8599 = vst [vmem:[#allocation36_spill] sm:$0xff] %v5282_v59  ;;  %v5284_v31 = vpop.permute.xlu1 %621 }
  0xad   : > { %8600 = vst [vmem:[#allocation37_spill] sm:$0xff] %v5284_v31  ;;  %960 = vrot.lane.b32.xlu0 %v4890_v9, %s4730_s27 }
  0xae   : > { %1059 = vrot.lane.b32.xlu1 %v695_v8, %s4731_s28 }
  0xaf   : > { %v5290_v29 = vpop.permute.xlu0 %623 }
  0xb0   : > { %8601 = vst [vmem:[#allocation38_spill] sm:$0xff] %v5290_v29  ;;  %v5292_v23 = vpop.permute.xlu1 %625 }
  0xb1   : > { %8602 = vst [vmem:[#allocation39_spill] sm:$0xff] %v5292_v23  ;;  %1333 = vrot.lane.b32.xlu0 %v697_v1, %s4734_s16 }
  0xb2   : > { %765 = vrot.lane.b32.xlu1 %v695_v8, %s4728_s25 }
  0xb3   : > { %v5296_v58 = vpop.permute.xlu0 %627 }
  0xb4   : > { %8603 = vst [vmem:[#allocation40_spill] sm:$0xff] %v5296_v58  ;;  %v5298_v59 = vpop.permute.xlu1 %629 }
  0xb5   : > { %8604 = vst [vmem:[#allocation41_spill] sm:$0xff] %v5298_v59  ;;  %1061 = vrot.lane.b32.xlu0 %v697_v1, %s4731_s28 }
  0xb6   : > { %1155 = vrot.lane.b32.xlu1 %v4873_v62, %s4732_s8 }
  0xb7   : > { %v5303_v9 = vpop.permute.xlu0 %631 }
  0xb8   : > { %8605 = vst [vmem:[#allocation42_spill] sm:$0xff] %v5303_v9  ;;  %v5305_v11 = vpop.permute.xlu1 %633  ;;  %v698_v9 = vrot.slane %v4873_v62, 2 }
  0xb9   : > { %8606 = vst [vmem:[#allocation43_spill] sm:$0xff] %v5305_v11  ;;  %767 = vrot.lane.b32.xlu0 %v697_v1, %s4728_s25  ;;  %v699_v11 = vrot.slane %v4870_v61, 2 }
  0xba   : > { %860 = vrot.lane.b32.xlu1 %v4873_v62, %s4729_s26 }
  0xbb   : > { %v5310_v45 = vpop.permute.xlu0 %635 }
  0xbc   : > { %8607 = vst [vmem:[#allocation44_spill] sm:$0xff] %v5310_v45  ;;  %v5312_v8 = vpop.permute.xlu1 %637  ;;  %v700_v45 = vsel %vm677_vm2, %v698_v9, %v699_v11 }
  0xbd   : > { %8608 = vst [vmem:[#allocation45_spill] sm:$0xff] %v5312_v8  ;;  %1157 = vrot.lane.b32.xlu0 %v4870_v61, %s4732_s8 }
  0xbe   : > { %1245 = vrot.lane.b32.xlu1 %v4907_v24, %s4733_s13 }
  0xbf   : > { %v5318_v59 = vpop.permute.xlu0 %639 }
  0xc0   : > { %8609 = vst [vmem:[#allocation46_spill] sm:$0xff] %v5318_v59  ;;  %v5322_v1 = vpop.permute.xlu1 %641  ;;  %v701_v59 = vrot.slane %v4885_v6, 2 }
  0xc1   : > { %8610 = vst [vmem:[#allocation47_spill] sm:$0xff] %v5322_v1  ;;  %862 = vrot.lane.b32.xlu0 %v4870_v61, %s4729_s26 }
  0xc2   : > { %962 = vrot.lane.b32.xlu1 %v4907_v24, %s4730_s27  ;;  %v702_v24 = vsel %vm677_vm2, %v699_v11, %v701_v59 }
  0xc3   : > { %v5328_v8 = vpop.permute.xlu0 %643 }
  0xc4   : > { %8611 = vst [vmem:[#allocation48_spill] sm:$0xff] %v5328_v8  ;;  %v5331_v58 = vpop.permute.xlu1 %645 }
  0xc5   : > { %8612 = vst [vmem:[#allocation49_spill] sm:$0xff] %v5331_v58  ;;  %1247 = vrot.lane.b32.xlu0 %v4910_v28, %s4733_s13 }
  0xc6   : > { %1335 = vrot.lane.b32.xlu1 %v700_v45, %s4734_s16 }
  0xc7   : > { %v754_v1 = vpop.permute.xlu0 %753 }
  0xc8   : > { %v756_v23 = vpop.permute.xlu1 %755 }
  0xc9   : > { %964 = vrot.lane.b32.xlu0 %v4910_v28, %s4730_s27 }
  0xca   : > { %1063 = vrot.lane.b32.xlu1 %v700_v45, %s4731_s28 }
  0xcb   : > { %v845_v8 = vpop.permute.xlu0 %844 }
  0xcc   : > { %v847_v9 = vpop.permute.xlu1 %846 }
  0xcd   : > { %1337 = vrot.lane.b32.xlu0 %v702_v24, %s4734_s16 }
  0xce   : > { %769 = vrot.lane.b32.xlu1 %v700_v45, %s4728_s25  ;;  %v703_v45 = vrot.slane %v4897_v16, 2 }
  0xcf   : > { %v947_v58 = vpop.permute.xlu0 %946 }
  0xd0   : > { %v949_v29 = vpop.permute.xlu1 %948  ;;  %v705_v0 = vsel %vm677_vm2, %v703_v45, %v704_v48 }
  0xd1   : > { %1065 = vrot.lane.b32.xlu0 %v702_v24, %s4731_s28 }
  0xd2   : > { %1159 = vrot.lane.b32.xlu1 %v4897_v16, %s4732_s8 }
  0xd3   : > { %v1048_v6 = vpop.permute.xlu0 %1047 }
  0xd4   : > { %v5346_v31 = vpop.permute.xlu1 %757 }
  0xd5   : > { %771 = vrot.lane.b32.xlu0 %v702_v24, %s4728_s25 }
  0xd6   : > { %864 = vrot.lane.b32.xlu1 %v4897_v16, %s4729_s26 }
  0xd7   : > { %v1050_v28 = vpop.permute.xlu0 %1049 }
  0xd8   : > { %v1144_v59 = vpop.permute.xlu1 %1143 }
  0xd9   : > { %1161 = vrot.lane.b32.xlu0 %v4894_v15, %s4732_s8 }
  0xda   : > { %1249 = vrot.lane.b32.xlu1 %v4933_v54, %s4733_s13 }
  0xdb   : > { %v5355_v11 = vpop.permute.xlu0 %759 }
  0xdc   : > { %v5359_v53 = vpop.permute.xlu1 %848 }
  0xdd   : > { %866 = vrot.lane.b32.xlu0 %v4894_v15, %s4729_s26 }
  0xde   : > { %966 = vrot.lane.b32.xlu1 %v4933_v54, %s4730_s27  ;;  %v5374_v54 = vsel %vm1444_vm5, %v1414_v50, %v754_v1 }
  0xdf   : > { %v1146_v24 = vpop.permute.xlu0 %1145  ;;  %v1476_v60 = vsel %vm1475_vm6, %v5374_v54, %v845_v8 }
  0xe0   : > { %v1234_v7 = vpop.permute.xlu1 %1233  ;;  %v1509_v12 = vsel %vm1508_vm7, %v1476_v60, %v947_v58  ;;  %v1415_v60 = vsel %vm1413_vm4, %v4789_v13, %v5227_v32 }
  0xe1   : > { %1251 = vrot.lane.b32.xlu0 %v4940_v63, %s4733_s13  ;;  %v1542_v14 = vsel %vm1541_vm8, %v1509_v12, %v1048_v6  ;;  %v5394_v12 = vsel %vm1444_vm5, %v1415_v60, %v756_v23 }
  0xe2   : > { %1339 = vrot.lane.b32.xlu1 %v705_v0, %s4734_s16  ;;  %v1575_v44 = vsel %vm1574_vm9, %v1542_v14, %v1144_v59  ;;  %v1477_v42 = vsel %vm1475_vm6, %v5394_v12, %v847_v9  ;;  %v709_v14 = vrot.slane %v4919_v36, 2 }
  0xe3   : > { %v5376_v45 = vpop.permute.xlu0 %850  ;;  %v1608_v8 = vsel %vm1607_vm10, %v1575_v44, %v1234_v7  ;;  %v1510_v48 = vsel %vm1508_vm7, %v1477_v42, %v949_v29  ;;  %v1416_v44 = vsel %vm1413_vm4, %v4801_v21, %v5221_v40 }
  0xe4   : > { %v951_v37 = vpop.permute.xlu1 %950  ;;  %v1543_v13 = vsel %vm1541_vm8, %v1510_v48, %v1050_v28 }
  0xe5   : > { %968 = vrot.lane.b32.xlu0 %v4940_v63, %s4730_s27  ;;  %v1576_v32 = vsel %vm1574_vm9, %v1543_v13, %v1146_v24  ;;  %v708_v24 = vrot.slane %v4923_v41, 2 }
  0xe6   : > { %1067 = vrot.lane.b32.xlu1 %v705_v0, %s4731_s28 }
  0xe7   : > { %v1236_v50 = vpop.permute.xlu0 %1235 }
  0xe8   : > { %v1324_v1 = vpop.permute.xlu1 %1323 }
  0xe9   : > { %1341 = vrot.lane.b32.xlu0 %v707_v19, %s4734_s16  ;;  %v1641_v63 = vsel %vm1640_vm11, %v1608_v8, %v1324_v1  ;;  %v710_v1 = vsel %vm677_vm2, %v708_v24, %v709_v14 }
  0xea   : > { %773 = vrot.lane.b32.xlu1 %v705_v0, %s4728_s25  ;;  %4545 = vmatprep.mubr.msk.f32.mxu0 %vm1685_vm12, %v1641_v63  ;;  %v1609_v0 = vsel %vm1607_vm10, %v1576_v32, %v1236_v50  ;;  %v1447_v50 = vsel %vm1444_vm5, %v1416_v44, %v5346_v31  ;;  %v714_v44 = vrot.slane %v4944_v2, 2 }
  0xeb   : > { %v953_v7 = vpop.permute.xlu0 %952  ;;  %v1478_v60 = vsel %vm1475_vm6, %v1447_v50, %v5359_v53  ;;  %v1417_v53 = vsel %vm1413_vm4, %v4798_v20, %v5229_v38 }
  0xec   : > { %v1052_v58 = vpop.permute.xlu1 %1051  ;;  %v1511_v42 = vsel %vm1508_vm7, %v1478_v60, %v951_v37 }
  0xed   : > { %1069 = vrot.lane.b32.xlu0 %v707_v19, %s4731_s28  ;;  %v1544_v21 = vsel %vm1541_vm8, %v1511_v42, %v1052_v58  ;;  %v1448_v58 = vsel %vm1444_vm5, %v1417_v53, %v5355_v11 }
  0xee   : > { %1163 = vrot.lane.b32.xlu1 %v4923_v41, %s4732_s8  ;;  %v1479_v32 = vsel %vm1475_vm6, %v1448_v58, %v5376_v45 }
  0xef   : > { %v1326_v23 = vpop.permute.xlu0 %1325  ;;  %v1512_v20 = vsel %vm1508_vm7, %v1479_v32, %v953_v7 }
  0xf0   : > { %v1642_v6 = vsel %vm1640_vm11, %v1609_v0, %v1326_v23  ;;  %v1054_v59 = vpop.permute.xlu1 %1053 }
  0xf1   : > { %775 = vrot.lane.b32.xlu0 %v707_v19, %s4728_s25  ;;  %4546 = vmatmul.mubr.msk.f32.vlgmr.msra.gmra.mrb[0].mxu0 %vm1685_vm12, %v1642_v6  ;;  %v1545_v23 = vsel %vm1541_vm8, %v1512_v20, %v1054_v59 }
  0xf2   : > { %868 = vrot.lane.b32.xlu1 %v4923_v41, %s4729_s26 }
  0xf3   : > { %v1148_v29 = vpop.permute.xlu0 %1147 }
  0xf4   : > { %v5412_v9 = vpop.permute.xlu1 %852  ;;  %v1577_v31 = vsel %vm1574_vm9, %v1544_v21, %v1148_v29 }
  0xf5   : > { %1165 = vrot.lane.b32.xlu0 %v4919_v36, %s4732_s8  ;;  %v1480_v42 = vsel %vm1475_vm6, %v5374_v54, %v5412_v9 }
  0xf6   : > { %1253 = vrot.lane.b32.xlu1 %v4964_v18, %s4733_s13 }
  0xf7   : > { %v1150_v28 = vpop.permute.xlu0 %1149 }
  0xf8   : > { %v1238_v19 = vpop.permute.xlu1 %1237 }
  0xf9   : > { %870 = vrot.lane.b32.xlu0 %v4919_v36, %s4729_s26  ;;  %v1610_v48 = vsel %vm1607_vm10, %v1577_v31, %v1238_v19  ;;  %v713_v19 = vrot.slane %v4947_v3, 2 }
  0xfa   : > { %970 = vrot.lane.b32.xlu1 %v4964_v18, %s4730_s27  ;;  %v711_v18 = vrot.slane %v4926_v46, 2 }
  0xfb   : > { %v5429_v8 = vpop.permute.xlu0 %854  ;;  %v715_v60 = vsel %vm677_vm2, %v713_v19, %v714_v44  ;;  %v1418_v19 = vsel %vm1413_vm4, %v4824_v33, %v5235_v26  ;;  %v8616_v26 = vld [vmem:[#allocation3_spill] sm:$0xff] }
  0xfc   : > { %v955_v63 = vpop.permute.xlu1 %954  ;;  %v712_v46 = vsel %vm677_vm2, %v709_v14, %v711_v18 }
  0xfd   : > { %1255 = vrot.lane.b32.xlu0 %v4970_v30, %s4733_s13  ;;  %v1513_v18 = vsel %vm1508_vm7, %v1480_v42, %v955_v63 }
  0xfe   : > { %1343 = vrot.lane.b32.xlu1 %v710_v1, %s4734_s16 }
  0xff   : > { %v1240_v40 = vpop.permute.xlu0 %1239 }
 0x100   : > { %v1328_v13 = vpop.permute.xlu1 %1327 }
 0x101   : > { %v1643_v37 = vsel %vm1640_vm11, %v1610_v48, %v1328_v13  ;;  %972 = vrot.lane.b32.xlu0 %v4970_v30, %s4730_s27  ;;  %v1578_v30 = vsel %vm1574_vm9, %v1545_v23, %v1150_v28 }
 0x102   : > { %1071 = vrot.lane.b32.xlu1 %v710_v1, %s4731_s28  ;;  %4548 = vmatprep.mubr.msk.f32.mxu0 %vm1685_vm12, %v1643_v37  ;;  %v1611_v11 = vsel %vm1607_vm10, %v1578_v30, %v1240_v40 }
 0x103   : > { %v957_v0 = vpop.permute.xlu0 %956 }
 0x104   : > { %v1056_v38 = vpop.permute.xlu1 %1055 }
 0x105   : > { %1345 = vrot.lane.b32.xlu0 %v712_v46, %s4734_s16  ;;  %v1546_v31 = vsel %vm1541_vm8, %v1513_v18, %v1056_v38 }
 0x106   : > { %777 = vrot.lane.b32.xlu1 %v710_v1, %s4728_s25 }
 0x107   : > { %v1330_v6 = vpop.permute.xlu0 %1329 }
 0x108   : > { %v1644_v29 = vsel %vm1640_vm11, %v1611_v11, %v1330_v6  ;;  %v5462_v24 = vpop.permute.xlu1 %761  ;;  %v8613_v11 = vld [vmem:[#allocation2_spill] sm:$0xff]  ;;  %v8614_v6 = vld [vmem:[#allocation7_spill] sm:$0xff] }
 0x109   : > { %1073 = vrot.lane.b32.xlu0 %v712_v46, %s4731_s28  ;;  %4549 = vmatmul.mubr.msk.f32.gmra.mrb[2].mxu0 %vm1685_vm12, %v1644_v29 }
 0x10a   : > { %1167 = vrot.lane.b32.xlu1 %v4947_v3, %s4732_s8 }
 0x10b   : > { %v1058_v45 = vpop.permute.xlu0 %1057 }
 0x10c   : > { %v1152_v7 = vpop.permute.xlu1 %1151 }
 0x10d   : > { %779 = vrot.lane.b32.xlu0 %v712_v46, %s4728_s25  ;;  %v1579_v40 = vsel %vm1574_vm9, %v1546_v31, %v1152_v7  ;;  %v719_v7 = vrot.slane %v8613_v11, 2 }
 0x10e   : > { %872 = vrot.lane.b32.xlu1 %v4947_v3, %s4729_s26 }
 0x10f   : > { %v5471_v59 = vpop.permute.xlu0 %763 }
 0x110   : > { %v857_v28 = vpop.permute.xlu1 %856 }
 0x111   : > { %1169 = vrot.lane.b32.xlu0 %v4944_v2, %s4732_s8 }
 0x112   : > { %1257 = vrot.lane.b32.xlu1 %v4989_v56, %s4733_s13 }
 0x113   : > { %v1154_v14 = vpop.permute.xlu0 %1153 }
 0x114   : > { %v1242_v50 = vpop.permute.xlu1 %1241 }
 0x115   : > { %874 = vrot.lane.b32.xlu0 %v4944_v2, %s4729_s26  ;;  %v1612_v13 = vsel %vm1607_vm10, %v1579_v40, %v1242_v50  ;;  %v721_v40 = vrot.slane %v8616_v26, 2 }
 0x116   : > { %974 = vrot.lane.b32.xlu1 %v4989_v56, %s4730_s27  ;;  %v716_v56 = vrot.slane %v4950_v4, 2  ;;  %v1481_v4 = vsel %vm1475_vm6, %v5394_v12, %v5429_v8 }
 0x117   : > { %v5483_v1 = vpop.permute.xlu0 %858  ;;  %v1514_v37 = vsel %vm1508_vm7, %v1481_v4, %v957_v0 }
 0x118   : > { %v959_v21 = vpop.permute.xlu1 %958  ;;  %v717_v9 = vsel %vm677_vm2, %v714_v44, %v716_v56  ;;  %v1547_v46 = vsel %vm1541_vm8, %v1514_v37, %v1058_v45  ;;  %v718_v45 = vrot.slane %v4953_v5, 2  ;;  %v1449_v44 = vsel %vm1444_vm5, %v1418_v19, %v5462_v24  ;;  %v8615_v56 = vld [vmem:[#allocation11_spill] sm:$0xff] }
 0x119   : > { %1259 = vrot.lane.b32.xlu0 %v4992_v57, %s4733_s13  ;;  %v1482_v42 = vsel %vm1475_vm6, %v1449_v44, %v857_v28  ;;  %v1419_v28 = vsel %vm1413_vm4, %v4836_v39, %v5237_v34  ;;  %v1420_v44 = vsel %vm1413_vm4, %v4854_v52, %v5241_v43  ;;  %v8621_v43 = vld [vmem:[#allocation6_spill] sm:$0xff] }
 0x11a   : > { %1347 = vrot.lane.b32.xlu1 %v715_v60, %s4734_s16  ;;  %v1515_v31 = vsel %vm1508_vm7, %v1482_v42, %v959_v21 }
 0x11b   : > { %v1244_v48 = vpop.permute.xlu0 %1243 }
 0x11c   : > { %v1332_v53 = vpop.permute.xlu1 %1331 }
 0x11d   : > { %v1645_v54 = vsel %vm1640_vm11, %v1612_v13, %v1332_v53  ;;  %976 = vrot.lane.b32.xlu0 %v4992_v57, %s4730_s27  ;;  %v1580_v57 = vsel %vm1574_vm9, %v1547_v46, %v1154_v14 }
 0x11e   : > { %1075 = vrot.lane.b32.xlu1 %v715_v60, %s4731_s28  ;;  %4551 = vmatprep.mubr.msk.f32.mxu0 %vm1685_vm12, %v1645_v54  ;;  %v1613_v32 = vsel %vm1607_vm10, %v1580_v57, %v1244_v48  ;;  %v1450_v54 = vsel %vm1444_vm5, %v1419_v28, %v5471_v59 }
 0x11f   : > { %v961_v63 = vpop.permute.xlu0 %960  ;;  %v1483_v4 = vsel %vm1475_vm6, %v1450_v54, %v5483_v1  ;;  %v8617_v1 = vld [vmem:[#allocation5_spill] sm:$0xff] }
 0x120   : > { %v1060_v58 = vpop.permute.xlu1 %1059  ;;  %v1516_v39 = vsel %vm1508_vm7, %v1483_v4, %v961_v63 }
 0x121   : > { %1349 = vrot.lane.b32.xlu0 %v717_v9, %s4734_s16  ;;  %v1548_v33 = vsel %vm1541_vm8, %v1515_v31, %v1060_v58 }
 0x122   : > { %781 = vrot.lane.b32.xlu1 %v715_v60, %s4728_s25  ;;  %v720_v60 = vsel %vm677_vm2, %v718_v45, %v719_v7 }
 0x123   : > { %v1334_v20 = vpop.permute.xlu0 %1333 }
 0x124   : > { %v1646_v38 = vsel %vm1640_vm11, %v1613_v32, %v1334_v20  ;;  %v5513_v23 = vpop.permute.xlu1 %765 }
 0x125   : > { %1077 = vrot.lane.b32.xlu0 %v717_v9, %s4731_s28  ;;  %4552 = vmatmul.mubr.msk.f32.gmra.mrb[4].mxu0 %vm1685_vm12, %v1646_v38 }
 0x126   : > { %1171 = vrot.lane.b32.xlu1 %v4953_v5, %s4732_s8 }
 0x127   : > { %v1062_v12 = vpop.permute.xlu0 %1061 }
 0x128   : > { %v1156_v8 = vpop.permute.xlu1 %1155  ;;  %v1549_v58 = vsel %vm1541_vm8, %v1516_v39, %v1062_v12 }
 0x129   : > { %783 = vrot.lane.b32.xlu0 %v717_v9, %s4728_s25  ;;  %v1581_v24 = vsel %vm1574_vm9, %v1548_v33, %v1156_v8  ;;  %v722_v9 = vsel %vm677_vm2, %v719_v7, %v721_v40  ;;  %v723_v7 = vrot.slane %v8617_v1, 2  ;;  %v8620_v40 = vld [vmem:[#allocation15_spill] sm:$0xff] }
 0x12a   : > { %876 = vrot.lane.b32.xlu1 %v4953_v5, %s4729_s26 }
 0x12b   : > { %v5522_v0 = vpop.permute.xlu0 %767 }
 0x12c   : > { %v5524_v30 = vpop.permute.xlu1 %860 }
 0x12d   : > { %1173 = vrot.lane.b32.xlu0 %v8613_v11, %s4732_s8 }
 0x12e   : > { %1261 = vrot.lane.b32.xlu1 %v8614_v6, %s4733_s13 }
 0x12f   : > { %v1158_v29 = vpop.permute.xlu0 %1157 }
 0x130   : > { %v1246_v14 = vpop.permute.xlu1 %1245  ;;  %v1582_v46 = vsel %vm1574_vm9, %v1549_v58, %v1158_v29  ;;  %v8619_v29 = vld [vmem:[#allocation12_spill] sm:$0xff] }
 0x131   : > { %878 = vrot.lane.b32.xlu0 %v8613_v11, %s4729_s26  ;;  %v1614_v13 = vsel %vm1607_vm10, %v1581_v24, %v1246_v14  ;;  %v726_v24 = vrot.slane %v8621_v43, 2 }
 0x132   : > { %978 = vrot.lane.b32.xlu1 %v8614_v6, %s4730_s27  ;;  %v8618_v6 = vld [vmem:[#allocation4_spill] sm:$0xff] }
 0x133   : > { %v5541_v50 = vpop.permute.xlu0 %862  ;;  %v724_v14 = vrot.slane %v8618_v6, 2 }
 0x134   : > { %v963_v18 = vpop.permute.xlu1 %962 }
 0x135   : > { %1263 = vrot.lane.b32.xlu0 %v8615_v56, %s4733_s13  ;;  %v725_v31 = vsel %vm677_vm2, %v723_v7, %v724_v14 }
 0x136   : > { %1351 = vrot.lane.b32.xlu1 %v720_v60, %s4734_s16 }
 0x137   : > { %v1248_v48 = vpop.permute.xlu0 %1247 }
 0x138   : > { %v1336_v53 = vpop.permute.xlu1 %1335  ;;  %v1615_v59 = vsel %vm1607_vm10, %v1582_v46, %v1248_v48 }
 0x139   : > { %v1647_v21 = vsel %vm1640_vm11, %v1614_v13, %v1336_v53  ;;  %980 = vrot.lane.b32.xlu0 %v8615_v56, %s4730_s27 }
 0x13a   : > { %1079 = vrot.lane.b32.xlu1 %v720_v60, %s4731_s28  ;;  %4554 = vmatprep.mubr.msk.f32.mxu0 %vm1685_vm12, %v1647_v21  ;;  %v727_v21 = vsel %vm677_vm2, %v724_v14, %v726_v24  ;;  %v1422_v14 = vsel %vm1413_vm4, %v4873_v62, %v5248_v55 }
 0x13b   : > { %v965_v37 = vpop.permute.xlu0 %964 }
 0x13c   : > { %v1064_v34 = vpop.permute.xlu1 %1063 }
 0x13d   : > { %1353 = vrot.lane.b32.xlu0 %v722_v9, %s4734_s16 }
 0x13e   : > { %785 = vrot.lane.b32.xlu1 %v720_v60, %s4728_s25  ;;  %v1451_v60 = vsel %vm1444_vm5, %v1420_v44, %v5513_v23 }
 0x13f   : > { %v1338_v57 = vpop.permute.xlu0 %1337  ;;  %v1484_v56 = vsel %vm1475_vm6, %v1451_v60, %v5524_v30  ;;  %v1421_v30 = vsel %vm1413_vm4, %v4851_v51, %v5243_v25 }
 0x140   : > { %v1648_v32 = vsel %vm1640_vm11, %v1615_v59, %v1338_v57  ;;  %v5573_v20 = vpop.permute.xlu1 %769  ;;  %v1517_v26 = vsel %vm1508_vm7, %v1484_v56, %v963_v18  ;;  %v1452_v28 = vsel %vm1444_vm5, %v1421_v30, %v5522_v0 }
 0x141   : > { %1081 = vrot.lane.b32.xlu0 %v722_v9, %s4731_s28  ;;  %4555 = vmatmul.mubr.msk.f32.gmra.mrb[6].mxu0 %vm1685_vm12, %v1648_v32  ;;  %v1550_v52 = vsel %vm1541_vm8, %v1517_v26, %v1064_v34  ;;  %v1485_v54 = vsel %vm1475_vm6, %v1452_v28, %v5541_v50  ;;  %v8622_v50 = vld [vmem:[#allocation9_spill] sm:$0xff] }
 0x142   : > { %1175 = vrot.lane.b32.xlu1 %v8617_v1, %s4732_s8  ;;  %v1518_v51 = vsel %vm1508_vm7, %v1485_v54, %v965_v37 }
 0x143   : > { %v1066_v63 = vpop.permute.xlu0 %1065 }
 0x144   : > { %v1160_v38 = vpop.permute.xlu1 %1159  ;;  %v1551_v4 = vsel %vm1541_vm8, %v1518_v51, %v1066_v63  ;;  %v8623_v63 = vld [vmem:[#allocation8_spill] sm:$0xff] }
 0x145   : > { %787 = vrot.lane.b32.xlu0 %v722_v9, %s4728_s25  ;;  %v1583_v23 = vsel %vm1574_vm9, %v1550_v52, %v1160_v38 }
 0x146   : > { %880 = vrot.lane.b32.xlu1 %v8617_v1, %s4729_s26 }
 0x147   : > { %v5582_v12 = vpop.permute.xlu0 %771 }
 0x148   : > { %v5584_v8 = vpop.permute.xlu1 %864 }
 0x149   : > { %1177 = vrot.lane.b32.xlu0 %v8618_v6, %s4732_s8 }
 0x14a   : > { %1265 = vrot.lane.b32.xlu1 %v8619_v29, %s4733_s13 }
 0x14b   : > { %v1162_v45 = vpop.permute.xlu0 %1161 }
 0x14c   : > { %v1250_v19 = vpop.permute.xlu1 %1249  ;;  %v1584_v39 = vsel %vm1574_vm9, %v1551_v4, %v1162_v45  ;;  %v729_v45 = vrot.slane %v8623_v63, 2 }
 0x14d   : > { %882 = vrot.lane.b32.xlu0 %v8618_v6, %s4729_s26  ;;  %v1616_v13 = vsel %vm1607_vm10, %v1583_v23, %v1250_v19  ;;  %v1453_v19 = vsel %vm1444_vm5, %v1422_v14, %v5573_v20 }
 0x14e   : > { %982 = vrot.lane.b32.xlu1 %v8619_v29, %s4730_s27  ;;  %v728_v29 = vrot.slane %v8622_v50, 2 }
 0x14f   : > { %v5601_v42 = vpop.permute.xlu0 %866 }
 0x150   : > { %v967_v33 = vpop.permute.xlu1 %966  ;;  %v730_v60 = vsel %vm677_vm2, %v728_v29, %v729_v45 }
 0x151   : > { %1267 = vrot.lane.b32.xlu0 %v8620_v40, %s4733_s13 }
 0x152   : > { %1355 = vrot.lane.b32.xlu1 %v725_v31, %s4734_s16 }
 0x153   : > { %v1252_v48 = vpop.permute.xlu0 %1251 }
 0x154   : > { %v1340_v53 = vpop.permute.xlu1 %1339  ;;  %v1617_v0 = vsel %vm1607_vm10, %v1584_v39, %v1252_v48  ;;  %v8627_v39 = vld [vmem:[#allocation13_spill] sm:$0xff] }
 0x155   : > { %v1649_v18 = vsel %vm1640_vm11, %v1616_v13, %v1340_v53  ;;  %984 = vrot.lane.b32.xlu0 %v8620_v40, %s4730_s27  ;;  %v8624_v40 = vld [vmem:[#allocation17_spill] sm:$0xff] }
 0x156   : > { %1083 = vrot.lane.b32.xlu1 %v725_v31, %s4731_s28  ;;  %4557 = vmatprep.mubr.msk.f32.mxu0 %vm1685_vm12, %v1649_v18 }
 0x157   : > { %v969_v9 = vpop.permute.xlu0 %968 }
 0x158   : > { %v1068_v25 = vpop.permute.xlu1 %1067 }
 0x159   : > { %1357 = vrot.lane.b32.xlu0 %v727_v21, %s4734_s16 }
 0x15a   : > { %789 = vrot.lane.b32.xlu1 %v725_v31, %s4728_s25  ;;  %v1486_v31 = vsel %vm1475_vm6, %v1453_v19, %v5584_v8  ;;  %v1423_v8 = vsel %vm1413_vm4, %v4870_v61, %v5250_v35 }
 0x15b   : > { %v1342_v34 = vpop.permute.xlu0 %1341  ;;  %v1519_v26 = vsel %vm1508_vm7, %v1486_v31, %v967_v33  ;;  %v1454_v23 = vsel %vm1444_vm5, %v1423_v8, %v5582_v12 }
 0x15c   : > { %v1650_v58 = vsel %vm1640_vm11, %v1617_v0, %v1342_v34  ;;  %v5634_v46 = vpop.permute.xlu1 %773  ;;  %v1552_v62 = vsel %vm1541_vm8, %v1519_v26, %v1068_v25  ;;  %v1487_v13 = vsel %vm1475_vm6, %v1454_v23, %v5601_v42  ;;  %v8626_v42 = vld [vmem:[#allocation14_spill] sm:$0xff] }
 0x15d   : > { %1085 = vrot.lane.b32.xlu0 %v727_v21, %s4731_s28  ;;  %4558 = vmatmul.mubr.msk.f32.gmra.mrb[8].mxu0 %vm1685_vm12, %v1650_v58  ;;  %v1520_v61 = vsel %vm1508_vm7, %v1487_v13, %v969_v9  ;;  %v733_v34 = vrot.slane %v8626_v42, 2  ;;  %v734_v58 = vrot.slane %v8627_v39, 2  ;;  %v8630_v13 = vld [vmem:[#allocation23_spill] sm:$0xff] }
 0x15e   : > { %1179 = vrot.lane.b32.xlu1 %v8622_v50, %s4732_s8 }
 0x15f   : > { %v1070_v37 = vpop.permute.xlu0 %1069 }
 0x160   : > { %v1164_v59 = vpop.permute.xlu1 %1163  ;;  %v1553_v30 = vsel %vm1541_vm8, %v1520_v61, %v1070_v37 }
 0x161   : > { %791 = vrot.lane.b32.xlu0 %v727_v21, %s4728_s25  ;;  %v1585_v20 = vsel %vm1574_vm9, %v1552_v62, %v1164_v59  ;;  %v1424_v59 = vsel %vm1413_vm4, %v4897_v16, %v5255_v17 }
 0x162   : > { %884 = vrot.lane.b32.xlu1 %v8622_v50, %s4729_s26 }
 0x163   : > { %v5643_v57 = vpop.permute.xlu0 %775 }
 0x164   : > { %v5645_v32 = vpop.permute.xlu1 %868 }
 0x165   : > { %1181 = vrot.lane.b32.xlu0 %v8623_v63, %s4732_s8 }
 0x166   : > { %1269 = vrot.lane.b32.xlu1 %v5051_v47, %s4733_s13 }
 0x167   : > { %v1166_v38 = vpop.permute.xlu0 %1165 }
 0x168   : > { %v1254_v7 = vpop.permute.xlu1 %1253  ;;  %v1586_v18 = vsel %vm1574_vm9, %v1553_v30, %v1166_v38  ;;  %v1455_v38 = vsel %vm1444_vm5, %v1424_v59, %v5634_v46 }
 0x169   : > { %886 = vrot.lane.b32.xlu0 %v8623_v63, %s4729_s26  ;;  %v1618_v43 = vsel %vm1607_vm10, %v1585_v20, %v1254_v7  ;;  %v1488_v7 = vsel %vm1475_vm6, %v1455_v38, %v5645_v32  ;;  %v1425_v32 = vsel %vm1413_vm4, %v4894_v15, %v5257_v27 }
 0x16a   : > { %986 = vrot.lane.b32.xlu1 %v5051_v47, %s4730_s27  ;;  %v8625_v47 = vld [vmem:[#allocation10_spill] sm:$0xff] }
 0x16b   : > { %v5662_v44 = vpop.permute.xlu0 %870  ;;  %v731_v55 = vrot.slane %v8625_v47, 2 }
 0x16c   : > { %v971_v56 = vpop.permute.xlu1 %970 }
 0x16d   : > { %1271 = vrot.lane.b32.xlu0 %v8624_v40, %s4733_s13  ;;  %v732_v48 = vsel %vm677_vm2, %v729_v45, %v731_v55  ;;  %v735_v45 = vsel %vm677_vm2, %v733_v34, %v734_v58  ;;  %v1521_v19 = vsel %vm1508_vm7, %v1488_v7, %v971_v56 }
 0x16e   : > { %1359 = vrot.lane.b32.xlu1 %v730_v60, %s4734_s16 }
 0x16f   : > { %v1256_v52 = vpop.permute.xlu0 %1255 }
 0x170   : > { %v1344_v24 = vpop.permute.xlu1 %1343  ;;  %v1619_v12 = vsel %vm1607_vm10, %v1586_v18, %v1256_v52  ;;  %v8631_v18 = vld [vmem:[#allocation32_spill] sm:$0xff] }
 0x171   : > { %v1651_v33 = vsel %vm1640_vm11, %v1618_v43, %v1344_v24  ;;  %988 = vrot.lane.b32.xlu0 %v8624_v40, %s4730_s27  ;;  %v1456_v40 = vsel %vm1444_vm5, %v1425_v32, %v5643_v57 }
 0x172   : > { %1087 = vrot.lane.b32.xlu1 %v730_v60, %s4731_s28  ;;  %4560 = vmatprep.mubr.msk.f32.mxu0 %vm1685_vm12, %v1651_v33  ;;  %v1489_v47 = vsel %vm1475_vm6, %v1456_v40, %v5662_v44  ;;  %v8629_v44 = vld [vmem:[#allocation18_spill] sm:$0xff] }
 0x173   : > { %v973_v53 = vpop.permute.xlu0 %972  ;;  %v738_v61 = vrot.slane %v8629_v44, 2 }
 0x174   : > { %v1072_v35 = vpop.permute.xlu1 %1071  ;;  %v1522_v15 = vsel %vm1508_vm7, %v1489_v47, %v973_v53 }
 0x175   : > { %1361 = vrot.lane.b32.xlu0 %v732_v48, %s4734_s16  ;;  %v1554_v16 = vsel %vm1541_vm8, %v1521_v19, %v1072_v35  ;;  %v739_v35 = vrot.slane %v5062_v10, 2  ;;  %v8634_v19 = vld [vmem:[#allocation33_spill] sm:$0xff] }
 0x176   : > { %793 = vrot.lane.b32.xlu1 %v730_v60, %s4728_s25 }
 0x177   : > { %v1346_v28 = vpop.permute.xlu0 %1345 }
 0x178   : > { %v1652_v21 = vsel %vm1640_vm11, %v1619_v12, %v1346_v28  ;;  %v5695_v54 = vpop.permute.xlu1 %777  ;;  %v1426_v12 = vsel %vm1413_vm4, %v4923_v41, %v8631_v18 }
 0x179   : > { %1089 = vrot.lane.b32.xlu0 %v732_v48, %s4731_s28  ;;  %4561 = vmatmul.mubr.msk.f32.gmra.mrb[10].mxu0 %vm1685_vm12, %v1652_v21  ;;  %v1457_v28 = vsel %vm1444_vm5, %v1426_v12, %v5695_v54  ;;  %v8639_v12 = vld [vmem:[#allocation29_spill] sm:$0xff] }
 0x17a   : > { %1183 = vrot.lane.b32.xlu1 %v8626_v42, %s4732_s8 }
 0x17b   : > { %v1074_v9 = vpop.permute.xlu0 %1073 }
 0x17c   : > { %v1168_v51 = vpop.permute.xlu1 %1167  ;;  %v1555_v20 = vsel %vm1541_vm8, %v1522_v15, %v1074_v9  ;;  %v740_v9 = vsel %vm677_vm2, %v738_v61, %v739_v35 }
 0x17d   : > { %795 = vrot.lane.b32.xlu0 %v732_v48, %s4728_s25  ;;  %v1587_v46 = vsel %vm1574_vm9, %v1554_v16, %v1168_v51 }
 0x17e   : > { %888 = vrot.lane.b32.xlu1 %v8626_v42, %s4729_s26 }
 0x17f   : > { %v5704_v25 = vpop.permute.xlu0 %779 }
 0x180   : > { %v5706_v4 = vpop.permute.xlu1 %872 }
 0x181   : > { %1185 = vrot.lane.b32.xlu0 %v8627_v39, %s4732_s8  ;;  %v1490_v51 = vsel %vm1475_vm6, %v1457_v28, %v5706_v4  ;;  %v1427_v4 = vsel %vm1413_vm4, %v4919_v36, %v8634_v19  ;;  %v8640_v28 = vld [vmem:[#allocation22_spill] sm:$0xff] }
 0x182   : > { %1273 = vrot.lane.b32.xlu1 %v5075_v49, %s4733_s13  ;;  %v1458_v16 = vsel %vm1444_vm5, %v1427_v4, %v5704_v25 }
 0x183   : > { %v1170_v0 = vpop.permute.xlu0 %1169 }
 0x184   : > { %v1258_v37 = vpop.permute.xlu1 %1257 }
 0x185   : > { %890 = vrot.lane.b32.xlu0 %v8627_v39, %s4729_s26  ;;  %v1620_v31 = vsel %vm1607_vm10, %v1587_v46, %v1258_v37  ;;  %v8633_v37 = vld [vmem:[#allocation19_spill] sm:$0xff] }
 0x186   : > { %990 = vrot.lane.b32.xlu1 %v5075_v49, %s4730_s27  ;;  %v8628_v49 = vld [vmem:[#allocation16_spill] sm:$0xff]  ;;  %v741_v59 = vrot.slane %v8633_v37, 2 }
 0x187   : > { %v5723_v29 = vpop.permute.xlu0 %874  ;;  %v736_v17 = vrot.slane %v8628_v49, 2 }
 0x188   : > { %v975_v14 = vpop.permute.xlu1 %974  ;;  %v742_v49 = vsel %vm677_vm2, %v739_v35, %v741_v59 }
 0x189   : > { %1275 = vrot.lane.b32.xlu0 %v5081_v22, %s4733_s13  ;;  %v737_v62 = vsel %vm677_vm2, %v734_v58, %v736_v17  ;;  %v1523_v34 = vsel %vm1508_vm7, %v1490_v51, %v975_v14  ;;  %v8632_v58 = vld [vmem:[#allocation24_spill] sm:$0xff]  ;;  %v1491_v17 = vsel %vm1475_vm6, %v1458_v16, %v5723_v29  ;;  %v8635_v29 = vld [vmem:[#allocation21_spill] sm:$0xff] }
 0x18a   : > { %1363 = vrot.lane.b32.xlu1 %v735_v45, %s4734_s16 }
 0x18b   : > { %v1260_v60 = vpop.permute.xlu0 %1259 }
 0x18c   : > { %v1348_v26 = vpop.permute.xlu1 %1347 }
 0x18d   : > { %v1653_v56 = vsel %vm1640_vm11, %v1620_v31, %v1348_v26  ;;  %992 = vrot.lane.b32.xlu0 %v5081_v22, %s4730_s27  ;;  %v1588_v22 = vsel %vm1574_vm9, %v1555_v20, %v1170_v0  ;;  %v8637_v20 = vld [vmem:[#allocation28_spill] sm:$0xff] }
 0x18e   : > { %1091 = vrot.lane.b32.xlu1 %v735_v45, %s4731_s28  ;;  %4563 = vmatprep.mubr.msk.f32.mxu0 %vm1685_vm12, %v1653_v56  ;;  %v1621_v57 = vsel %vm1607_vm10, %v1588_v22, %v1260_v60 }
 0x18f   : > { %v977_v55 = vpop.permute.xlu0 %976 }
 0x190   : > { %v1076_v27 = vpop.permute.xlu1 %1075  ;;  %v1524_v36 = vsel %vm1508_vm7, %v1491_v17, %v977_v55 }
 0x191   : > { %1365 = vrot.lane.b32.xlu0 %v737_v62, %s4734_s16  ;;  %v1556_v41 = vsel %vm1541_vm8, %v1523_v34, %v1076_v27  ;;  %v8636_v27 = vld [vmem:[#allocation20_spill] sm:$0xff] }
 0x192   : > { %797 = vrot.lane.b32.xlu1 %v735_v45, %s4728_s25 }
 0x193   : > { %v1350_v52 = vpop.permute.xlu0 %1349 }
 0x194   : > { %v1654_v43 = vsel %vm1640_vm11, %v1621_v57, %v1350_v52  ;;  %v5756_v24 = vpop.permute.xlu1 %781  ;;  %v743_v57 = vrot.slane %v8635_v29, 2  ;;  %v744_v52 = vrot.slane %v8636_v27, 2 }
 0x195   : > { %1093 = vrot.lane.b32.xlu0 %v737_v62, %s4731_s28  ;;  %4564 = vmatmul.mubr.msk.f32.gmra.mrb[12].mxu0 %vm1685_vm12, %v1654_v43 }
 0x196   : > { %1187 = vrot.lane.b32.xlu1 %v8629_v44, %s4732_s8  ;;  %v745_v61 = vsel %vm677_vm2, %v743_v57, %v744_v52 }
 0x197   : > { %v1078_v8 = vpop.permute.xlu0 %1077 }
 0x198   : > { %v1172_v33 = vpop.permute.xlu1 %1171  ;;  %v1557_v31 = vsel %vm1541_vm8, %v1524_v36, %v1078_v8  ;;  %v8638_v8 = vld [vmem:[#allocation34_spill] sm:$0xff] }
 0x199   : > { %799 = vrot.lane.b32.xlu0 %v737_v62, %s4728_s25  ;;  %v1589_v54 = vsel %vm1574_vm9, %v1556_v41, %v1172_v33  ;;  %v1428_v33 = vsel %vm1413_vm4, %v4947_v3, %v8638_v8 }
 0x19a   : > { %892 = vrot.lane.b32.xlu1 %v8629_v44, %s4729_s26 }
 0x19b   : > { %v5765_v23 = vpop.permute.xlu0 %783 }
 0x19c   : > { %v5767_v48 = vpop.permute.xlu1 %876 }
 0x19d   : > { %1189 = vrot.lane.b32.xlu0 %v5062_v10, %s4732_s8 }
 0x19e   : > { %1277 = vrot.lane.b32.xlu1 %v8630_v13, %s4733_s13 }
 0x19f   : > { %v1174_v53 = vpop.permute.xlu0 %1173 }
 0x1a0   : > { %v1262_v30 = vpop.permute.xlu1 %1261  ;;  %v1590_v26 = vsel %vm1574_vm9, %v1557_v31, %v1174_v53 }
 0x1a1   : > { %894 = vrot.lane.b32.xlu0 %v5062_v10, %s4729_s26  ;;  %v1622_v45 = vsel %vm1607_vm10, %v1589_v54, %v1262_v30 }
 0x1a2   : > { %994 = vrot.lane.b32.xlu1 %v8630_v13, %s4730_s27  ;;  %v1459_v13 = vsel %vm1444_vm5, %v1428_v33, %v5756_v24 }
 0x1a3   : > { %v5784_v21 = vpop.permute.xlu0 %878  ;;  %v1492_v35 = vsel %vm1475_vm6, %v1459_v13, %v5767_v48  ;;  %v8641_v48 = vld [vmem:[#allocation35_spill] sm:$0xff] }
 0x1a4   : > { %v979_v0 = vpop.permute.xlu1 %978 }
 0x1a5   : > { %1279 = vrot.lane.b32.xlu0 %v8632_v58, %s4733_s13  ;;  %v1525_v18 = vsel %vm1508_vm7, %v1492_v35, %v979_v0  ;;  %v1429_v0 = vsel %vm1413_vm4, %v4944_v2, %v8641_v48 }
 0x1a6   : > { %1367 = vrot.lane.b32.xlu1 %v740_v9, %s4734_s16  ;;  %v1460_v54 = vsel %vm1444_vm5, %v1429_v0, %v5765_v23 }
 0x1a7   : > { %v1264_v38 = vpop.permute.xlu0 %1263 }
 0x1a8   : > { %v1352_v7 = vpop.permute.xlu1 %1351  ;;  %v1623_v25 = vsel %vm1607_vm10, %v1590_v26, %v1264_v38  ;;  %v8643_v26 = vld [vmem:[#allocation25_spill] sm:$0xff] }
 0x1a9   : > { %v1655_v14 = vsel %vm1640_vm11, %v1622_v45, %v1352_v7  ;;  %996 = vrot.lane.b32.xlu0 %v8632_v58, %s4730_s27  ;;  %v1493_v45 = vsel %vm1475_vm6, %v1460_v54, %v5784_v21  ;;  %v8642_v21 = vld [vmem:[#allocation26_spill] sm:$0xff] }
 0x1aa   : > { %1095 = vrot.lane.b32.xlu1 %v740_v9, %s4731_s28  ;;  %4566 = vmatprep.mubr.msk.f32.mxu0 %vm1685_vm12, %v1655_v14 }
 0x1ab   : > { %v981_v46 = vpop.permute.xlu0 %980 }
 0x1ac   : > { %v1080_v60 = vpop.permute.xlu1 %1079  ;;  %v1526_v7 = vsel %vm1508_vm7, %v1493_v45, %v981_v46 }
 0x1ad   : > { %1369 = vrot.lane.b32.xlu0 %v742_v49, %s4734_s16  ;;  %v1558_v3 = vsel %vm1541_vm8, %v1525_v18, %v1080_v60  ;;  %v8647_v18 = vld [vmem:[#allocation27_spill] sm:$0xff] }
 0x1ae   : > { %801 = vrot.lane.b32.xlu1 %v740_v9, %s4728_s25  ;;  %v746_v9 = vrot.slane %v8640_v28, 2 }
 0x1af   : > { %v1354_v32 = vpop.permute.xlu0 %1353 }
 0x1b0   : > { %v1656_v56 = vsel %vm1640_vm11, %v1623_v25, %v1354_v32  ;;  %v5817_v40 = vpop.permute.xlu1 %785  ;;  %v747_v38 = vsel %vm677_vm2, %v744_v52, %v746_v9  ;;  %v8644_v25 = vld [vmem:[#allocation30_spill] sm:$0xff] }
 0x1b1   : > { %1097 = vrot.lane.b32.xlu0 %v742_v49, %s4731_s28  ;;  %4567 = vmatmul.mubr.msk.f32.gmra.mrb[14].mxu0 %vm1685_vm12, %v1656_v56  ;;  %v748_v56 = vrot.slane %v8642_v21, 2 }
 0x1b2   : > { %1191 = vrot.lane.b32.xlu1 %v8635_v29, %s4732_s8 }
 0x1b3   : > { %v1082_v62 = vpop.permute.xlu0 %1081 }
 0x1b4   : > { %v1176_v47 = vpop.permute.xlu1 %1175  ;;  %v1559_v4 = vsel %vm1541_vm8, %v1526_v7, %v1082_v62  ;;  %v749_v62 = vrot.slane %v8643_v26, 2 }
 0x1b5   : > { %803 = vrot.lane.b32.xlu0 %v742_v49, %s4728_s25  ;;  %v1591_v24 = vsel %vm1574_vm9, %v1558_v3, %v1176_v47 }
 0x1b6   : > { %896 = vrot.lane.b32.xlu1 %v8635_v29, %s4729_s26 }
 0x1b7   : > { %v5826_v55 = vpop.permute.xlu0 %787 }
 0x1b8   : > { %v5828_v15 = vpop.permute.xlu1 %880 }
 0x1b9   : > { %1193 = vrot.lane.b32.xlu0 %v8636_v27, %s4732_s8 }
 0x1ba   : > { %1281 = vrot.lane.b32.xlu1 %v8637_v20, %s4733_s13 }
 0x1bb   : > { %v1178_v22 = vpop.permute.xlu0 %1177 }
 0x1bc   : > { %v1266_v43 = vpop.permute.xlu1 %1265  ;;  %v1592_v14 = vsel %vm1574_vm9, %v1559_v4, %v1178_v22 }
 0x1bd   : > { %898 = vrot.lane.b32.xlu0 %v8636_v27, %s4729_s26  ;;  %v1624_v34 = vsel %vm1607_vm10, %v1591_v24, %v1266_v43  ;;  %v750_v43 = vsel %vm677_vm2, %v748_v56, %v749_v62  ;;  %v255_v24 = vld [vmem:[%s4781_s23 + $0xf0] sm:$0xff] }
 0x1be   : > { %998 = vrot.lane.b32.xlu1 %v8637_v20, %s4730_s27  ;;  %v8645_v20 = vld [vmem:[#allocation36_spill] sm:$0xff] }
 0x1bf   : > { %v5845_v53 = vpop.permute.xlu0 %882  ;;  %v1430_v22 = vsel %vm1413_vm4, %v4953_v5, %v8645_v20 }
 0x1c0   : > { %v983_v30 = vpop.permute.xlu1 %982  ;;  %v1461_v57 = vsel %vm1444_vm5, %v1430_v22, %v5817_v40 }
 0x1c1   : > { %1283 = vrot.lane.b32.xlu0 %v8639_v12, %s4733_s13  ;;  %v1494_v8 = vsel %vm1475_vm6, %v1461_v57, %v5828_v15 }
 0x1c2   : > { %1371 = vrot.lane.b32.xlu1 %v745_v61, %s4734_s16  ;;  %v1527_v5 = vsel %vm1508_vm7, %v1494_v8, %v983_v30 }
 0x1c3   : > { %v1268_v51 = vpop.permute.xlu0 %1267 }
 0x1c4   : > { %v1356_v58 = vpop.permute.xlu1 %1355  ;;  %v5858_v41 = vpop.f32.mrb[0].mxu0  ;;  %v1625_v23 = vsel %vm1607_vm10, %v1592_v14, %v1268_v51  ;;  %v8648_v51 = vld [vmem:[#allocation37_spill] sm:$0xff] }
 0x1c5   : > { %v1657_v37 = vsel %vm1640_vm11, %v1624_v34, %v1356_v58  ;;  %1000 = vrot.lane.b32.xlu0 %v8639_v12, %s4730_s27  ;;  %v5866_v59 = vpop.f32.mrb[1].mxu0  ;;  %v751_v12 = vrot.slane %v8647_v18, 2  ;;  %v1431_v30 = vsel %vm1413_vm4, %v8613_v11, %v8648_v51  ;;  %v256_v58 = vld [vmem:[%s4781_s23 + $0xf8] sm:$0xff]  ;;  %v288_v11 = vrot.slane %v255_v24, 1 }
 0x1c6   : > { %1099 = vrot.lane.b32.xlu1 %v745_v61, %s4731_s28  ;;  %4569 = vmatprep.mubr.msk.f32.mxu0 %vm1685_vm12, %v1657_v37  ;;  %v1462_v48 = vsel %vm1444_vm5, %v1431_v30, %v5826_v55 }
 0x1c7   : > { %v985_v2 = vpop.permute.xlu0 %984  ;;  %v752_v0 = vsel %vm677_vm2, %v749_v62, %v751_v12  ;;  %v1495_v37 = vsel %vm1475_vm6, %v1462_v48, %v5845_v53 }
 0x1c8   : > { %v1084_v19 = vpop.permute.xlu1 %1083  ;;  %v1528_v45 = vsel %vm1508_vm7, %v1495_v37, %v985_v2  ;;  %v8650_v37 = vld [vmem:[#allocation39_spill] sm:$0xff] }
 0x1c9   : > { %1373 = vrot.lane.b32.xlu0 %v747_v38, %s4734_s16  ;;  %v1560_v40 = vsel %vm1541_vm8, %v1527_v5, %v1084_v19  ;;  %v368_v19 = vrot.slane %v256_v58, 7 }
 0x1ca   : > { %805 = vrot.lane.b32.xlu1 %v745_v61, %s4728_s25  ;;  %v8646_v61 = vld [vmem:[#allocation31_spill] sm:$0xff] }
 0x1cb   : > { %v1358_v16 = vpop.permute.xlu0 %1357 }
 0x1cc   : > { %v1658_v49 = vsel %vm1640_vm11, %v1625_v23, %v1358_v16  ;;  %v5882_v17 = vpop.permute.xlu1 %789 }
 0x1cd   : > { %1101 = vrot.lane.b32.xlu0 %v747_v38, %s4731_s28  ;;  %4570 = vmatmul.mubr.msk.f32.gmra.mrb[16].mxu0 %vm1685_vm12, %v1658_v49 }
 0x1ce   : > { %1195 = vrot.lane.b32.xlu1 %v8642_v21, %s4732_s8 }
 0x1cf   : > { %v1086_v46 = vpop.permute.xlu0 %1085 }
 0x1d0   : > { %v1180_v36 = vpop.permute.xlu1 %1179  ;;  %v1561_v4 = vsel %vm1541_vm8, %v1528_v45, %v1086_v46 }
 0x1d1   : > { %807 = vrot.lane.b32.xlu0 %v747_v38, %s4728_s25  ;;  %v1593_v15 = vsel %vm1574_vm9, %v1560_v40, %v1180_v36  ;;  %v367_v38 = vrot.slane %v255_v24, 7  ;;  %v8649_v40 = vld [vmem:[#allocation38_spill] sm:$0xff] }
 0x1d2   : > { %900 = vrot.lane.b32.xlu1 %v8642_v21, %s4729_s26  ;;  %v1432_v18 = vsel %vm1413_vm4, %v8617_v1, %v8649_v40 }
 0x1d3   : > { %v5891_v60 = vpop.permute.xlu0 %791  ;;  %v464_v53 = vsel %vm321_vm0, %v288_v11, %v367_v38  ;;  %v369_v2 = vsel %vm321_vm0, %v367_v38, %v368_v19  ;;  %v1433_v11 = vsel %vm1413_vm4, %v8618_v6, %v8650_v37 }
 0x1d4   : > { %v5893_v31 = vpop.permute.xlu1 %884  ;;  %v941_v46 = vrot.slane %v464_v53, 1  ;;  %v1043_v8 = vrot.slane %v369_v2, 2  ;;  %v1464_v38 = vsel %vm1444_vm5, %v1433_v11, %v5891_v60 }
 0x1d5   : > { %1197 = vrot.lane.b32.xlu0 %v8643_v26, %s4732_s8 }
 0x1d6   : > { %1285 = vrot.lane.b32.xlu1 %v8644_v25, %s4733_s13 }
 0x1d7   : > { %v1182_v32 = vpop.permute.xlu0 %1181 }
 0x1d8   : > { %v1270_v47 = vpop.permute.xlu1 %1269  ;;  %v1594_v55 = vsel %vm1574_vm9, %v1561_v4, %v1182_v32  ;;  %v942_v32 = vrot.slane %v369_v2, 1 }
 0x1d9   : > { %902 = vrot.lane.b32.xlu0 %v8643_v26, %s4729_s26  ;;  %v1626_v28 = vsel %vm1607_vm10, %v1593_v15, %v1270_v47  ;;  %v1463_v15 = vsel %vm1444_vm5, %v1432_v18, %v5882_v17 }
 0x1da   : > { %1002 = vrot.lane.b32.xlu1 %v8644_v25, %s4730_s27  ;;  %v432_v25 = vrot.slane %v256_v58, 5  ;;  %v943_v47 = vsel %vm511_vm1, %v941_v46, %v942_v32 }
 0x1db   : > { %v5910_v52 = vpop.permute.xlu0 %886 }
 0x1dc   : > { %v5915_v33 = vpop.permute.xlu1 %986  ;;  %v5917_v13 = vpop.f32.mrb[2].mxu0  ;;  %v480_v20 = vsel %vm321_vm0, %v368_v19, %v432_v25 }
 0x1dd   : > { %1287 = vrot.lane.b32.xlu0 %v8646_v61, %s4733_s13  ;;  %v5922_v35 = vpop.f32.mrb[3].mxu0  ;;  %v944_v57 = vrot.slane %v480_v20, 1  ;;  %v1045_v17 = vrot.slane %v480_v20, 2 }
 0x1de   : > { %1375 = vrot.lane.b32.xlu1 %v750_v43, %s4734_s16 }
 0x1df   : > { %v1272_v3 = vpop.permute.xlu0 %1271  ;;  %v945_v12 = vsel %vm511_vm1, %v942_v32, %v944_v57  ;;  %v1046_v45 = vsel %vm677_vm2, %v1043_v8, %v1045_v17  ;;  %v8651_v32 = vld [vmem:[#allocation40_spill] sm:$0xff] }
 0x1e0   : > { %v1360_v9 = vpop.permute.xlu1 %1359  ;;  %v1627_v14 = vsel %vm1607_vm10, %v1594_v55, %v1272_v3 }
 0x1e1   : > { %v1659_v34 = vsel %vm1640_vm11, %v1626_v28, %v1360_v9  ;;  %1004 = vrot.lane.b32.xlu0 %v8646_v61, %s4730_s27  ;;  %v1496_v9 = vsel %vm1475_vm6, %v1463_v15, %v5893_v31 }
 0x1e2   : > { %1103 = vrot.lane.b32.xlu1 %v750_v43, %s4731_s28  ;;  %4572 = vmatprep.mubr.msk.f32.mxu0 %vm1685_vm12, %v1659_v34  ;;  %v1529_v30 = vsel %vm1508_vm7, %v1496_v9, %v5915_v33 }
 0x1e3   : > { %v5944_v54 = vpop.permute.xlu0 %988 }
 0x1e4   : > { %v1088_v7 = vpop.permute.xlu1 %1087 }
 0x1e5   : > { %1377 = vrot.lane.b32.xlu0 %v752_v0, %s4734_s16  ;;  %v1562_v34 = vsel %vm1541_vm8, %v1529_v30, %v1088_v7  ;;  %v1497_v7 = vsel %vm1475_vm6, %v1464_v38, %v5910_v52 }
 0x1e6   : > { %809 = vrot.lane.b32.xlu1 %v750_v43, %s4728_s25  ;;  %v1042_v43 = vrot.slane %v464_v53, 2  ;;  %v1530_v6 = vsel %vm1508_vm7, %v1497_v7, %v5944_v54  ;;  %v8653_v7 = vld [vmem:[#allocation42_spill] sm:$0xff] }
 0x1e7   : > { %v1362_v23 = vpop.permute.xlu0 %1361 }
 0x1e8   : > { %v1660_v16 = vsel %vm1640_vm11, %v1627_v14, %v1362_v23  ;;  %v5954_v49 = vpop.permute.xlu1 %793  ;;  %v1044_v28 = vsel %vm677_vm2, %v1042_v43, %v1043_v8 }
 0x1e9   : > { %1105 = vrot.lane.b32.xlu0 %v752_v0, %s4731_s28  ;;  %4573 = vmatmul.mubr.msk.f32.gmra.mrb[18].mxu0 %vm1685_vm12, %v1660_v16 }
 0x1ea   : > { %1199 = vrot.lane.b32.xlu1 %v464_v53, %s4732_s8 }
 0x1eb   : > { %v1090_v36 = vpop.permute.xlu0 %1089 }
 0x1ec   : > { %v1184_v56 = vpop.permute.xlu1 %1183  ;;  %v1563_v55 = vsel %vm1541_vm8, %v1530_v6, %v1090_v36 }
 0x1ed   : > { %811 = vrot.lane.b32.xlu0 %v752_v0, %s4728_s25  ;;  %v1595_v58 = vsel %vm1574_vm9, %v1562_v34, %v1184_v56  ;;  %v1434_v56 = vsel %vm1413_vm4, %v8622_v50, %v8651_v32  ;;  %v8654_v32 = vld [vmem:[#allocation43_spill] sm:$0xff] }
 0x1ee   : > { %904 = vrot.lane.b32.xlu1 %v464_v53, %s4729_s26 }
 0x1ef   : > { %v5962_v62 = vpop.permute.xlu0 %795 }
 0x1f0   : > { %v889_v22 = vpop.permute.xlu1 %888 }
 0x1f1   : > { %1201 = vrot.lane.b32.xlu0 %v369_v2, %s4732_s8 }
 0x1f2   : > { %1289 = vrot.lane.b32.xlu1 %v943_v47, %s4733_s13 }
 0x1f3   : > { %v1186_v5 = vpop.permute.xlu0 %1185 }
 0x1f4   : > { %v1274_v61 = vpop.permute.xlu1 %1273  ;;  %v1596_v60 = vsel %vm1574_vm9, %v1563_v55, %v1186_v5 }
 0x1f5   : > { %906 = vrot.lane.b32.xlu0 %v369_v2, %s4729_s26  ;;  %v1628_v31 = vsel %vm1607_vm10, %v1595_v58, %v1274_v61 }
 0x1f6   : > { %1006 = vrot.lane.b32.xlu1 %v943_v47, %s4730_s27  ;;  %v1465_v47 = vsel %vm1444_vm5, %v1434_v56, %v5954_v49 }
 0x1f7   : > { %v891_v3 = vpop.permute.xlu0 %890  ;;  %v1498_v57 = vsel %vm1475_vm6, %v1465_v47, %v889_v22 }
 0x1f8   : > { %v991_v24 = vpop.permute.xlu1 %990  ;;  %v5979_v51 = vpop.f32.mrb[4].mxu0 }
 0x1f9   : > { %1291 = vrot.lane.b32.xlu0 %v945_v12, %s4733_s13  ;;  %v5984_v1 = vpop.f32.mrb[5].mxu0  ;;  %v1531_v5 = vsel %vm1508_vm7, %v1498_v57, %v991_v24 }
 0x1fa   : > { %1379 = vrot.lane.b32.xlu1 %v1044_v28, %s4734_s16 }
 0x1fb   : > { %v1276_v48 = vpop.permute.xlu0 %1275 }
 0x1fc   : > { %v1364_v0 = vpop.permute.xlu1 %1363  ;;  %v1629_v14 = vsel %vm1607_vm10, %v1596_v60, %v1276_v48 }
 0x1fd   : > { %v1661_v33 = vsel %vm1640_vm11, %v1628_v31, %v1364_v0  ;;  %1008 = vrot.lane.b32.xlu0 %v945_v12, %s4730_s27 }
 0x1fe   : > { %1107 = vrot.lane.b32.xlu1 %v1044_v28, %s4731_s28  ;;  %4575 = vmatprep.mubr.msk.f32.mxu0 %vm1685_vm12, %v1661_v33  ;;  %v8652_v28 = vld [vmem:[#allocation41_spill] sm:$0xff] }
 0x1ff   : > { %v993_v19 = vpop.permute.xlu0 %992  ;;  %v1435_v49 = vsel %vm1413_vm4, %v8623_v63, %v8652_v28 }
 0x200   : > { %v1092_v4 = vpop.permute.xlu1 %1091  ;;  %v1466_v9 = vsel %vm1444_vm5, %v1435_v49, %v5962_v62 }
 0x201   : > { %1381 = vrot.lane.b32.xlu0 %v1046_v45, %s4734_s16  ;;  %v1564_v40 = vsel %vm1541_vm8, %v1531_v5, %v1092_v4  ;;  %v1499_v24 = vsel %vm1475_vm6, %v1466_v9, %v891_v3 }
 0x202   : > { %1109 = vrot.lane.b32.xlu1 %v1046_v45, %s4731_s28  ;;  %v1532_v34 = vsel %vm1508_vm7, %v1499_v24, %v993_v19  ;;  %v1436_v19 = vsel %vm1413_vm4, %v8626_v42, %v8653_v7  ;;  %v8655_v24 = vld [vmem:[#allocation44_spill] sm:$0xff] }
 0x203   : > { %v1366_v23 = vpop.permute.xlu0 %1365 }
 0x204   : > { %v1662_v53 = vsel %vm1640_vm11, %v1629_v14, %v1366_v23  ;;  %v798_v16 = vpop.permute.xlu1 %797 }
 0x205   : > { %4576 = vmatmul.mubr.msk.f32.gmra.mrb[20].mxu0 %vm1685_vm12, %v1662_v53  ;;  %v1467_v6 = vsel %vm1444_vm5, %v1436_v19, %v798_v16  ;;  %v1437_v16 = vsel %vm1413_vm4, %v8627_v39, %v8654_v32 }
 0x207   : > { %v1094_v52 = vpop.permute.xlu0 %1093 }
 0x208   : > { %v1188_v2 = vpop.permute.xlu1 %1187  ;;  %v1565_v58 = vsel %vm1541_vm8, %v1532_v34, %v1094_v52 }
 0x209   : > { %v1597_v18 = vsel %vm1574_vm9, %v1564_v40, %v1188_v2 }
 0x20b   : > { %v800_v54 = vpop.permute.xlu0 %799 }
 0x20c   : > { %v893_v46 = vpop.permute.xlu1 %892  ;;  %v1468_v56 = vsel %vm1444_vm5, %v1437_v16, %v800_v54 }
 0x20d   : > { %v1500_v55 = vsel %vm1475_vm6, %v1467_v6, %v893_v46 }
 0x20f   : > { %v1190_v25 = vpop.permute.xlu0 %1189 }
 0x210   : > { %v1278_v36 = vpop.permute.xlu1 %1277  ;;  %v1598_v48 = vsel %vm1574_vm9, %v1565_v58, %v1190_v25 }
 0x211   : > { %v1630_v50 = vsel %vm1607_vm10, %v1597_v18, %v1278_v36 }
 0x213   : > { %v895_v20 = vpop.permute.xlu0 %894 }
 0x214   : > { %v995_v43 = vpop.permute.xlu1 %994  ;;  %v6017_v8 = vpop.f32.mrb[6].mxu0  ;;  %v1501_v47 = vsel %vm1475_vm6, %v1468_v56, %v895_v20 }
 0x215   : > { %v6020_v61 = vpop.f32.mrb[7].mxu0  ;;  %v1533_v23 = vsel %vm1508_vm7, %v1500_v55, %v995_v43 }
 0x217   : > { %v1280_v12 = vpop.permute.xlu0 %1279 }
 0x218   : > { %v1368_v15 = vpop.permute.xlu1 %1367  ;;  %v1631_v31 = vsel %vm1607_vm10, %v1598_v48, %v1280_v12 }
 0x219   : > { %v1663_v22 = vsel %vm1640_vm11, %v1630_v50, %v1368_v15 }
 0x21a   : > { %4578 = vmatprep.mubr.msk.f32.mxu0 %vm1685_vm12, %v1663_v22 }
 0x21b   : > { %v997_v30 = vpop.permute.xlu0 %996 }
 0x21c   : > { %v1096_v17 = vpop.permute.xlu1 %1095  ;;  %v1534_v43 = vsel %vm1508_vm7, %v1501_v47, %v997_v30  ;;  %v1438_v30 = vsel %vm1413_vm4, %v8629_v44, %v8655_v24  ;;  %v8657_v47 = vld [vmem:[#allocation46_spill] sm:$0xff] }
 0x21d   : > { %v1566_v52 = vsel %vm1541_vm8, %v1533_v23, %v1096_v17 }
 0x21f   : > { %v1370_v63 = vpop.permute.xlu0 %1369 }
 0x220   : > { %v1664_v0 = vsel %vm1640_vm11, %v1631_v31, %v1370_v63  ;;  %v802_v37 = vpop.permute.xlu1 %801 }
 0x221   : > { %4579 = vmatmul.mubr.msk.f32.gmra.mrb[22].mxu0 %vm1685_vm12, %v1664_v0  ;;  %v1469_v34 = vsel %vm1444_vm5, %v1438_v30, %v802_v37 }
 0x223   : > { %v1098_v62 = vpop.permute.xlu0 %1097 }
 0x224   : > { %v1192_v11 = vpop.permute.xlu1 %1191  ;;  %v1567_v40 = vsel %vm1541_vm8, %v1534_v43, %v1098_v62 }
 0x225   : > { %v1599_v2 = vsel %vm1574_vm9, %v1566_v52, %v1192_v11 }
 0x227   : > { %v804_v33 = vpop.permute.xlu0 %803 }
 0x228   : > { %v897_v3 = vpop.permute.xlu1 %896 }
 0x229   : > { %v1502_v58 = vsel %vm1475_vm6, %v1469_v34, %v897_v3  ;;  %v8656_v3 = vld [vmem:[#allocation45_spill] sm:$0xff] }
 0x22b   : > { %v1194_v38 = vpop.permute.xlu0 %1193 }
 0x22c   : > { %v1282_v45 = vpop.permute.xlu1 %1281  ;;  %v1600_v18 = vsel %vm1574_vm9, %v1567_v40, %v1194_v38 }
 0x22d   : > { %v1632_v36 = vsel %vm1607_vm10, %v1599_v2, %v1282_v45  ;;  %v1439_v45 = vsel %vm1413_vm4, %v5062_v10, %v8656_v3 }
 0x22e   : > { %v1470_v19 = vsel %vm1444_vm5, %v1439_v45, %v804_v33 }
 0x22f   : > { %v899_v4 = vpop.permute.xlu0 %898 }
 0x230   : > { %v999_v60 = vpop.permute.xlu1 %998  ;;  %v6044_v14 = vpop.f32.mrb[8].mxu0  ;;  %v1503_v6 = vsel %vm1475_vm6, %v1470_v19, %v899_v4 }
 0x231   : > { %v6047_v53 = vpop.f32.mrb[9].mxu0  ;;  %v1535_v63 = vsel %vm1508_vm7, %v1502_v58, %v999_v60  ;;  %v8658_v58 = vld [vmem:[#allocation47_spill] sm:$0xff] }
 0x233   : > { %v1284_v25 = vpop.permute.xlu0 %1283 }
 0x234   : > { %v1372_v42 = vpop.permute.xlu1 %1371  ;;  %v1633_v12 = vsel %vm1607_vm10, %v1600_v18, %v1284_v25 }
 0x235   : > { %v1665_v46 = vsel %vm1640_vm11, %v1632_v36, %v1372_v42 }
 0x236   : > { %4581 = vmatprep.mubr.msk.f32.mxu0 %vm1685_vm12, %v1665_v46 }
 0x237   : > { %v1001_v57 = vpop.permute.xlu0 %1000 }
 0x238   : > { %v1100_v5 = vpop.permute.xlu1 %1099  ;;  %v1536_v60 = vsel %vm1508_vm7, %v1503_v6, %v1001_v57  ;;  %v1440_v57 = vsel %vm1413_vm4, %v8635_v29, %v8657_v47  ;;  %v8660_v6 = vld [vmem:[#allocation49_spill] sm:$0xff] }
 0x239   : > { %v1568_v62 = vsel %vm1541_vm8, %v1535_v63, %v1100_v5 }
 0x23b   : > { %v1374_v50 = vpop.permute.xlu0 %1373 }
 0x23c   : > { %v1666_v39 = vsel %vm1640_vm11, %v1633_v12, %v1374_v50  ;;  %v806_v15 = vpop.permute.xlu1 %805 }
 0x23d   : > { %4582 = vmatmul.mubr.msk.f32.gmra.mrb[24].mxu0 %vm1685_vm12, %v1666_v39  ;;  %v1471_v43 = vsel %vm1444_vm5, %v1440_v57, %v806_v15  ;;  %v1441_v15 = vsel %vm1413_vm4, %v8636_v27, %v8658_v58 }
 0x23f   : > { %v1102_v54 = vpop.permute.xlu0 %1101 }
 0x240   : > { %v6065_v28 = vpop.permute.xlu1 %1195  ;;  %v1569_v52 = vsel %vm1541_vm8, %v1536_v60, %v1102_v54 }
 0x241   : > { %v1601_v11 = vsel %vm1574_vm9, %v1568_v62, %v6065_v28 }
 0x243   : > { %v808_v20 = vpop.permute.xlu0 %807 }
 0x244   : > { %v901_v49 = vpop.permute.xlu1 %900  ;;  %v1472_v62 = vsel %vm1444_vm5, %v1441_v15, %v808_v20 }
 0x245   : > { %v1504_v40 = vsel %vm1475_vm6, %v1471_v43, %v901_v49  ;;  %v8659_v49 = vld [vmem:[#allocation48_spill] sm:$0xff] }
 0x246   : > { %v1442_v63 = vsel %vm1413_vm4, %v8642_v21, %v8659_v49  ;;  %v1443_v21 = vsel %vm1413_vm4, %v8643_v26, %v8660_v6 }
 0x247   : > { %v6067_v22 = vpop.permute.xlu0 %1197 }
 0x248   : > { %v6069_v9 = vpop.permute.xlu1 %1285  ;;  %v1602_v2 = vsel %vm1574_vm9, %v1569_v52, %v6067_v22 }
 0x249   : > { %v1634_v44 = vsel %vm1607_vm10, %v1601_v11, %v6069_v9 }
 0x24b   : > { %v903_v17 = vpop.permute.xlu0 %902 }
 0x24c   : > { %v1003_v48 = vpop.permute.xlu1 %1002  ;;  %v6076_v31 = vpop.f32.mrb[10].mxu0 }
 0x24d   : > { %v6079_v0 = vpop.f32.mrb[11].mxu0  ;;  %v1537_v50 = vsel %vm1508_vm7, %v1504_v40, %v1003_v48 }
 0x24f   : > { %v6084_v38 = vpop.permute.xlu0 %1287 }
 0x250   : > { %v6088_v37 = vpop.permute.xlu1 %1375  ;;  %v1635_v10 = vsel %vm1607_vm10, %v1602_v2, %v6084_v38 }
 0x251   : > { %v1667_v7 = vsel %vm1640_vm11, %v1634_v44, %v6088_v37  ;;  %v1505_v44 = vsel %vm1475_vm6, %v1472_v62, %v903_v17 }
 0x252   : > { %4584 = vmatprep.mubr.msk.f32.mxu0 %vm1685_vm12, %v1667_v7 }
 0x253   : > { %v1005_v55 = vpop.permute.xlu0 %1004 }
 0x254   : > { %v1104_v23 = vpop.permute.xlu1 %1103  ;;  %v1538_v7 = vsel %vm1508_vm7, %v1505_v44, %v1005_v55 }
 0x255   : > { %v1570_v54 = vsel %vm1541_vm8, %v1537_v50, %v1104_v23 }
 0x257   : > { %v1378_v25 = vpop.permute.xlu0 %1377 }
 0x258   : > { %v810_v36 = vpop.permute.xlu1 %809  ;;  %v1668_v33 = vsel %vm1640_vm11, %v1635_v10, %v1378_v25 }
 0x259   : > { %4585 = vmatmul.mubr.msk.f32.gmra.mrb[26].mxu0 %vm1685_vm12, %v1668_v33  ;;  %v1473_v11 = vsel %vm1444_vm5, %v1442_v63, %v810_v36 }
 0x25b   : > { %v1106_v42 = vpop.permute.xlu0 %1105 }
 0x25c   : > { %v1200_v4 = vpop.permute.xlu1 %1199  ;;  %v1571_v20 = vsel %vm1541_vm8, %v1538_v7, %v1106_v42 }
 0x25d   : > { %v1603_v24 = vsel %vm1574_vm9, %v1570_v54, %v1200_v4 }
 0x25f   : > { %v812_v32 = vpop.permute.xlu0 %811 }
 0x260   : > { %v905_v16 = vpop.permute.xlu1 %904  ;;  %v1474_v23 = vsel %vm1444_vm5, %v1443_v21, %v812_v32 }
 0x261   : > { %v1506_v3 = vsel %vm1475_vm6, %v1473_v11, %v905_v16 }
 0x263   : > { %v1202_v46 = vpop.permute.xlu0 %1201 }
 0x264   : > { %v1290_v56 = vpop.permute.xlu1 %1289  ;;  %v1604_v17 = vsel %vm1574_vm9, %v1571_v20, %v1202_v46 }
 0x265   : > { %v1636_v34 = vsel %vm1607_vm10, %v1603_v24, %v1290_v56 }
 0x267   : > { %v907_v5 = vpop.permute.xlu0 %906 }
 0x268   : > { %v1007_v18 = vpop.permute.xlu1 %1006  ;;  %v6111_v12 = vpop.f32.mrb[12].mxu0  ;;  %v1507_v55 = vsel %vm1475_vm6, %v1474_v23, %v907_v5 }
 0x269   : > { %v6114_v39 = vpop.f32.mrb[13].mxu0  ;;  %v1539_v27 = vsel %vm1508_vm7, %v1506_v3, %v1007_v18 }
 0x26b   : > { %v1292_v30 = vpop.permute.xlu0 %1291 }
 0x26c   : > { %v1380_v29 = vpop.permute.xlu1 %1379  ;;  %v1637_v2 = vsel %vm1607_vm10, %v1604_v17, %v1292_v30 }
 0x26d   : > { %v1669_v48 = vsel %vm1640_vm11, %v1636_v34, %v1380_v29 }
 0x26e   : > { %4587 = vmatprep.mubr.msk.f32.mxu0 %vm1685_vm12, %v1669_v48 }
 0x26f   : > { %v1009_v45 = vpop.permute.xlu0 %1008 }
 0x270   : > { %v1108_v19 = vpop.permute.xlu1 %1107  ;;  %v1540_v26 = vsel %vm1508_vm7, %v1507_v55, %v1009_v45 }
 0x271   : > { %v1572_v60 = vsel %vm1541_vm8, %v1539_v27, %v1108_v19 }
 0x272   : > { %v1605_v52 = vsel %vm1574_vm9, %v1572_v60, %v6065_v28 }
 0x273   : > { %v1382_v10 = vpop.permute.xlu0 %1381  ;;  %v1638_v36 = vsel %vm1607_vm10, %v1605_v52, %v6069_v9 }
 0x274   : > { %v1670_v33 = vsel %vm1640_vm11, %v1637_v2, %v1382_v10  ;;  %v1110_v42 = vpop.permute.xlu1 %1109  ;;  %v1671_v28 = vsel %vm1640_vm11, %v1638_v36, %v6088_v37 }
 0x275   : > { %v1573_v4 = vsel %vm1541_vm8, %v1540_v26, %v1110_v42  ;;  %4588 = vmatmul.mubr.msk.f32.gmra.mrb[28].mxu0 %vm1685_vm12, %v1670_v33 }
 0x276   : > { %v1606_v32 = vsel %vm1574_vm9, %v1573_v4, %v6067_v22  ;;  %4590 = vmatprep.mubr.msk.f32.mxu0 %vm1685_vm12, %v1671_v28  ;;  %v6166_v22 = vld [vmem:[%s8495_s2] ss:$0 sm:$0xff] }
 0x277   : > { %v1639_v9 = vsel %vm1607_vm10, %v1606_v32, %v6084_v38  ;;  %v6170_v38 = vadd.f32 %v5858_v41, %v6166_v22  ;;  %v6178_v18 = vadd.f32 %v6166_v22, %v5922_v35  ;;  %v6188_v41 = vadd.f32 %v5917_v13, %v6166_v22 }
 0x278   : > { %v1672_v16 = vsel %vm1640_vm11, %v1639_v9, %v1378_v25  ;;  %v6174_v25 = vadd.f32 %v6166_v22, %v5866_v59  ;;  %v6192_v59 = vadd.f32 %v6166_v22, %v5984_v1  ;;  %v6200_v15 = vadd.f32 %v5979_v51, %v6166_v22 }
 0x279   : > { %4591 = vmatmul.mubr.msk.f32.gmra.mrb[30].mxu0 %vm1685_vm12, %v1672_v16  ;;  %v2012_v50 = vsel %vm1413_vm4, %v6170_v38, 0.0  ;;  %v2014_v24 = vsel %vm1413_vm4, %v6178_v18, 0.0  ;;  %v2016_v34 = vsel %vm1413_vm4, %v6188_v41, 0.0  ;;  %v6204_v13 = vadd.f32 %v6166_v22, %v6020_v61 }
 0x27a   : > { %v2011_v54 = vsel %vm1413_vm4, %v6174_v25, 0.0  ;;  %v2018_v29 = vsel %vm1413_vm4, %v6192_v59, 0.0  ;;  %v2020_v1 = vsel %vm1413_vm4, %v6200_v15, 0.0  ;;  %v6212_v62 = vadd.f32 %v6017_v8, %v6166_v22 }
 0x27b   : > { %v2013_v30 = vadd.f32 %v2012_v50, %v2011_v54  ;;  %v2022_v63 = vsel %vm1413_vm4, %v6204_v13, 0.0  ;;  %v6216_v51 = vadd.f32 %v6166_v22, %v6047_v53  ;;  %v6224_v27 = vadd.f32 %v6044_v14, %v6166_v22 }
 0x27c   : > { %v2024_v3 = vsel %vm1413_vm4, %v6212_v62, 0.0  ;;  %v6228_v8 = vadd.f32 %v6166_v22, %v6079_v0  ;;  %v6236_v20 = vadd.f32 %v6076_v31, %v6166_v22  ;;  %v6240_v14 = vadd.f32 %v6166_v22, %v6114_v39 }
 0x27d   : > { %v2015_v35 = vadd.f32 %v2014_v24, %v2013_v30  ;;  %v2026_v45 = vsel %vm1413_vm4, %v6216_v51, 0.0  ;;  %v2028_v19 = vsel %vm1413_vm4, %v6224_v27, 0.0  ;;  %v6248_v52 = vadd.f32 %v6111_v12, %v6166_v22 }
 0x27e   : > { %v2030_v6 = vsel %vm1413_vm4, %v6228_v8, 0.0  ;;  %v2032_v0 = vsel %vm1413_vm4, %v6236_v20, 0.0  ;;  %v2034_v23 = vsel %vm1413_vm4, %v6240_v14, 0.0 }
 0x27f   : > { %v2017_v58 = vadd.f32 %v2016_v34, %v2015_v35  ;;  %v2036_v39 = vsel %vm1413_vm4, %v6248_v52, 0.0 }
 0x281   : > { %v2019_v49 = vadd.f32 %v2018_v29, %v2017_v58 }
 0x283   : > { %v2021_v48 = vadd.f32 %v2020_v1, %v2019_v49 }
 0x284   : > { %v4568_v46 = vpop.f32.mrb[14].mxu0 }
 0x285   : > { %v1922_v56 = vpop.f32.mrb[15].mxu0  ;;  %v2023_v44 = vadd.f32 %v2022_v63, %v2021_v48  ;;  %v6258_v36 = vadd.f32 %v4568_v46, %v6166_v22 }
 0x286   : > { %v6251_v55 = vadd.f32 %v6166_v22, %v1922_v56 }
 0x287   : > { %v2025_v7 = vadd.f32 %v2024_v3, %v2023_v44  ;;  %v2040_v12 = vsel %vm1413_vm4, %v6258_v36, 0.0 }
 0x288   : > { %v2038_v2 = vsel %vm1413_vm4, %v6251_v55, 0.0 }
 0x289   : > { %v2027_v53 = vadd.f32 %v2026_v45, %v2025_v7 }
 0x28b   : > { %v2029_v21 = vadd.f32 %v2028_v19, %v2027_v53 }
 0x28d   : > { %v2031_v60 = vadd.f32 %v2030_v6, %v2029_v21 }
 0x28f   : > { %v2033_v17 = vadd.f32 %v2032_v0, %v2031_v60 }
 0x291   : > { %v2035_v31 = vadd.f32 %v2034_v23, %v2033_v17 }
 0x293   : > { %v2037_v10 = vadd.f32 %v2036_v39, %v2035_v31 }
 0x295   : > { %v2039_v33 = vadd.f32 %v2038_v2, %v2037_v10 }
 0x297   : > { %v2041_v28 = vadd.f32 %v2040_v12, %v2039_v33 }
 0x2a0   : > { %v4571_v47 = vpop.f32.mrb[16].mxu0 }
 0x2a1   : > { %v1932_v57 = vpop.f32.mrb[17].mxu0  ;;  %v6268_v9 = vadd.f32 %v4571_v47, %v6166_v22 }
 0x2a2   : > { %v6261_v26 = vadd.f32 %v6166_v22, %v1932_v57 }
 0x2a3   : > { %v2044_v56 = vsel %vm1413_vm4, %v6268_v9, 0.0 }
 0x2a4   : > { %v2042_v42 = vsel %vm1413_vm4, %v6261_v26, 0.0 }
 0x2a5   : > { %v2043_v46 = vadd.f32 %v2042_v42, %v2041_v28 }
 0x2a7   : > { %v2045_v50 = vadd.f32 %v2044_v56, %v2043_v46 }
 0x2bc   : > { %v6159_v43 = vpop.f32.mrb[18].mxu0 }
 0x2bd   : > { %v1942_v5 = vpop.f32.mrb[19].mxu0  ;;  %v6279_v54 = vadd.f32 %v6159_v43, %v6166_v22 }
 0x2be   : > { %v6271_v16 = vadd.f32 %v6166_v22, %v1942_v5 }
 0x2bf   : > { %v2048_v5 = vsel %vm1413_vm4, %v6279_v54, 0.0 }
 0x2c0   : > { %v2046_v57 = vsel %vm1413_vm4, %v6271_v16, 0.0 }
 0x2c1   : > { %v2047_v47 = vadd.f32 %v2046_v57, %v2045_v50 }
 0x2c3   : > { %v2049_v35 = vadd.f32 %v2048_v5, %v2047_v47 }
 0x2d8   : > { %v6161_v37 = vpop.f32.mrb[20].mxu0 }
 0x2d9   : > { %v1952_v40 = vpop.f32.mrb[21].mxu0  ;;  %v6290_v34 = vadd.f32 %v6161_v37, %v6166_v22 }
 0x2da   : > { %v6282_v24 = vadd.f32 %v6166_v22, %v1952_v40 }
 0x2db   : > { %v2052_v40 = vsel %vm1413_vm4, %v6290_v34, 0.0 }
 0x2dc   : > { %v2050_v30 = vsel %vm1413_vm4, %v6282_v24, 0.0 }
 0x2dd   : > { %v2051_v43 = vadd.f32 %v2050_v30, %v2049_v35 }
 0x2df   : > { %v2053_v49 = vadd.f32 %v2052_v40, %v2051_v43 }
 0x2f4   : > { %v4580_v11 = vpop.f32.mrb[22].mxu0 }
 0x2f5   : > { %v1962_v61 = vpop.f32.mrb[23].mxu0  ;;  %v6300_v1 = vadd.f32 %v4580_v11, %v6166_v22 }
 0x2f6   : > { %v6293_v29 = vadd.f32 %v6166_v22, %v1962_v61 }
 0x2f7   : > { %v2056_v37 = vsel %vm1413_vm4, %v6300_v1, 0.0 }
 0x2f8   : > { %v2054_v58 = vsel %vm1413_vm4, %v6293_v29, 0.0 }
 0x2f9   : > { %v2055_v48 = vadd.f32 %v2054_v58, %v2053_v49 }
 0x2fb   : > { %v2057_v61 = vadd.f32 %v2056_v37, %v2055_v48 }
 0x310   : > { %v4583_v4 = vpop.f32.mrb[24].mxu0 }
 0x311   : > { %v1972_v32 = vpop.f32.mrb[25].mxu0  ;;  %v6310_v3 = vadd.f32 %v4583_v4, %v6166_v22 }
 0x312   : > { %v6303_v63 = vadd.f32 %v6166_v22, %v1972_v32 }
 0x313   : > { %v2060_v11 = vsel %vm1413_vm4, %v6310_v3, 0.0 }
 0x314   : > { %v2058_v44 = vsel %vm1413_vm4, %v6303_v63, 0.0 }
 0x315   : > { %v2059_v45 = vadd.f32 %v2058_v44, %v2057_v61 }
 0x317   : > { %v2061_v21 = vadd.f32 %v2060_v11, %v2059_v45 }
 0x32c   : > { %v4586_v7 = vpop.f32.mrb[26].mxu0 }
 0x32d   : > { %v1982_v53 = vpop.f32.mrb[27].mxu0  ;;  %v1988_v19 = vadd.f32 %v4586_v7, %v6166_v22 }
 0x32e   : > { %v1983_v6 = vadd.f32 %v6166_v22, %v1982_v53 }
 0x32f   : > { %v2064_v23 = vsel %vm1413_vm4, %v1988_v19, 0.0 }
 0x330   : > { %v2062_v60 = vsel %vm1413_vm4, %v1983_v6, 0.0 }
 0x331   : > { %v2063_v0 = vadd.f32 %v2062_v60, %v2061_v21 }
 0x333   : > { %v2065_v17 = vadd.f32 %v2064_v23, %v2063_v0 }
 0x348   : > { %v4589_v31 = vpop.f32.mrb[28].mxu0 }
 0x349   : > { %v1992_v39 = vpop.f32.mrb[29].mxu0  ;;  %v1998_v2 = vadd.f32 %v4589_v31, %v6166_v22 }
 0x34a   : > { %v1993_v10 = vadd.f32 %v6166_v22, %v1992_v39 }
 0x34b   : > { %v2068_v28 = vsel %vm1413_vm4, %v1998_v2, 0.0 }
 0x34c   : > { %v2066_v33 = vsel %vm1413_vm4, %v1993_v10, 0.0  ;;  %v4592_v12 = vpop.f32.mrb[30].mxu0 }
 0x34d   : > { %v2067_v42 = vadd.f32 %v2066_v33, %v2065_v17  ;;  %v2002_v4 = vpop.f32.mrb[31].mxu0  ;;  %v2008_v32 = vadd.f32 %v4592_v12, %v6166_v22 }
 0x34e   : > { %v2003_v46 = vadd.f32 %v6166_v22, %v2002_v4 }
 0x34f   : > { %v2069_v56 = vadd.f32 %v2068_v28, %v2067_v42  ;;  %v2072_v47 = vsel %vm1413_vm4, %v2008_v32, 0.0 }
 0x350   : > { %v2070_v57 = vsel %vm1413_vm4, %v2003_v46, 0.0 }
 0x351   : > { %v2071_v50 = vadd.f32 %v2070_v57, %v2069_v56 }
 0x353   : > { %v2073_v5 = vadd.f32 %v2072_v47, %v2071_v50 }
 0x355   : > { %v2074_v30 = vrot.slane %v2073_v5, 4 }
 0x357   : > { %v2075_v35 = vadd.f32 %v2074_v30, %v2073_v5 }
 0x359   : > { %v2076_v43 = vrot.slane %v2075_v35, 2 }
 0x35b   : > { %v2077_v40 = vadd.f32 %v2076_v43, %v2075_v35 }
 0x35d   : > { %v2078_v58 = vrot.slane %v2077_v40, 1 }
 0x35f   : > { %v2079_v49 = vadd.f32 %v2078_v58, %v2077_v40 }
 0x361   : > { %v6326_v48 = vmul.f32 0.00390625, %v2079_v49 }
 0x363   : > { %v6329_v37 = vsub.f32 %v1983_v6, %v6326_v48  ;;  %v6332_v22 = vsub.f32 %v1988_v19, %v6326_v48  ;;  %v6335_v44 = vsub.f32 %v1993_v10, %v6326_v48  ;;  %v6338_v61 = vsub.f32 %v1998_v2, %v6326_v48 }
 0x364   : > { %v6341_v45 = vsub.f32 %v2003_v46, %v6326_v48  ;;  %v6344_v7 = vsub.f32 %v2008_v32, %v6326_v48  ;;  %v6348_v53 = vsub.f32 %v6174_v25, %v6326_v48  ;;  %v6352_v11 = vsub.f32 %v6170_v38, %v6326_v48 }
 0x365   : > { %8661 = vst [vmem:[#allocation2_spill] sm:$0xff] %v6329_v37  ;;  %8662 = vst [vmem:[#allocation7_spill] sm:$0xff] %v6332_v22  ;;  %v6356_v19 = vsub.f32 %v6178_v18, %v6326_v48  ;;  %v6360_v6 = vsub.f32 %v6188_v41, %v6326_v48  ;;  %v6368_v25 = vsub.f32 %v6192_v59, %v6326_v48 }
 0x366   : > { %8663 = vst [vmem:[#allocation11_spill] sm:$0xff] %v6335_v44  ;;  %8664 = vst [vmem:[#allocation3_spill] sm:$0xff] %v6338_v61  ;;  %v2114_v21 = vmul.f32 %v6348_v53, %v6348_v53  ;;  %v2115_v60 = vmul.f32 %v6352_v11, %v6352_v11  ;;  %v6374_v18 = vsub.f32 %v6200_v15, %v6326_v48 }
 0x367   : > { %8665 = vst [vmem:[#allocation5_spill] sm:$0xff] %v6341_v45  ;;  %8666 = vst [vmem:[#allocation4_spill] sm:$0xff] %v6344_v7  ;;  %v2116_v38 = vmul.f32 %v6356_v19, %v6356_v19  ;;  %v2117_v41 = vmul.f32 %v6360_v6, %v6360_v6  ;;  %v6382_v31 = vsub.f32 %v6204_v13, %v6326_v48 }
 0x368   : > { %v2146_v0 = vsel %vm1413_vm4, %v2114_v21, 0.0  ;;  %v2147_v23 = vsel %vm1413_vm4, %v2115_v60, 0.0  ;;  %v2118_v59 = vmul.f32 %v6368_v25, %v6368_v25  ;;  %v6389_v15 = vsub.f32 %v6212_v62, %v6326_v48 }
 0x369   : > { %v2148_v17 = vadd.f32 %v2147_v23, %v2146_v0  ;;  %v2149_v39 = vsel %vm1413_vm4, %v2116_v38, 0.0  ;;  %v2119_v10 = vmul.f32 %v6374_v18, %v6374_v18  ;;  %v2151_v33 = vsel %vm1413_vm4, %v2117_v41, 0.0 }
 0x36a   : > { %v6396_v13 = vsub.f32 %v6216_v51, %v6326_v48  ;;  %v2120_v42 = vmul.f32 %v6382_v31, %v6382_v31  ;;  %v2153_v4 = vsel %vm1413_vm4, %v2118_v59, 0.0  ;;  %v6403_v62 = vsub.f32 %v6224_v27, %v6326_v48 }
 0x36b   : > { %v2150_v2 = vadd.f32 %v2149_v39, %v2148_v17  ;;  %v2121_v32 = vmul.f32 %v6389_v15, %v6389_v15  ;;  %v2155_v46 = vsel %vm1413_vm4, %v2119_v10, 0.0  ;;  %v6410_v51 = vsub.f32 %v6228_v8, %v6326_v48 }
 0x36c   : > { %v2122_v57 = vmul.f32 %v6396_v13, %v6396_v13  ;;  %v2157_v50 = vsel %vm1413_vm4, %v2120_v42, 0.0  ;;  %v6417_v27 = vsub.f32 %v6236_v20, %v6326_v48  ;;  %v2123_v5 = vmul.f32 %v6403_v62, %v6403_v62 }
 0x36d   : > { %v2152_v12 = vadd.f32 %v2151_v33, %v2150_v2  ;;  %v2159_v30 = vsel %vm1413_vm4, %v2121_v32, 0.0  ;;  %v6424_v8 = vsub.f32 %v6240_v14, %v6326_v48  ;;  %v2124_v43 = vmul.f32 %v6410_v51, %v6410_v51 }
 0x36e   : > { %v2161_v40 = vsel %vm1413_vm4, %v2122_v57, 0.0  ;;  %v6431_v20 = vsub.f32 %v6248_v52, %v6326_v48  ;;  %v2125_v49 = vmul.f32 %v6417_v27, %v6417_v27  ;;  %v2163_v21 = vsel %vm1413_vm4, %v2123_v5, 0.0 }
 0x36f   : > { %v2154_v28 = vadd.f32 %v2153_v4, %v2152_v12  ;;  %v6438_v14 = vsub.f32 %v6251_v55, %v6326_v48  ;;  %v2126_v38 = vmul.f32 %v6424_v8, %v6424_v8  ;;  %v2165_v41 = vsel %vm1413_vm4, %v2124_v43, 0.0 }
 0x370   : > { %v6445_v52 = vsub.f32 %v6258_v36, %v6326_v48  ;;  %v2127_v23 = vmul.f32 %v6431_v20, %v6431_v20  ;;  %v2167_v17 = vsel %vm1413_vm4, %v2125_v49, 0.0  ;;  %v6452_v55 = vsub.f32 %v6261_v26, %v6326_v48 }
 0x371   : > { %v2156_v56 = vadd.f32 %v2155_v46, %v2154_v28  ;;  %v2128_v39 = vmul.f32 %v6438_v14, %v6438_v14  ;;  %v2169_v2 = vsel %vm1413_vm4, %v2126_v38, 0.0  ;;  %v6459_v36 = vsub.f32 %v6268_v9, %v6326_v48 }
 0x372   : > { %v2129_v33 = vmul.f32 %v6445_v52, %v6445_v52  ;;  %v2171_v12 = vsel %vm1413_vm4, %v2127_v23, 0.0  ;;  %v6466_v26 = vsub.f32 %v6271_v16, %v6326_v48  ;;  %v2130_v4 = vmul.f32 %v6452_v55, %v6452_v55 }
 0x373   : > { %v2158_v47 = vadd.f32 %v2157_v50, %v2156_v56  ;;  %v2173_v28 = vsel %vm1413_vm4, %v2128_v39, 0.0  ;;  %v6473_v9 = vsub.f32 %v6279_v54, %v6326_v48  ;;  %v2131_v46 = vmul.f32 %v6459_v36, %v6459_v36 }
 0x374   : > { %v2175_v56 = vsel %vm1413_vm4, %v2129_v33, 0.0  ;;  %v6480_v16 = vsub.f32 %v6282_v24, %v6326_v48  ;;  %v2132_v50 = vmul.f32 %v6466_v26, %v6466_v26  ;;  %v6487_v54 = vsub.f32 %v6290_v34, %v6326_v48 }
 0x375   : > { %v2160_v35 = vadd.f32 %v2159_v30, %v2158_v47  ;;  %v2177_v47 = vsel %vm1413_vm4, %v2130_v4, 0.0  ;;  %v2133_v30 = vmul.f32 %v6473_v9, %v6473_v9  ;;  %v6494_v24 = vsub.f32 %v6293_v29, %v6326_v48 }
 0x376   : > { %v6501_v34 = vsub.f32 %v6300_v1, %v6326_v48  ;;  %v6508_v29 = vsub.f32 %v6303_v63, %v6326_v48  ;;  %v6515_v1 = vsub.f32 %v6310_v3, %v6326_v48  ;;  %v2140_v3 = vmul.f32 %v6329_v37, %v6329_v37 }
 0x377   : > { %v2162_v58 = vadd.f32 %v2161_v40, %v2160_v35  ;;  %v2179_v35 = vsel %vm1413_vm4, %v2131_v46, 0.0  ;;  %8667 = vst [vmem:[#allocation12_spill] sm:$0xff] %v6494_v24  ;;  %v2134_v40 = vmul.f32 %v6480_v16, %v6480_v16 }
 0x378   : > { %8668 = vst [vmem:[#allocation15_spill] sm:$0xff] %v6501_v34  ;;  %8669 = vst [vmem:[#allocation6_spill] sm:$0xff] %v6508_v29  ;;  %v2138_v63 = vmul.f32 %v6508_v29, %v6508_v29  ;;  %v2139_v33 = vmul.f32 %v6515_v1, %v6515_v1 }
 0x379   : > { %v2164_v60 = vadd.f32 %v2163_v21, %v2162_v58  ;;  %v2181_v58 = vsel %vm1413_vm4, %v2132_v50, 0.0  ;;  %v2135_v21 = vmul.f32 %v6487_v54, %v6487_v54  ;;  %8670 = vst [vmem:[#allocation9_spill] sm:$0xff] %v6515_v1 }
 0x37a   : > { %v2193_v48 = vsel %vm1413_vm4, %v2138_v63, 0.0 }
 0x37b   : > { %v2166_v0 = vadd.f32 %v2165_v41, %v2164_v60  ;;  %v2183_v60 = vsel %vm1413_vm4, %v2133_v30, 0.0  ;;  %v2136_v41 = vmul.f32 %v6494_v24, %v6494_v24 }
 0x37d   : > { %v2168_v59 = vadd.f32 %v2167_v17, %v2166_v0  ;;  %v2185_v0 = vsel %vm1413_vm4, %v2134_v40, 0.0  ;;  %v2137_v17 = vmul.f32 %v6501_v34, %v6501_v34 }
 0x37f   : > { %v2170_v10 = vadd.f32 %v2169_v2, %v2168_v59  ;;  %v2187_v59 = vsel %vm1413_vm4, %v2135_v21, 0.0  ;;  %v2189_v2 = vsel %vm1413_vm4, %v2136_v41, 0.0 }
 0x381   : > { %v2172_v42 = vadd.f32 %v2171_v12, %v2170_v10  ;;  %v2191_v12 = vsel %vm1413_vm4, %v2137_v17, 0.0 }
 0x383   : > { %v2174_v32 = vadd.f32 %v2173_v28, %v2172_v42  ;;  %v2141_v28 = vmul.f32 %v6332_v22, %v6332_v22 }
 0x385   : > { %v2176_v57 = vadd.f32 %v2175_v56, %v2174_v32  ;;  %v2195_v32 = vsel %vm1413_vm4, %v2139_v33, 0.0  ;;  %v2142_v56 = vmul.f32 %v6335_v44, %v6335_v44 }
 0x387   : > { %v2178_v5 = vadd.f32 %v2177_v47, %v2176_v57  ;;  %v2197_v57 = vsel %vm1413_vm4, %v2140_v3, 0.0  ;;  %v2143_v47 = vmul.f32 %v6338_v61, %v6338_v61 }
 0x389   : > { %v2180_v43 = vadd.f32 %v2179_v35, %v2178_v5  ;;  %v2199_v5 = vsel %vm1413_vm4, %v2141_v28, 0.0  ;;  %v2144_v35 = vmul.f32 %v6341_v45, %v6341_v45 }
 0x38b   : > { %v2182_v49 = vadd.f32 %v2181_v58, %v2180_v43  ;;  %v2201_v43 = vsel %vm1413_vm4, %v2142_v56, 0.0  ;;  %v2145_v58 = vmul.f32 %v6344_v7, %v6344_v7 }
 0x38d   : > { %v2184_v38 = vadd.f32 %v2183_v60, %v2182_v49  ;;  %v2203_v49 = vsel %vm1413_vm4, %v2143_v47, 0.0  ;;  %v2205_v60 = vsel %vm1413_vm4, %v2144_v35, 0.0  ;;  %v2207_v41 = vsel %vm1413_vm4, %v2145_v58, 0.0 }
 0x38f   : > { %v2186_v23 = vadd.f32 %v2185_v0, %v2184_v38 }
 0x391   : > { %v2188_v39 = vadd.f32 %v2187_v59, %v2186_v23 }
 0x393   : > { %v2190_v10 = vadd.f32 %v2189_v2, %v2188_v39 }
 0x395   : > { %v2192_v42 = vadd.f32 %v2191_v12, %v2190_v10 }
 0x397   : > { %v2194_v4 = vadd.f32 %v2193_v48, %v2192_v42 }
 0x399   : > { %v2196_v46 = vadd.f32 %v2195_v32, %v2194_v4 }
 0x39b   : > { %v2198_v50 = vadd.f32 %v2197_v57, %v2196_v46 }
 0x39d   : > { %v2200_v30 = vadd.f32 %v2199_v5, %v2198_v50 }
 0x39f   : > { %v2202_v40 = vadd.f32 %v2201_v43, %v2200_v30 }
 0x3a1   : > { %v2204_v21 = vadd.f32 %v2203_v49, %v2202_v40 }
 0x3a3   : > { %v2206_v38 = vadd.f32 %v2205_v60, %v2204_v21 }
 0x3a5   : > { %v2208_v0 = vadd.f32 %v2207_v41, %v2206_v38 }
 0x3a7   : > { %v2209_v23 = vrot.slane %v2208_v0, 4 }
 0x3a9   : > { %v2210_v17 = vadd.f32 %v2209_v23, %v2208_v0 }
 0x3ab   : > { %v2211_v59 = vrot.slane %v2210_v17, 2 }
 0x3ad   : > { %v2212_v39 = vadd.f32 %v2211_v59, %v2210_v17 }
 0x3af   : > { %v2213_v63 = vrot.slane %v2212_v39, 1 }
 0x3b1   : > { %v2214_v2 = vadd.f32 %v2213_v63, %v2212_v39 }
 0x3b3   : > { %v2215_v10 = vmul.f32 0.00390625, %v2214_v2 }
 0x3b5   : > { %v2216_v33 = vadd.f32 1e-05, %v2215_v10 }
 0x3b7   : > { %4683 = vrsqrt.f32 %v2216_v33 }
 0x3c1   : > { %v6546_v12 = vpop.eup %4683 }
 0x3c2   : > { %v2218_v42 = vmul.f32 %v6546_v12, %v6348_v53  ;;  %v2219_v3 = vmul.f32 %v6546_v12, %v6352_v11  ;;  %v2220_v53 = vmul.f32 %v6546_v12, %v6356_v19  ;;  %v2221_v11 = vmul.f32 %v6546_v12, %v6360_v6 }
 0x3c3   : > { %v2222_v5 = vmul.f32 %v6546_v12, %v6368_v25  ;;  %v2223_v30 = vmul.f32 %v6546_v12, %v6374_v18  ;;  %v2224_v35 = vmul.f32 %v6546_v12, %v6382_v31  ;;  %v2225_v19 = vmul.f32 %v6546_v12, %v6389_v15 }
 0x3c4   : > { %v2250_v48 = vmax.f32 %v2218_v42, 0.0  ;;  %v2251_v4 = vmax.f32 %v2219_v3, 0.0  ;;  %v2252_v50 = vmax.f32 %v2220_v53, 0.0  ;;  %v2253_v47 = vmax.f32 %v2221_v11, 0.0 }
 0x3c5   : > { %v2254_v6 = vmax.f32 %v2222_v5, 0.0  ;;  %v2255_v58 = vmax.f32 %v2223_v30, 0.0  ;;  %v2226_v21 = vmul.f32 %v6546_v12, %v6396_v13  ;;  %v6578_v25 = vmul.f32 %v6546_v12, %v6403_v62 }
 0x3c6   : > { %v2349_v28 = vrot.slane %v2250_v48, 7  ;;  %v2350_v32 = vrot.slane %v2251_v4, 7  ;;  %v2299_v56 = vrot.slane %v2250_v48, 1  ;;  %v2346_v43 = vrot.slane %v2252_v50, 7 }
 0x3c7   : > { %v2347_v40 = vrot.slane %v2253_v47, 7  ;;  %v2298_v49 = vrot.slane %v2252_v50, 1  ;;  %v2228_v18 = vmul.f32 %v6546_v12, %v6410_v51  ;;  %v6584_v31 = vmul.f32 %v6546_v12, %v6417_v27 }
 0x3c8   : > { %v6553_v46 = vsel %vm321_vm0, %v2349_v28, %v2350_v32  ;;  %v6558_v57 = vsel %vm321_vm0, %v2299_v56, %v2349_v28  ;;  %v2256_v15 = vmax.f32 %v2224_v35, 0.0  ;;  %v2257_v60 = vmax.f32 %v2225_v19, 0.0 }
 0x3c9   : > { %2868 = vrot.lane.b32.xlu0 %v6553_v46, %s4729_s26  ;;  %2866 = vrot.lane.b32.xlu1 %v6558_v57, %s4729_s26  ;;  %v6587_v38 = vsel %vm321_vm0, %v2346_v43, %v2347_v40  ;;  %v2352_v41 = vrot.slane %v2254_v6, 7  ;;  %v2353_v0 = vrot.slane %v2255_v58, 7  ;;  %v6590_v13 = vsel %vm321_vm0, %v2298_v49, %v2346_v43 }
 0x3ca   : > { %v2536_v62 = vrot.slane %v6587_v38, 1  ;;  %v6595_v23 = vmul.f32 %v6546_v12, %v6424_v8  ;;  %v6599_v51 = vmul.f32 %v6546_v12, %v6431_v20  ;;  %v2300_v27 = vrot.slane %v2254_v6, 1 }
 0x3cb   : > { %v2535_v17 = vrot.slane %v6590_v13, 1  ;;  %v6604_v59 = vmul.f32 %v6546_v12, %v6438_v14  ;;  %v2258_v39 = vmax.f32 %v2226_v21, 0.0  ;;  %v2442_v63 = vrot.slane %v2251_v4, 5 }
 0x3cc   : > { %v2441_v2 = vrot.slane %v2253_v47, 5  ;;  %v2541_v10 = vrot.slane %v6553_v46, 1  ;;  %v2259_v33 = vmax.f32 %v6578_v25, 0.0  ;;  %v2540_v8 = vrot.slane %v6558_v57, 1 }
 0x3cd   : > { %v6610_v42 = vsel %vm511_vm1, %v2535_v17, %v2536_v62  ;;  %v2301_v20 = vrot.slane %v2256_v15, 1  ;;  %v2355_v3 = vrot.slane %v2256_v15, 7  ;;  %v2356_v48 = vrot.slane %v2257_v60, 7 }
 0x3ce   : > { %2610 = vrot.lane.b32.xlu0 %v6610_v42, %s4727_s24  ;;  %v6615_v14 = vsel %vm321_vm0, %v2352_v41, %v2353_v0  ;;  %v6619_v4 = vmul.f32 %v6546_v12, %v6445_v52  ;;  %v2260_v28 = vmax.f32 %v2228_v18, 0.0  ;;  %v2261_v56 = vmax.f32 %v6584_v31, 0.0 }
 0x3cf   : > { %v6623_v53 = vsel %vm321_vm0, %v2300_v27, %v2352_v41  ;;  %v2302_v11 = vrot.slane %v2258_v39, 1  ;;  %v2443_v50 = vrot.slane %v2255_v58, 5  ;;  %v6626_v47 = vsel %vm321_vm0, %v2347_v40, %v2441_v2 }
 0x3d0   : > { %v6629_v5 = vsel %vm321_vm0, %v2350_v32, %v2442_v63  ;;  %v2358_v30 = vrot.slane %v2258_v39, 7  ;;  %v2538_v35 = vrot.slane %v6626_v47, 1  ;;  %v6633_v52 = vsel %vm511_vm1, %v2540_v8, %v2541_v10 }
 0x3d1   : > { %v2546_v19 = vrot.slane %v6615_v14, 1  ;;  %v2359_v43 = vrot.slane %v2259_v33, 7  ;;  %v6637_v6 = vsel %vm321_vm0, %v2355_v3, %v2356_v48  ;;  %v6640_v58 = vsel %vm321_vm0, %v2301_v20, %v2355_v3 }
 0x3d2   : > { %2614 = vrot.lane.b32.xlu0 %v6633_v52, %s4727_s24  ;;  %v2545_v32 = vrot.slane %v6623_v53, 1  ;;  %v2234_v40 = vmul.f32 %v6546_v12, %v6452_v55  ;;  %v2235_v49 = vmul.f32 %v6546_v12, %v6459_v36  ;;  %v6650_v21 = vsel %vm511_vm1, %v2536_v62, %v2538_v35 }
 0x3d3   : > { %v2543_v25 = vrot.slane %v6629_v5, 1  ;;  %v2262_v18 = vmax.f32 %v6595_v23, 0.0  ;;  %v2263_v31 = vmax.f32 %v6599_v51, 0.0  ;;  %v2444_v15 = vrot.slane %v2257_v60, 5  ;;  %2612 = vrot.lane.b32.xlu1 %v6650_v21, %s4727_s24 }
 0x3d4   : > { %v6658_v41 = vsel %vm321_vm0, %v2353_v0, %v2443_v50  ;;  %v2303_v55 = vrot.slane %v2260_v28, 1  ;;  %v6661_v27 = vsel %vm511_vm1, %v2545_v32, %v2546_v19  ;;  %v2551_v36 = vrot.slane %v6637_v6, 1 }
 0x3d5   : > { %v2550_v62 = vrot.slane %v6640_v58, 1  ;;  %v2361_v17 = vrot.slane %v2260_v28, 7  ;;  %v2362_v39 = vrot.slane %v2261_v56, 7  ;;  %v6666_v23 = vsel %vm321_vm0, %v2358_v30, %v2359_v43 }
 0x3d6   : > { %8671 = vst [vmem:[#allocation8_spill] sm:$0xff] %v6666_v23  ;;  %v6669_v60 = vsel %vm321_vm0, %v2302_v11, %v2358_v30  ;;  %2618 = vrot.lane.b32.xlu0 %v6661_v27, %s4727_s24  ;;  %v2264_v0 = vmax.f32 %v6604_v59, 0.0  ;;  %v2265_v51 = vmax.f32 %v6619_v4, 0.0  ;;  %v6676_v63 = vsel %vm511_vm1, %v2541_v10, %v2543_v25 }
 0x3d7   : > { %v2548_v2 = vrot.slane %v6658_v41, 1  ;;  %v2266_v8 = vmax.f32 %v2234_v40, 0.0  ;;  %v2267_v20 = vmax.f32 %v2235_v49, 0.0  ;;  %v2445_v3 = vrot.slane %v2259_v33, 5  ;;  %2616 = vrot.lane.b32.xlu1 %v6676_v63, %s4727_s24 }
 0x3d8   : > { %v6682_v28 = vsel %vm321_vm0, %v2356_v48, %v2444_v15  ;;  %v2304_v11 = vrot.slane %v2262_v18, 1  ;;  %v6685_v50 = vsel %vm511_vm1, %v2550_v62, %v2551_v36  ;;  %v2556_v59 = vrot.slane %v6666_v23, 1 }
 0x3d9   : > { %v2555_v10 = vrot.slane %v6669_v60, 1  ;;  %v2364_v4 = vrot.slane %v2262_v18, 7  ;;  %v2365_v30 = vrot.slane %v2263_v31, 7  ;;  %v6690_v35 = vsel %vm321_vm0, %v2361_v17, %v2362_v39 }
 0x3da   : > { %8672 = vst [vmem:[#allocation17_spill] sm:$0xff] %v6690_v35  ;;  %v6693_v33 = vsel %vm321_vm0, %v2303_v55, %v2361_v17  ;;  %2622 = vrot.lane.b32.xlu0 %v6685_v50, %s4727_s24  ;;  %v6698_v48 = vsel %vm511_vm1, %v2546_v19, %v2548_v2  ;;  %v2553_v32 = vrot.slane %v6682_v28, 1  ;;  %v2370_v40 = vrot.slane %v2266_v8, 7 }
 0x3db   : > { %8673 = vst [vmem:[#allocation10_spill] sm:$0xff] %v6693_v33  ;;  %v2371_v49 = vrot.slane %v2267_v20, 7  ;;  %v2446_v25 = vrot.slane %v2261_v56, 5  ;;  %2620 = vrot.lane.b32.xlu1 %v6698_v48, %s4727_s24  ;;  %v6704_v18 = vsel %vm321_vm0, %v2359_v43, %v2445_v3  ;;  %v2305_v15 = vrot.slane %v2264_v0, 1 }
 0x3dc   : > { %v6707_v55 = vsel %vm511_vm1, %v2555_v10, %v2556_v59  ;;  %v2561_v62 = vrot.slane %v6690_v35, 1  ;;  %v2560_v19 = vrot.slane %v6693_v33, 1  ;;  %v2367_v17 = vrot.slane %v2264_v0, 7 }
 0x3dd   : > { %v2368_v2 = vrot.slane %v2265_v51, 7  ;;  %v6712_v7 = vsel %vm321_vm0, %v2364_v4, %v2365_v30  ;;  %v6715_v56 = vsel %vm321_vm0, %v2304_v11, %v2364_v4  ;;  %v6720_v43 = vsel %vm511_vm1, %v2551_v36, %v2553_v32 }
 0x3de   : > { %2626 = vrot.lane.b32.xlu0 %v6707_v55, %s4727_s24  ;;  %v2558_v3 = vrot.slane %v6704_v18, 1  ;;  %v2447_v10 = vrot.slane %v2263_v31, 5  ;;  %v2449_v45 = vrot.slane %v2267_v20, 5  ;;  %v6724_v61 = vsel %vm321_vm0, %v2370_v40, %v2371_v49 }
 0x3df   : > { %2624 = vrot.lane.b32.xlu1 %v6720_v43, %s4727_s24  ;;  %v6729_v0 = vsel %vm321_vm0, %v2362_v39, %v2446_v25  ;;  %v6732_v11 = vsel %vm511_vm1, %v2560_v19, %v2561_v62  ;;  %v2566_v4 = vrot.slane %v6712_v7, 1  ;;  %v2565_v36 = vrot.slane %v6715_v56, 1 }
 0x3e0   : > { %v2306_v32 = vrot.slane %v2266_v8, 1  ;;  %v6737_v31 = vsel %vm321_vm0, %v2367_v17, %v2368_v2  ;;  %v6740_v20 = vsel %vm321_vm0, %v2305_v15, %v2367_v17  ;;  %v6745_v39 = vsel %vm511_vm1, %v2556_v59, %v2558_v3 }
 0x3e1   : > { %v2563_v25 = vrot.slane %v6729_v0, 1  ;;  %v2576_v19 = vrot.slane %v6724_v61, 1  ;;  %v2448_v44 = vrot.slane %v2265_v51, 5  ;;  %v6752_v8 = vsel %vm321_vm0, %v2365_v30, %v2447_v10 }
 0x3e2   : > { %2630 = vrot.lane.b32.xlu0 %v6732_v11, %s4727_s24  ;;  %v6755_v15 = vsel %vm321_vm0, %v2371_v49, %v2449_v45  ;;  %v6758_v17 = vsel %vm511_vm1, %v2565_v36, %v2566_v4  ;;  %v2571_v59 = vrot.slane %v6737_v31, 1  ;;  %v2570_v3 = vrot.slane %v6740_v20, 1 }
 0x3e3   : > { %2628 = vrot.lane.b32.xlu1 %v6745_v39, %s4727_s24  ;;  %v2578_v22 = vrot.slane %v6755_v15, 1  ;;  %v6764_v51 = vsel %vm321_vm0, %v2306_v32, %v2370_v40  ;;  %v6769_v30 = vsel %vm511_vm1, %v2561_v62, %v2563_v25  ;;  %v2568_v45 = vrot.slane %v6752_v8, 1 }
 0x3e4   : > { %v6778_v10 = vsel %vm321_vm0, %v2368_v2, %v2448_v44  ;;  %v6781_v40 = vsel %vm511_vm1, %v2570_v3, %v2571_v59  ;;  %v2575_v36 = vrot.slane %v6764_v51, 1  ;;  %v2701_v32 = vrot.slane %v6587_v38, 2 }
 0x3e5   : > { %v6773_v49 = vsel %vm511_vm1, %v2576_v19, %v2578_v22  ;;  %v6787_v62 = vsel %vm511_vm1, %v2566_v4, %v2568_v45  ;;  %v2573_v22 = vrot.slane %v6778_v10, 1  ;;  %v2703_v2 = vrot.slane %v6626_v47, 2 }
 0x3e6   : > { %2634 = vrot.lane.b32.xlu0 %v6758_v17, %s4727_s24  ;;  %v6794_v44 = vsel %vm511_vm1, %v2575_v36, %v2576_v19  ;;  %v2700_v4 = vrot.slane %v6590_v13, 2  ;;  %v2706_v47 = vrot.slane %v6553_v46, 2  ;;  %v2705_v45 = vrot.slane %v6558_v57, 2 }
 0x3e7   : > { %2632 = vrot.lane.b32.xlu1 %v6769_v30, %s4727_s24  ;;  %v6800_v25 = vsel %vm511_vm1, %v2571_v59, %v2573_v22  ;;  %v2704_v3 = vsel %vm677_vm2, %v2701_v32, %v2703_v2  ;;  %v2708_v36 = vrot.slane %v6629_v5, 2  ;;  %v3689_v5 = vld [vmem:[%s8496_s3 + $0x10] sm:$0xff]  ;;  %v3690_v2 = vld [vmem:[%s8496_s3 + $0x18] sm:$0xff] }
 0x3e8   : > { %v2702_v19 = vsel %vm677_vm2, %v2700_v4, %v2701_v32  ;;  %v2707_v59 = vsel %vm677_vm2, %v2705_v45, %v2706_v47  ;;  %v4663_v4 = vpack.c.bf16 %v3690_v2, %v3689_v5  ;;  %v2716_v45 = vrot.slane %v6637_v6, 2 }
 0x3e9   : > { %v2709_v22 = vsel %vm677_vm2, %v2706_v47, %v2708_v36  ;;  %v3691_v47 = vld [vmem:[%s8496_s3 + $0x20] sm:$0xf] }
 0x3ea   : > { %2638 = vrot.lane.b32.xlu0 %v6781_v40, %s4727_s24 }
 0x3eb   : > { %2636 = vrot.lane.b32.xlu1 %v6787_v62, %s4727_s24 }
 0x3ee   : > { %2642 = vrot.lane.b32.xlu0 %v6794_v44, %s4727_s24 }
 0x3ef   : > { %2640 = vrot.lane.b32.xlu1 %v6800_v25, %s4727_s24 }
 0x3f2   : > { %2777 = vrot.lane.b32.xlu0 %v2704_v3, %s4728_s25 }
 0x3f3   : > { %2775 = vrot.lane.b32.xlu1 %v2702_v19, %s4728_s25 }
 0x3f6   : > { %2970 = vrot.lane.b32.xlu0 %v6676_v63, %s4730_s27  ;;  %v3687_v63 = vld [vmem:[%s8496_s3] sm:$0xff] }
 0x3f7   : > { %2968 = vrot.lane.b32.xlu1 %v6633_v52, %s4730_s27  ;;  %v3688_v52 = vld [vmem:[%s8496_s3 + $0x8] sm:$0xff] }
 0x3f8   : > { %v4659_v32 = vpack.c.bf16 %v3688_v52, %v3687_v63 }
 0x3fa   : > { %2779 = vrot.lane.b32.xlu0 %v2707_v59, %s4728_s25  ;;  %4660 = vmatprep.subr.bf16.mxu1 %v4659_v32 }
 0x3fb   : > { %3069 = vrot.lane.b32.xlu1 %v2707_v59, %s4731_s28  ;;  %4662 = vmatpush3.bf16.msra.mxu1 %v4659_v32 }
 0x3fc   : > { %4664 = vmatprep.subr.bf16.mxu1 %v4663_v4 }
 0x3fe   : > { %3165 = vrot.lane.b32.xlu0 %v6590_v13, %s4732_s8 }
 0x3ff   : > { %3071 = vrot.lane.b32.xlu1 %v2709_v22, %s4731_s28  ;;  %4666 = vmatpush3.bf16.msra.mxu1 %v4663_v4 }
 0x400   : > { %4601 = vmatprep.subr.msk.mxu1 %vm1782_vm3, %v3691_v47 }
 0x402   : > { %2870 = vrot.lane.b32.xlu0 %v6590_v13, %s4729_s26 }
 0x403   : > { %2781 = vrot.lane.b32.xlu1 %v2709_v22, %s4728_s25  ;;  %4602 = vmatpush3.msk.msra.mxu1 %vm1782_vm3, %v3691_v47 }
 0x406   : > { %3255 = vrot.lane.b32.xlu0 %v6610_v42, %s4733_s13 }
 0x407   : > { %3167 = vrot.lane.b32.xlu1 %v6587_v38, %s4732_s8 }
 0x40a   : > { %2972 = vrot.lane.b32.xlu0 %v6610_v42, %s4730_s27  ;;  %v2710_v42 = vrot.slane %v6623_v53, 2 }
 0x40b   : > { %2872 = vrot.lane.b32.xlu1 %v6587_v38, %s4729_s26 }
 0x40e   : > { %3345 = vrot.lane.b32.xlu0 %v2702_v19, %s4734_s16 }
 0x40f   : > { %3257 = vrot.lane.b32.xlu1 %v6650_v21, %s4733_s13 }
 0x412   : > { %3073 = vrot.lane.b32.xlu0 %v2702_v19, %s4731_s28  ;;  %v2713_v19 = vrot.slane %v6658_v41, 2 }
 0x413   : > { %2974 = vrot.lane.b32.xlu1 %v6650_v21, %s4730_s27  ;;  %v2711_v21 = vrot.slane %v6615_v14, 2 }
 0x416   : > { %3075 = vrot.lane.b32.xlu0 %v2704_v3, %s4731_s28 }
 0x417   : > { %3347 = vrot.lane.b32.xlu1 %v2704_v3, %s4734_s16  ;;  %v2712_v3 = vsel %vm677_vm2, %v2710_v42, %v2711_v21 }
 0x41a   : > { %2874 = vrot.lane.b32.xlu0 %v6623_v53, %s4729_s26 }
 0x41b   : > { %3169 = vrot.lane.b32.xlu1 %v6623_v53, %s4732_s8 }
 0x41e   : > { %3259 = vrot.lane.b32.xlu0 %v6661_v27, %s4733_s13 }
 0x41f   : > { %3171 = vrot.lane.b32.xlu1 %v6615_v14, %s4732_s8 }
 0x422   : > { %2976 = vrot.lane.b32.xlu0 %v6661_v27, %s4730_s27  ;;  %v2714_v27 = vsel %vm677_vm2, %v2711_v21, %v2713_v19  ;;  %v2720_v19 = vrot.slane %v6669_v60, 2 }
 0x423   : > { %2876 = vrot.lane.b32.xlu1 %v6615_v14, %s4729_s26 }
 0x426   : > { %3349 = vrot.lane.b32.xlu0 %v2712_v3, %s4734_s16 }
 0x427   : > { %3261 = vrot.lane.b32.xlu1 %v6698_v48, %s4733_s13 }
 0x42a   : > { %3077 = vrot.lane.b32.xlu0 %v2712_v3, %s4731_s28 }
 0x42b   : > { %2978 = vrot.lane.b32.xlu1 %v6698_v48, %s4730_s27  ;;  %v2715_v48 = vrot.slane %v6640_v58, 2 }
 0x42d   : > { %v2717_v22 = vsel %vm677_vm2, %v2715_v48, %v2716_v45 }
 0x42e   : > { %2783 = vrot.lane.b32.xlu0 %v2712_v3, %s4728_s25 }
 0x42f   : > { %3351 = vrot.lane.b32.xlu1 %v2714_v27, %s4734_s16 }
 0x432   : > { %3173 = vrot.lane.b32.xlu0 %v6640_v58, %s4732_s8 }
 0x433   : > { %3079 = vrot.lane.b32.xlu1 %v2714_v27, %s4731_s28 }
 0x436   : > { %2878 = vrot.lane.b32.xlu0 %v6640_v58, %s4729_s26 }
 0x437   : > { %2785 = vrot.lane.b32.xlu1 %v2714_v27, %s4728_s25  ;;  %v2721_v27 = vrot.slane %v6666_v23, 2 }
 0x43a   : > { %3263 = vrot.lane.b32.xlu0 %v6685_v50, %s4733_s13 }
 0x43b   : > { %v6892_v41 = vpop.permute.xlu0 %2868  ;;  %3175 = vrot.lane.b32.xlu1 %v6637_v6, %s4732_s8  ;;  %v6902_v59 = vpop.permute.xlu1 %2866 }
 0x43e   : > { %2980 = vrot.lane.b32.xlu0 %v6685_v50, %s4730_s27  ;;  %v2718_v50 = vrot.slane %v6682_v28, 2 }
 0x43f   : > { %2880 = vrot.lane.b32.xlu1 %v6637_v6, %s4729_s26 }
 0x440   : > { %v6904_v36 = vpop.permute.xlu0 %2610  ;;  %v2719_v2 = vsel %vm677_vm2, %v2716_v45, %v2718_v50 }
 0x442   : > { %3353 = vrot.lane.b32.xlu0 %v2717_v22, %s4734_s16 }
 0x443   : > { %3265 = vrot.lane.b32.xlu1 %v6720_v43, %s4733_s13 }
 0x444   : > { %v6910_v63 = vpop.permute.xlu0 %2614 }
 0x445   : > { %v6912_v52 = vpop.permute.xlu1 %2612 }
 0x446   : > { %3081 = vrot.lane.b32.xlu0 %v2717_v22, %s4731_s28 }
 0x447   : > { %2982 = vrot.lane.b32.xlu1 %v6720_v43, %s4730_s27 }
 0x448   : > { %v6918_v32 = vpop.permute.xlu0 %2618 }
 0x449   : > { %v6920_v5 = vpop.permute.xlu1 %2616 }
 0x44a   : > { %2787 = vrot.lane.b32.xlu0 %v2717_v22, %s4728_s25  ;;  %v2722_v22 = vsel %vm677_vm2, %v2720_v19, %v2721_v27 }
 0x44b   : > { %3355 = vrot.lane.b32.xlu1 %v2719_v2, %s4734_s16 }
 0x44c   : > { %v6925_v4 = vpop.permute.xlu0 %2622 }
 0x44d   : > { %v6927_v47 = vpop.permute.xlu1 %2620 }
 0x44e   : > { %3177 = vrot.lane.b32.xlu0 %v6669_v60, %s4732_s8 }
 0x44f   : > { %3083 = vrot.lane.b32.xlu1 %v2719_v2, %s4731_s28 }
 0x450   : > { %v6932_v28 = vpop.permute.xlu0 %2626 }
 0x451   : > { %v6934_v43 = vpop.permute.xlu1 %2624 }
 0x452   : > { %2882 = vrot.lane.b32.xlu0 %v6669_v60, %s4729_s26 }
 0x453   : > { %2789 = vrot.lane.b32.xlu1 %v2719_v2, %s4728_s25 }
 0x454   : > { %v6939_v42 = vpop.permute.xlu0 %2630 }
 0x455   : > { %8674 = vst [vmem:[#allocation14_spill] sm:$0xff] %v6939_v42  ;;  %v6941_v21 = vpop.permute.xlu1 %2628 }
 0x456   : > { %3267 = vrot.lane.b32.xlu0 %v6707_v55, %s4733_s13 }
 0x457   : > { %3179 = vrot.lane.b32.xlu1 %v6666_v23, %s4732_s8 }
 0x458   : > { %v6947_v3 = vpop.permute.xlu0 %2634 }
 0x459   : > { %8675 = vst [vmem:[#allocation13_spill] sm:$0xff] %v6947_v3  ;;  %v6951_v48 = vpop.permute.xlu1 %2632 }
 0x45a   : > { %8676 = vst [vmem:[#allocation16_spill] sm:$0xff] %v6951_v48  ;;  %2984 = vrot.lane.b32.xlu0 %v6707_v55, %s4730_s27  ;;  %v2723_v55 = vrot.slane %v6704_v18, 2 }
 0x45b   : > { %2884 = vrot.lane.b32.xlu1 %v6666_v23, %s4729_s26 }
 0x45c   : > { %v6957_v45 = vpop.permute.xlu0 %2638 }
 0x45d   : > { %8677 = vst [vmem:[#allocation18_spill] sm:$0xff] %v6957_v45  ;;  %v6960_v50 = vpop.permute.xlu1 %2636 }
 0x45e   : > { %8678 = vst [vmem:[#allocation23_spill] sm:$0xff] %v6960_v50  ;;  %3357 = vrot.lane.b32.xlu0 %v2722_v22, %s4734_s16  ;;  %v2724_v50 = vsel %vm677_vm2, %v2721_v27, %v2723_v55  ;;  %v2725_v55 = vrot.slane %v6693_v33, 2 }
 0x45f   : > { %3269 = vrot.lane.b32.xlu1 %v6745_v39, %s4733_s13 }
 0x460   : > { %v6965_v2 = vpop.permute.xlu0 %2642 }
 0x461   : > { %8679 = vst [vmem:[#allocation32_spill] sm:$0xff] %v6965_v2  ;;  %v6967_v37 = vpop.permute.xlu1 %2640 }
 0x462   : > { %8680 = vst [vmem:[#allocation24_spill] sm:$0xff] %v6967_v37  ;;  %3085 = vrot.lane.b32.xlu0 %v2722_v22, %s4731_s28  ;;  %v2726_v37 = vrot.slane %v6690_v35, 2 }
 0x463   : > { %2986 = vrot.lane.b32.xlu1 %v6745_v39, %s4730_s27 }
 0x464   : > { %v2778_v45 = vpop.permute.xlu0 %2777 }
 0x465   : > { %v2776_v19 = vpop.permute.xlu1 %2775 }
 0x466   : > { %2791 = vrot.lane.b32.xlu0 %v2722_v22, %s4728_s25 }
 0x467   : > { %3359 = vrot.lane.b32.xlu1 %v2724_v50, %s4734_s16 }
 0x468   : > { %v2971_v3 = vpop.permute.xlu0 %2970 }
 0x469   : > { %v2969_v1 = vpop.permute.xlu1 %2968 }
 0x46a   : > { %3181 = vrot.lane.b32.xlu0 %v6693_v33, %s4732_s8 }
 0x46b   : > { %3087 = vrot.lane.b32.xlu1 %v2724_v50, %s4731_s28 }
 0x46c   : > { %v6979_v2 = vpop.permute.xlu0 %2779 }
 0x46d   : > { %v3070_v18 = vpop.permute.xlu1 %3069 }
 0x46e   : > { %2886 = vrot.lane.b32.xlu0 %v6693_v33, %s4729_s26  ;;  %v2727_v33 = vsel %vm677_vm2, %v2725_v55, %v2726_v37  ;;  %v2728_v55 = vrot.slane %v6729_v0, 2 }
 0x46f   : > { %2793 = vrot.lane.b32.xlu1 %v2724_v50, %s4728_s25  ;;  %v3435_v50 = vsel %vm1413_vm4, %v6590_v13, %v6904_v36 }
 0x470   : > { %v3166_v39 = vpop.permute.xlu0 %3165  ;;  %v7000_v42 = vsel %vm1444_vm5, %v3435_v50, %v2776_v19  ;;  %v2729_v0 = vsel %vm677_vm2, %v2726_v37, %v2728_v55 }
 0x471   : > { %v3072_v22 = vpop.permute.xlu1 %3071 }
 0x472   : > { %3271 = vrot.lane.b32.xlu0 %v6732_v11, %s4733_s13 }
 0x473   : > { %3183 = vrot.lane.b32.xlu1 %v6690_v35, %s4732_s8 }
 0x474   : > { %v2871_v27 = vpop.permute.xlu0 %2870 }
 0x475   : > { %v6990_v29 = vpop.permute.xlu1 %2781 }
 0x476   : > { %2988 = vrot.lane.b32.xlu0 %v6732_v11, %s4730_s27  ;;  %v3495_v11 = vsel %vm1475_vm6, %v7000_v42, %v6902_v59 }
 0x477   : > { %2888 = vrot.lane.b32.xlu1 %v6690_v35, %s4729_s26  ;;  %v3527_v36 = vsel %vm1508_vm7, %v3495_v11, %v2969_v1  ;;  %v3436_v1 = vsel %vm1413_vm4, %v6587_v38, %v6912_v52 }
 0x478   : > { %v3256_v48 = vpop.permute.xlu0 %3255  ;;  %v3559_v35 = vsel %vm1541_vm8, %v3527_v36, %v3070_v18  ;;  %v2731_v36 = vrot.slane %v6712_v7, 2 }
 0x479   : > { %v3168_v34 = vpop.permute.xlu1 %3167  ;;  %v3591_v19 = vsel %vm1574_vm9, %v3559_v35, %v3166_v39  ;;  %v7026_v35 = vsel %vm1444_vm5, %v3436_v1, %v2778_v45 }
 0x47a   : > { %3361 = vrot.lane.b32.xlu0 %v2727_v33, %s4734_s16  ;;  %v3623_v50 = vsel %vm1607_vm10, %v3591_v19, %v3256_v48  ;;  %v3496_v48 = vsel %vm1475_vm6, %v7026_v35, %v6892_v41  ;;  %v3437_v19 = vsel %vm1413_vm4, %v6558_v57, %v6910_v63 }
 0x47b   : > { %3273 = vrot.lane.b32.xlu1 %v6769_v30, %s4733_s13  ;;  %v3528_v38 = vsel %vm1508_vm7, %v3496_v48, %v2971_v3 }
 0x47c   : > { %v2973_v13 = vpop.permute.xlu0 %2972 }
 0x47d   : > { %v7011_v24 = vpop.permute.xlu1 %2872 }
 0x47e   : > { %3089 = vrot.lane.b32.xlu0 %v2727_v33, %s4731_s28 }
 0x47f   : > { %2990 = vrot.lane.b32.xlu1 %v6769_v30, %s4730_s27 }
 0x480   : > { %v3346_v59 = vpop.permute.xlu0 %3345 }
 0x481   : > { %v3655_v23 = vsel %vm1640_vm11, %v3623_v50, %v3346_v59  ;;  %v3258_v18 = vpop.permute.xlu1 %3257  ;;  %v3467_v50 = vsel %vm1444_vm5, %v3437_v19, %v6979_v2  ;;  %v2735_v19 = vrot.slane %v6740_v20, 2 }
 0x482   : > { %2795 = vrot.lane.b32.xlu0 %v2727_v33, %s4728_s25  ;;  %4603 = vmatprep.mubr.msk.f32.mxu1 %vm1685_vm12, %v3655_v23  ;;  %v3560_v23 = vsel %vm1541_vm8, %v3528_v38, %v3072_v22  ;;  %v2730_v22 = vrot.slane %v6715_v56, 2  ;;  %v3497_v59 = vsel %vm1475_vm6, %v3467_v50, %v2871_v27 }
 0x483   : > { %3363 = vrot.lane.b32.xlu1 %v2729_v0, %s4734_s16  ;;  %v3592_v37 = vsel %vm1574_vm9, %v3560_v23, %v3168_v34 }
 0x484   : > { %v3074_v30 = vpop.permute.xlu0 %3073  ;;  %v3624_v52 = vsel %vm1607_vm10, %v3592_v37, %v3258_v18  ;;  %v3529_v18 = vsel %vm1508_vm7, %v3497_v59, %v2973_v13  ;;  %v2733_v13 = vrot.slane %v6752_v8, 2 }
 0x485   : > { %v2975_v39 = vpop.permute.xlu1 %2974  ;;  %v3561_v48 = vsel %vm1541_vm8, %v3529_v18, %v3074_v30  ;;  %v3438_v30 = vsel %vm1413_vm4, %v6553_v46, %v6920_v5 }
 0x486   : > { %3185 = vrot.lane.b32.xlu0 %v6715_v56, %s4732_s8  ;;  %v3468_v37 = vsel %vm1444_vm5, %v3438_v30, %v6990_v29  ;;  %v2734_v8 = vsel %vm677_vm2, %v2731_v36, %v2733_v13 }
 0x487   : > { %3091 = vrot.lane.b32.xlu1 %v2729_v0, %s4731_s28 }
 0x488   : > { %v3076_v33 = vpop.permute.xlu0 %3075 }
 0x489   : > { %v3348_v45 = vpop.permute.xlu1 %3347 }
 0x48a   : > { %2890 = vrot.lane.b32.xlu0 %v6715_v56, %s4729_s26  ;;  %v3656_v41 = vsel %vm1640_vm11, %v3624_v52, %v3348_v45  ;;  %v3498_v52 = vsel %vm1475_vm6, %v3468_v37, %v7011_v24 }
 0x48b   : > { %2797 = vrot.lane.b32.xlu1 %v2729_v0, %s4728_s25  ;;  %4604 = vmatmul.mubr.msk.f32.vlgmr.msra.gmra.mrb[0].mxu1 %vm1685_vm12, %v3656_v41  ;;  %v2732_v0 = vsel %vm677_vm2, %v2730_v22, %v2731_v36  ;;  %v3530_v41 = vsel %vm1508_vm7, %v3498_v52, %v2975_v39 }
 0x48c   : > { %v2875_v3 = vpop.permute.xlu0 %2874 }
 0x48d   : > { %v3170_v11 = vpop.permute.xlu1 %3169  ;;  %v3499_v59 = vsel %vm1475_vm6, %v7000_v42, %v2875_v3 }
 0x48e   : > { %3275 = vrot.lane.b32.xlu0 %v6758_v17, %s4733_s13 }
 0x48f   : > { %3187 = vrot.lane.b32.xlu1 %v6712_v7, %s4732_s8 }
 0x490   : > { %v3260_v34 = vpop.permute.xlu0 %3259 }
 0x491   : > { %v3172_v55 = vpop.permute.xlu1 %3171 }
 0x492   : > { %2992 = vrot.lane.b32.xlu0 %v6758_v17, %s4730_s27  ;;  %v3593_v17 = vsel %vm1574_vm9, %v3561_v48, %v3170_v11  ;;  %v3562_v11 = vsel %vm1541_vm8, %v3530_v41, %v3076_v33 }
 0x493   : > { %2892 = vrot.lane.b32.xlu1 %v6712_v7, %s4729_s26  ;;  %v3625_v63 = vsel %vm1607_vm10, %v3593_v17, %v3260_v34 }
 0x494   : > { %v2977_v1 = vpop.permute.xlu0 %2976 }
 0x495   : > { %v7064_v57 = vpop.permute.xlu1 %2876 }
 0x496   : > { %3365 = vrot.lane.b32.xlu0 %v2732_v0, %s4734_s16  ;;  %v3500_v13 = vsel %vm1475_vm6, %v7026_v35, %v7064_v57 }
 0x497   : > { %3277 = vrot.lane.b32.xlu1 %v6787_v62, %s4733_s13 }
 0x498   : > { %v3350_v2 = vpop.permute.xlu0 %3349 }
 0x499   : > { %v3657_v27 = vsel %vm1640_vm11, %v3625_v63, %v3350_v2  ;;  %v3262_v38 = vpop.permute.xlu1 %3261 }
 0x49a   : > { %3093 = vrot.lane.b32.xlu0 %v2732_v0, %s4731_s28  ;;  %4606 = vmatprep.mubr.msk.f32.mxu1 %vm1685_vm12, %v3657_v27 }
 0x49b   : > { %2994 = vrot.lane.b32.xlu1 %v6787_v62, %s4730_s27  ;;  %v3594_v62 = vsel %vm1574_vm9, %v3562_v11, %v3172_v55  ;;  %v2736_v55 = vrot.slane %v6737_v31, 2 }
 0x49c   : > { %v3078_v23 = vpop.permute.xlu0 %3077  ;;  %v3626_v29 = vsel %vm1607_vm10, %v3594_v62, %v3262_v38 }
 0x49d   : > { %v2979_v45 = vpop.permute.xlu1 %2978  ;;  %v2737_v48 = vsel %vm677_vm2, %v2735_v19, %v2736_v55 }
 0x49e   : > { %2799 = vrot.lane.b32.xlu0 %v2732_v0, %s4728_s25  ;;  %v3531_v0 = vsel %vm1508_vm7, %v3499_v59, %v2977_v1  ;;  %v2738_v1 = vrot.slane %v6778_v10, 2 }
 0x49f   : > { %3367 = vrot.lane.b32.xlu1 %v2734_v8, %s4734_s16  ;;  %v3563_v17 = vsel %vm1541_vm8, %v3531_v0, %v3078_v23  ;;  %v3532_v23 = vsel %vm1508_vm7, %v3500_v13, %v2979_v45 }
 0x4a0   : > { %v7089_v46 = vpop.permute.xlu0 %2783  ;;  %v2739_v37 = vsel %vm677_vm2, %v2736_v55, %v2738_v1 }
 0x4a1   : > { %v3352_v5 = vpop.permute.xlu1 %3351 }
 0x4a2   : > { %3189 = vrot.lane.b32.xlu0 %v6740_v20, %s4732_s8  ;;  %v3658_v24 = vsel %vm1640_vm11, %v3626_v29, %v3352_v5  ;;  %v2740_v5 = vrot.slane %v6764_v51, 2 }
 0x4a3   : > { %3095 = vrot.lane.b32.xlu1 %v2734_v8, %s4731_s28  ;;  %4607 = vmatmul.mubr.msk.f32.gmra.mrb[2].mxu1 %vm1685_vm12, %v3658_v24  ;;  %v2741_v24 = vrot.slane %v6724_v61, 2 }
 0x4a4   : > { %v3174_v39 = vpop.permute.xlu0 %3173 }
 0x4a5   : > { %v3080_v33 = vpop.permute.xlu1 %3079  ;;  %v3595_v2 = vsel %vm1574_vm9, %v3563_v17, %v3174_v39  ;;  %v3439_v39 = vsel %vm1413_vm4, %v6623_v53, %v6918_v32  ;;  %v2742_v59 = vsel %vm677_vm2, %v2740_v5, %v2741_v24  ;;  %v2743_v17 = vrot.slane %v6755_v15, 2 }
 0x4a6   : > { %2894 = vrot.lane.b32.xlu0 %v6740_v20, %s4729_s26  ;;  %v3564_v52 = vsel %vm1541_vm8, %v3532_v23, %v3080_v33 }
 0x4a7   : > { %2801 = vrot.lane.b32.xlu1 %v2734_v8, %s4728_s25 }
 0x4a8   : > { %v2879_v34 = vpop.permute.xlu0 %2878 }
 0x4a9   : > { %v7101_v22 = vpop.permute.xlu1 %2785 }
 0x4aa   : > { %3279 = vrot.lane.b32.xlu0 %v6781_v40, %s4733_s13 }
 0x4ab   : > { %3191 = vrot.lane.b32.xlu1 %v6737_v31, %s4732_s8 }
 0x4ac   : > { %v3264_v36 = vpop.permute.xlu0 %3263 }
 0x4ad   : > { %v3176_v50 = vpop.permute.xlu1 %3175 }
 0x4ae   : > { %2996 = vrot.lane.b32.xlu0 %v6781_v40, %s4730_s27  ;;  %v3627_v40 = vsel %vm1607_vm10, %v3595_v2, %v3264_v36  ;;  %v3469_v36 = vsel %vm1444_vm5, %v3439_v39, %v7089_v46  ;;  %v2237_v2 = vmul.f32 %v6546_v12, %v6473_v9 }
 0x4af   : > { %2896 = vrot.lane.b32.xlu1 %v6737_v31, %s4729_s26  ;;  %v3501_v19 = vsel %vm1475_vm6, %v3469_v36, %v2879_v34  ;;  %v3441_v36 = vsel %vm1413_vm4, %v6640_v58, %v6925_v4 }
 0x4b0   : > { %v2981_v18 = vpop.permute.xlu0 %2980 }
 0x4b1   : > { %v7118_v63 = vpop.permute.xlu1 %2880 }
 0x4b2   : > { %3369 = vrot.lane.b32.xlu0 %v2737_v48, %s4734_s16 }
 0x4b3   : > { %3281 = vrot.lane.b32.xlu1 %v6800_v25, %s4733_s13 }
 0x4b4   : > { %v3354_v42 = vpop.permute.xlu0 %3353 }
 0x4b5   : > { %v3659_v3 = vsel %vm1640_vm11, %v3627_v40, %v3354_v42  ;;  %v3266_v27 = vpop.permute.xlu1 %3265  ;;  %v3440_v40 = vsel %vm1413_vm4, %v6615_v14, %v6927_v47  ;;  %v2744_v14 = vsel %vm677_vm2, %v2741_v24, %v2743_v17  ;;  %v2269_v47 = vmax.f32 %v2237_v2, 0.0 }
 0x4b6   : > { %3097 = vrot.lane.b32.xlu0 %v2737_v48, %s4731_s28  ;;  %4609 = vmatprep.mubr.msk.f32.mxu1 %vm1685_vm12, %v3659_v3  ;;  %v3470_v3 = vsel %vm1444_vm5, %v3440_v40, %v7101_v22  ;;  %v3442_v40 = vsel %vm1413_vm4, %v6637_v6, %v6934_v43  ;;  %v2239_v43 = vmul.f32 %v6546_v12, %v6487_v54 }
 0x4b7   : > { %2998 = vrot.lane.b32.xlu1 %v6800_v25, %s4730_s27  ;;  %v3596_v25 = vsel %vm1574_vm9, %v3564_v52, %v3176_v50  ;;  %v3533_v50 = vsel %vm1508_vm7, %v3501_v19, %v2981_v18  ;;  %v2236_v18 = vmul.f32 %v6546_v12, %v6466_v26 }
 0x4b8   : > { %v3082_v38 = vpop.permute.xlu0 %3081  ;;  %v3628_v41 = vsel %vm1607_vm10, %v3596_v25, %v3266_v27  ;;  %v3502_v27 = vsel %vm1475_vm6, %v3470_v3, %v7118_v63  ;;  %v2450_v25 = vrot.slane %v2269_v47, 5 }
 0x4b9   : > { %v2983_v30 = vpop.permute.xlu1 %2982  ;;  %v3565_v53 = vsel %vm1541_vm8, %v3533_v50, %v3082_v38  ;;  %v2268_v9 = vmax.f32 %v2236_v18, 0.0 }
 0x4ba   : > { %2803 = vrot.lane.b32.xlu0 %v2737_v48, %s4728_s25  ;;  %v3534_v15 = vsel %vm1508_vm7, %v3502_v27, %v2983_v30 }
 0x4bb   : > { %3371 = vrot.lane.b32.xlu1 %v2739_v37, %s4734_s16  ;;  %v2373_v23 = vrot.slane %v2268_v9, 7 }
 0x4bc   : > { %v7139_v10 = vpop.permute.xlu0 %2787 }
 0x4bd   : > { %v3356_v8 = vpop.permute.xlu1 %3355  ;;  %v3471_v50 = vsel %vm1444_vm5, %v3441_v36, %v7139_v10 }
 0x4be   : > { %3193 = vrot.lane.b32.xlu0 %v6764_v51, %s4732_s8  ;;  %v3660_v35 = vsel %vm1640_vm11, %v3628_v41, %v3356_v8 }
 0x4bf   : > { %3099 = vrot.lane.b32.xlu1 %v2739_v37, %s4731_s28  ;;  %4610 = vmatmul.mubr.msk.f32.gmra.mrb[4].mxu1 %vm1685_vm12, %v3660_v35 }
 0x4c0   : > { %v3178_v57 = vpop.permute.xlu0 %3177 }
 0x4c1   : > { %v3084_v45 = vpop.permute.xlu1 %3083 }
 0x4c2   : > { %2898 = vrot.lane.b32.xlu0 %v6764_v51, %s4729_s26  ;;  %v3566_v1 = vsel %vm1541_vm8, %v3534_v15, %v3084_v45  ;;  %v2238_v15 = vmul.f32 %v6546_v12, %v6480_v16 }
 0x4c3   : > { %2805 = vrot.lane.b32.xlu1 %v2739_v37, %s4728_s25  ;;  %v2374_v37 = vrot.slane %v2269_v47, 7 }
 0x4c4   : > { %v7151_v11 = vpop.permute.xlu0 %2882  ;;  %v2270_v16 = vmax.f32 %v2238_v15, 0.0 }
 0x4c5   : > { %v7153_v62 = vpop.permute.xlu1 %2789  ;;  %v7221_v35 = vsel %vm321_vm0, %v2373_v23, %v2374_v37 }
 0x4c6   : > { %3283 = vrot.lane.b32.xlu0 %v6794_v44, %s4733_s13  ;;  %v2581_v24 = vrot.slane %v7221_v35, 1  ;;  %v3472_v3 = vsel %vm1444_vm5, %v3442_v40, %v7153_v62 }
 0x4c7   : > { %3195 = vrot.lane.b32.xlu1 %v6724_v61, %s4732_s8 }
 0x4c8   : > { %v3268_v29 = vpop.permute.xlu0 %3267 }
 0x4c9   : > { %v3180_v33 = vpop.permute.xlu1 %3179 }
 0x4ca   : > { %3000 = vrot.lane.b32.xlu0 %v6794_v44, %s4730_s27  ;;  %v3597_v44 = vsel %vm1574_vm9, %v3565_v53, %v3178_v57  ;;  %v3598_v22 = vsel %vm1574_vm9, %v3566_v1, %v3180_v33  ;;  %v3503_v53 = vsel %vm1475_vm6, %v3471_v50, %v7151_v11  ;;  %v2746_v11 = vrot.slane %v7221_v35, 2 }
 0x4cb   : > { %2900 = vrot.lane.b32.xlu1 %v6724_v61, %s4729_s26  ;;  %v3629_v46 = vsel %vm1607_vm10, %v3597_v44, %v3268_v29  ;;  %v2498_v29 = vsel %vm321_vm0, %v2374_v37, %v2450_v25 }
 0x4cc   : > { %v7171_v55 = vpop.permute.xlu0 %2984  ;;  %v2583_v33 = vrot.slane %v2498_v29, 1  ;;  %v2748_v6 = vrot.slane %v2498_v29, 2 }
 0x4cd   : > { %v7176_v32 = vpop.permute.xlu1 %2884 }
 0x4ce   : > { %3373 = vrot.lane.b32.xlu0 %v2742_v59, %s4734_s16  ;;  %v2584_v58 = vsel %vm511_vm1, %v2581_v24, %v2583_v33  ;;  %v3504_v27 = vsel %vm1475_vm6, %v3472_v3, %v7176_v32 }
 0x4cf   : > { %3285 = vrot.lane.b32.xlu1 %v6773_v49, %s4733_s13 }
 0x4d0   : > { %v3358_v34 = vpop.permute.xlu0 %3357 }
 0x4d1   : > { %v3661_v0 = vsel %vm1640_vm11, %v3629_v46, %v3358_v34  ;;  %v3270_v48 = vpop.permute.xlu1 %3269  ;;  %v3535_v46 = vsel %vm1508_vm7, %v3503_v53, %v7171_v55 }
 0x4d2   : > { %3101 = vrot.lane.b32.xlu0 %v2742_v59, %s4731_s28  ;;  %4612 = vmatprep.mubr.msk.f32.mxu1 %vm1685_vm12, %v3661_v0  ;;  %v3630_v63 = vsel %vm1607_vm10, %v3598_v22, %v3270_v48 }
 0x4d3   : > { %3002 = vrot.lane.b32.xlu1 %v6773_v49, %s4730_s27 }
 0x4d4   : > { %v3086_v42 = vpop.permute.xlu0 %3085 }
 0x4d5   : > { %v7200_v26 = vpop.permute.xlu1 %2986  ;;  %v3567_v4 = vsel %vm1541_vm8, %v3535_v46, %v3086_v42 }
 0x4d6   : > { %2644 = vrot.lane.b32.xlu0 %v6773_v49, %s4727_s24  ;;  %v2307_v49 = vrot.slane %v2268_v9, 1 }
 0x4d7   : > { %3375 = vrot.lane.b32.xlu1 %v2744_v14, %s4734_s16 }
 0x4d8   : > { %v7208_v38 = vpop.permute.xlu0 %2791  ;;  %v7218_v8 = vsel %vm321_vm0, %v2307_v49, %v2373_v23  ;;  %v2308_v23 = vrot.slane %v2270_v16, 1 }
 0x4d9   : > { %v3360_v13 = vpop.permute.xlu1 %3359  ;;  %v2580_v5 = vrot.slane %v7218_v8, 1  ;;  %v2745_v0 = vrot.slane %v7218_v8, 2 }
 0x4da   : > { %3103 = vrot.lane.b32.xlu0 %v2744_v14, %s4731_s28  ;;  %v3662_v30 = vsel %vm1640_vm11, %v3630_v63, %v3360_v13  ;;  %v2749_v63 = vsel %vm677_vm2, %v2746_v11, %v2748_v6  ;;  %v2271_v13 = vmax.f32 %v2239_v43, 0.0 }
 0x4db   : > { %2807 = vrot.lane.b32.xlu1 %v2742_v59, %s4728_s25  ;;  %4613 = vmatmul.mubr.msk.f32.gmra.mrb[6].mxu1 %vm1685_vm12, %v3662_v30  ;;  %v2582_v59 = vsel %vm511_vm1, %v2580_v5, %v2581_v24  ;;  %v2747_v2 = vsel %vm677_vm2, %v2745_v0, %v2746_v11  ;;  %v2376_v30 = vrot.slane %v2270_v16, 7 }
 0x4dc   : > { %v3182_v52 = vpop.permute.xlu0 %3181  ;;  %v2377_v37 = vrot.slane %v2271_v13, 7  ;;  %v2451_v25 = vrot.slane %v2271_v13, 5 }
 0x4dd   : > { %v3088_v41 = vpop.permute.xlu1 %3087  ;;  %v3599_v10 = vsel %vm1574_vm9, %v3567_v4, %v3182_v52  ;;  %v7301_v29 = vsel %vm321_vm0, %v2308_v23, %v2376_v30 }
 0x4de   : > { %2809 = vrot.lane.b32.xlu0 %v2744_v14, %s4728_s25  ;;  %v3536_v14 = vsel %vm1508_vm7, %v3504_v27, %v7200_v26  ;;  %v7304_v5 = vsel %vm321_vm0, %v2376_v30, %v2377_v37  ;;  %v2499_v36 = vsel %vm321_vm0, %v2377_v37, %v2451_v25  ;;  %v2585_v50 = vrot.slane %v7301_v29, 1 }
 0x4df   : > { %3197 = vrot.lane.b32.xlu1 %v7218_v8, %s4732_s8  ;;  %v3568_v47 = vsel %vm1541_vm8, %v3536_v14, %v3088_v41  ;;  %v2588_v46 = vrot.slane %v2499_v36, 1 }
 0x4e0   : > { %v7225_v57 = vpop.permute.xlu0 %2886 }
 0x4e1   : > { %v7227_v45 = vpop.permute.xlu1 %2793 }
 0x4e2   : > { %3199 = vrot.lane.b32.xlu0 %v7221_v35, %s4732_s8 }
 0x4e3   : > { %2902 = vrot.lane.b32.xlu1 %v7218_v8, %s4729_s26 }
 0x4e4   : > { %v3272_v39 = vpop.permute.xlu0 %3271 }
 0x4e5   : > { %v3184_v19 = vpop.permute.xlu1 %3183  ;;  %v3631_v48 = vsel %vm1607_vm10, %v3599_v10, %v3272_v39  ;;  %v3443_v39 = vsel %vm1413_vm4, %v6669_v60, %v6932_v28 }
 0x4e6   : > { %2904 = vrot.lane.b32.xlu0 %v7221_v35, %s4729_s26  ;;  %v3600_v32 = vsel %vm1574_vm9, %v3568_v47, %v3184_v19  ;;  %v3473_v19 = vsel %vm1444_vm5, %v3443_v39, %v7208_v38  ;;  %v8682_v47 = vld [vmem:[#allocation12_spill] sm:$0xff] }
 0x4e7   : > { %3287 = vrot.lane.b32.xlu1 %v2582_v59, %s4733_s13  ;;  %v3505_v53 = vsel %vm1475_vm6, %v3473_v19, %v7225_v57  ;;  %v8685_v19 = vld [vmem:[#allocation10_spill] sm:$0xff] }
 0x4e8   : > { %v7247_v44 = vpop.permute.xlu0 %2988 }
 0x4e9   : > { %v7253_v34 = vpop.permute.xlu1 %2888  ;;  %v3537_v28 = vsel %vm1508_vm7, %v3505_v53, %v7247_v44 }
 0x4ea   : > { %3289 = vrot.lane.b32.xlu0 %v2584_v58, %s4733_s13 }
 0x4eb   : > { %3004 = vrot.lane.b32.xlu1 %v2582_v59, %s4730_s27 }
 0x4ec   : > { %v3362_v18 = vpop.permute.xlu0 %3361 }
 0x4ed   : > { %v3663_v55 = vsel %vm1640_vm11, %v3631_v48, %v3362_v18  ;;  %v3274_v17 = vpop.permute.xlu1 %3273  ;;  %v2750_v18 = vrot.slane %v7301_v29, 2 }
 0x4ee   : > { %2646 = vrot.lane.b32.xlu0 %v2582_v59, %s4727_s24  ;;  %4615 = vmatprep.mubr.msk.f32.mxu1 %vm1685_vm12, %v3663_v55  ;;  %v3632_v1 = vsel %vm1607_vm10, %v3600_v32, %v3274_v17  ;;  %v2586_v59 = vrot.slane %v7304_v5, 1  ;;  %v2751_v55 = vrot.slane %v7304_v5, 2  ;;  %v8681_v17 = vld [vmem:[#allocation8_spill] sm:$0xff]  ;;  %v2240_v32 = vmul.f32 %v6546_v12, %v8682_v47 }
 0x4ef   : > { %3377 = vrot.lane.b32.xlu1 %v2747_v2, %s4734_s16 }
 0x4f0   : > { %v3090_v42 = vpop.permute.xlu0 %3089  ;;  %v2587_v57 = vsel %vm511_vm1, %v2585_v50, %v2586_v59  ;;  %v2589_v44 = vsel %vm511_vm1, %v2586_v59, %v2588_v46  ;;  %v2752_v14 = vsel %vm677_vm2, %v2750_v18, %v2751_v55  ;;  %v2272_v13 = vmax.f32 %v2240_v32, 0.0 }
 0x4f1   : > { %v7273_v9 = vpop.permute.xlu1 %2990 }
 0x4f2   : > { %3105 = vrot.lane.b32.xlu0 %v2747_v2, %s4731_s28  ;;  %v2309_v37 = vrot.slane %v2272_v13, 1  ;;  %v2379_v25 = vrot.slane %v2272_v13, 7  ;;  %v8688_v13 = vld [vmem:[#allocation6_spill] sm:$0xff] }
 0x4f3   : > { %3006 = vrot.lane.b32.xlu1 %v2584_v58, %s4730_s27 }
 0x4f4   : > { %v7284_v62 = vpop.permute.xlu0 %2795 }
 0x4f5   : > { %v3364_v22 = vpop.permute.xlu1 %3363 }
 0x4f6   : > { %2648 = vrot.lane.b32.xlu0 %v2584_v58, %s4727_s24  ;;  %v3664_v26 = vsel %vm1640_vm11, %v3632_v1, %v3364_v22  ;;  %v3569_v58 = vsel %vm1541_vm8, %v3537_v28, %v3090_v42  ;;  %v2753_v1 = vrot.slane %v2499_v36, 2  ;;  %v8683_v22 = vld [vmem:[#allocation15_spill] sm:$0xff]  ;;  %v8684_v36 = vld [vmem:[#allocation14_spill] sm:$0xff]  ;;  %v7385_v28 = vsel %vm321_vm0, %v2309_v37, %v2379_v25  ;;  %v8689_v37 = vld [vmem:[#allocation9_spill] sm:$0xff] }
 0x4f7   : > { %3379 = vrot.lane.b32.xlu1 %v2749_v63, %s4734_s16  ;;  %4616 = vmatmul.mubr.msk.f32.gmra.mrb[8].mxu1 %vm1685_vm12, %v3664_v26  ;;  %v2241_v16 = vmul.f32 %v6546_v12, %v8683_v22  ;;  %v3445_v50 = vsel %vm1413_vm4, %v8685_v19, %v8684_v36  ;;  %v2755_v47 = vrot.slane %v7385_v28, 2 }
 0x4f8   : > { %v3186_v54 = vpop.permute.xlu0 %3185  ;;  %v3475_v53 = vsel %vm1444_vm5, %v3445_v50, %v7284_v62 }
 0x4f9   : > { %v3092_v49 = vpop.permute.xlu1 %3091  ;;  %v3601_v38 = vsel %vm1574_vm9, %v3569_v58, %v3186_v54  ;;  %v2754_v54 = vsel %vm677_vm2, %v2751_v55, %v2753_v1 }
 0x4fa   : > { %3107 = vrot.lane.b32.xlu0 %v2749_v63, %s4731_s28 }
 0x4fb   : > { %2811 = vrot.lane.b32.xlu1 %v2747_v2, %s4728_s25  ;;  %v3444_v2 = vsel %vm1413_vm4, %v8681_v17, %v6941_v21 }
 0x4fc   : > { %v7295_v52 = vpop.permute.xlu0 %2890  ;;  %v3474_v42 = vsel %vm1444_vm5, %v3444_v2, %v7227_v45 }
 0x4fd   : > { %v7297_v41 = vpop.permute.xlu1 %2797  ;;  %v3506_v3 = vsel %vm1475_vm6, %v3474_v42, %v7253_v34  ;;  %v3507_v58 = vsel %vm1475_vm6, %v3475_v53, %v7295_v52  ;;  %v2590_v52 = vrot.slane %v7385_v28, 1  ;;  %v8687_v42 = vld [vmem:[#allocation17_spill] sm:$0xff] }
 0x4fe   : > { %2813 = vrot.lane.b32.xlu0 %v2749_v63, %s4728_s25  ;;  %v3538_v15 = vsel %vm1508_vm7, %v3506_v3, %v7273_v9 }
 0x4ff   : > { %3201 = vrot.lane.b32.xlu1 %v7301_v29, %s4732_s8  ;;  %v3570_v21 = vsel %vm1541_vm8, %v3538_v15, %v3092_v49  ;;  %v2273_v49 = vmax.f32 %v2241_v16, 0.0 }
 0x500   : > { %v3276_v24 = vpop.permute.xlu0 %3275 }
 0x501   : > { %v3188_v33 = vpop.permute.xlu1 %3187  ;;  %v3633_v10 = vsel %vm1607_vm10, %v3601_v38, %v3276_v24  ;;  %v2380_v24 = vrot.slane %v2273_v49, 7 }
 0x502   : > { %3203 = vrot.lane.b32.xlu0 %v7304_v5, %s4732_s8  ;;  %v3602_v45 = vsel %vm1574_vm9, %v3570_v21, %v3188_v33  ;;  %v2452_v33 = vrot.slane %v2273_v49, 5 }
 0x503   : > { %2906 = vrot.lane.b32.xlu1 %v7301_v29, %s4729_s26  ;;  %v7388_v46 = vsel %vm321_vm0, %v2379_v25, %v2380_v24  ;;  %v2243_v25 = vmul.f32 %v6546_v12, %v8689_v37 }
 0x504   : > { %v7322_v60 = vpop.permute.xlu0 %2992  ;;  %v2756_v32 = vrot.slane %v7388_v46, 2 }
 0x505   : > { %v7327_v4 = vpop.permute.xlu1 %2892  ;;  %v2275_v19 = vmax.f32 %v2243_v25, 0.0 }
 0x506   : > { %2908 = vrot.lane.b32.xlu0 %v7304_v5, %s4729_s26 }
 0x507   : > { %3291 = vrot.lane.b32.xlu1 %v2587_v57, %s4733_s13 }
 0x508   : > { %v3366_v0 = vpop.permute.xlu0 %3365 }
 0x509   : > { %v3665_v11 = vsel %vm1640_vm11, %v3633_v10, %v3366_v0  ;;  %v3278_v48 = vpop.permute.xlu1 %3277  ;;  %v2500_v0 = vsel %vm321_vm0, %v2380_v24, %v2452_v33 }
 0x50a   : > { %3293 = vrot.lane.b32.xlu0 %v2589_v44, %s4733_s13  ;;  %4618 = vmatprep.mubr.msk.f32.mxu1 %vm1685_vm12, %v3665_v11  ;;  %v3634_v43 = vsel %vm1607_vm10, %v3602_v45, %v3278_v48  ;;  %v2593_v55 = vrot.slane %v2500_v0, 1  ;;  %v2758_v49 = vrot.slane %v2500_v0, 2 }
 0x50b   : > { %3008 = vrot.lane.b32.xlu1 %v2587_v57, %s4730_s27 }
 0x50c   : > { %v3094_v40 = vpop.permute.xlu0 %3093  ;;  %v2759_v36 = vsel %vm677_vm2, %v2756_v32, %v2758_v49 }
 0x50d   : > { %v7349_v27 = vpop.permute.xlu1 %2994 }
 0x50e   : > { %2650 = vrot.lane.b32.xlu0 %v2587_v57, %s4727_s24  ;;  %v3539_v57 = vsel %vm1508_vm7, %v3507_v58, %v7322_v60 }
 0x50f   : > { %3381 = vrot.lane.b32.xlu1 %v2752_v14, %s4734_s16  ;;  %v3571_v10 = vsel %vm1541_vm8, %v3539_v57, %v3094_v40  ;;  %v8686_v40 = vld [vmem:[#allocation16_spill] sm:$0xff] }
 0x510   : > { %v7357_v6 = vpop.permute.xlu0 %2799  ;;  %v3446_v3 = vsel %vm1413_vm4, %v8687_v42, %v8686_v40 }
 0x511   : > { %v3368_v34 = vpop.permute.xlu1 %3367 }
 0x512   : > { %3109 = vrot.lane.b32.xlu0 %v2752_v14, %s4731_s28  ;;  %v3666_v9 = vsel %vm1640_vm11, %v3634_v43, %v3368_v34 }
 0x513   : > { %3010 = vrot.lane.b32.xlu1 %v2589_v44, %s4730_s27  ;;  %4619 = vmatmul.mubr.msk.f32.gmra.mrb[10].mxu1 %vm1685_vm12, %v3666_v9 }
 0x514   : > { %v3190_v26 = vpop.permute.xlu0 %3189 }
 0x515   : > { %v3096_v63 = vpop.permute.xlu1 %3095  ;;  %v3603_v11 = vsel %vm1574_vm9, %v3571_v10, %v3190_v26 }
 0x516   : > { %2652 = vrot.lane.b32.xlu0 %v2589_v44, %s4727_s24  ;;  %v2591_v44 = vrot.slane %v7388_v46, 1 }
 0x517   : > { %3383 = vrot.lane.b32.xlu1 %v2754_v54, %s4734_s16 }
 0x518   : > { %v7372_v23 = vpop.permute.xlu0 %2894  ;;  %v2592_v2 = vsel %vm511_vm1, %v2590_v52, %v2591_v44  ;;  %v2594_v21 = vsel %vm511_vm1, %v2591_v44, %v2593_v55 }
 0x519   : > { %v7374_v30 = vpop.permute.xlu1 %2801 }
 0x51a   : > { %3111 = vrot.lane.b32.xlu0 %v2754_v54, %s4731_s28 }
 0x51b   : > { %2815 = vrot.lane.b32.xlu1 %v2752_v14, %s4728_s25  ;;  %v3476_v14 = vsel %vm1444_vm5, %v3446_v3, %v7297_v41 }
 0x51c   : > { %v3280_v39 = vpop.permute.xlu0 %3279  ;;  %v3508_v45 = vsel %vm1475_vm6, %v3476_v14, %v7327_v4  ;;  %v8691_v14 = vld [vmem:[#allocation23_spill] sm:$0xff] }
 0x51d   : > { %v3192_v59 = vpop.permute.xlu1 %3191  ;;  %v3635_v48 = vsel %vm1607_vm10, %v3603_v11, %v3280_v39  ;;  %v3540_v34 = vsel %vm1508_vm7, %v3508_v45, %v7349_v27  ;;  %v2757_v27 = vsel %vm677_vm2, %v2755_v47, %v2756_v32  ;;  %v2383_v11 = vrot.slane %v2275_v19, 7 }
 0x51e   : > { %2817 = vrot.lane.b32.xlu0 %v2754_v54, %s4728_s25  ;;  %v3572_v9 = vsel %vm1541_vm8, %v3540_v34, %v3096_v63  ;;  %v2242_v54 = vmul.f32 %v6546_v12, %v8688_v13 }
 0x51f   : > { %3205 = vrot.lane.b32.xlu1 %v7385_v28, %s4732_s8  ;;  %v3604_v1 = vsel %vm1574_vm9, %v3572_v9, %v3192_v59  ;;  %v8690_v59 = vld [vmem:[#allocation13_spill] sm:$0xff] }
 0x520   : > { %v7394_v38 = vpop.permute.xlu0 %2996  ;;  %v2274_v33 = vmax.f32 %v2242_v54, 0.0  ;;  %v3447_v53 = vsel %vm1413_vm4, %v6715_v56, %v8690_v59  ;;  %v2453_v56 = vrot.slane %v2275_v19, 5 }
 0x521   : > { %v7399_v62 = vpop.permute.xlu1 %2896  ;;  %v3477_v0 = vsel %vm1444_vm5, %v3447_v53, %v7357_v6 }
 0x522   : > { %3207 = vrot.lane.b32.xlu0 %v7388_v46, %s4732_s8  ;;  %v2310_v57 = vrot.slane %v2274_v33, 1  ;;  %v2382_v10 = vrot.slane %v2274_v33, 7  ;;  %v3509_v52 = vsel %vm1475_vm6, %v3477_v0, %v7372_v23  ;;  %v2501_v42 = vsel %vm321_vm0, %v2383_v11, %v2453_v56  ;;  %v8692_v33 = vld [vmem:[#allocation2_spill] sm:$0xff] }
 0x523   : > { %2910 = vrot.lane.b32.xlu1 %v7385_v28, %s4729_s26  ;;  %v2598_v47 = vrot.slane %v2501_v42, 1  ;;  %v2763_v19 = vrot.slane %v2501_v42, 2 }
 0x524   : > { %v3370_v60 = vpop.permute.xlu0 %3369  ;;  %v7474_v55 = vsel %vm321_vm0, %v2310_v57, %v2382_v10  ;;  %v7477_v23 = vsel %vm321_vm0, %v2382_v10, %v2383_v11 }
 0x525   : > { %v3667_v18 = vsel %vm1640_vm11, %v3635_v48, %v3370_v60  ;;  %v3282_v17 = vpop.permute.xlu1 %3281  ;;  %v3541_v48 = vsel %vm1508_vm7, %v3509_v52, %v7394_v38  ;;  %v2595_v3 = vrot.slane %v7474_v55, 1  ;;  %v2761_v13 = vrot.slane %v7477_v23, 2 }
 0x526   : > { %2912 = vrot.lane.b32.xlu0 %v7388_v46, %s4729_s26  ;;  %4621 = vmatprep.mubr.msk.f32.mxu1 %vm1685_vm12, %v3667_v18  ;;  %v3636_v4 = vsel %vm1607_vm10, %v3604_v1, %v3282_v17 }
 0x527   : > { %3295 = vrot.lane.b32.xlu1 %v2592_v2, %s4733_s13  ;;  %v2764_v10 = vsel %vm677_vm2, %v2761_v13, %v2763_v19 }
 0x528   : > { %v3098_v15 = vpop.permute.xlu0 %3097 }
 0x529   : > { %v7424_v43 = vpop.permute.xlu1 %2998  ;;  %v3573_v60 = vsel %vm1541_vm8, %v3541_v48, %v3098_v15  ;;  %v2596_v15 = vrot.slane %v7477_v23, 1 }
 0x52a   : > { %3297 = vrot.lane.b32.xlu0 %v2594_v21, %s4733_s13 }
 0x52b   : > { %3012 = vrot.lane.b32.xlu1 %v2592_v2, %s4730_s27 }
 0x52c   : > { %v7433_v41 = vpop.permute.xlu0 %2803 }
 0x52d   : > { %v3372_v22 = vpop.permute.xlu1 %3371 }
 0x52e   : > { %2654 = vrot.lane.b32.xlu0 %v2592_v2, %s4727_s24  ;;  %v3668_v16 = vsel %vm1640_vm11, %v3636_v4, %v3372_v22 }
 0x52f   : > { %3385 = vrot.lane.b32.xlu1 %v2757_v27, %s4734_s16  ;;  %4622 = vmatmul.mubr.msk.f32.gmra.mrb[12].mxu1 %vm1685_vm12, %v3668_v16 }
 0x530   : > { %v3194_v26 = vpop.permute.xlu0 %3193 }
 0x531   : > { %v3100_v63 = vpop.permute.xlu1 %3099  ;;  %v3605_v6 = vsel %vm1574_vm9, %v3573_v60, %v3194_v26 }
 0x532   : > { %3113 = vrot.lane.b32.xlu0 %v2757_v27, %s4731_s28 }
 0x533   : > { %3014 = vrot.lane.b32.xlu1 %v2594_v21, %s4730_s27 }
 0x534   : > { %v7448_v24 = vpop.permute.xlu0 %2898 }
 0x535   : > { %v7450_v39 = vpop.permute.xlu1 %2805 }
 0x536   : > { %2656 = vrot.lane.b32.xlu0 %v2594_v21, %s4727_s24  ;;  %v3448_v21 = vsel %vm1413_vm4, %v6712_v7, %v8691_v14  ;;  %v2597_v7 = vsel %vm511_vm1, %v2595_v3, %v2596_v15 }
 0x537   : > { %3387 = vrot.lane.b32.xlu1 %v2759_v36, %s4734_s16  ;;  %v3478_v34 = vsel %vm1444_vm5, %v3448_v21, %v7374_v30 }
 0x538   : > { %v3284_v50 = vpop.permute.xlu0 %3283  ;;  %v3510_v32 = vsel %vm1475_vm6, %v3478_v34, %v7399_v62  ;;  %v2599_v62 = vsel %vm511_vm1, %v2596_v15, %v2598_v47 }
 0x539   : > { %v3196_v58 = vpop.permute.xlu1 %3195  ;;  %v3637_v17 = vsel %vm1607_vm10, %v3605_v6, %v3284_v50  ;;  %v3542_v1 = vsel %vm1508_vm7, %v3510_v32, %v7424_v43  ;;  %v2760_v43 = vrot.slane %v7474_v55, 2  ;;  %v8693_v50 = vld [vmem:[#allocation7_spill] sm:$0xff]  ;;  %v8694_v6 = vld [vmem:[#allocation18_spill] sm:$0xff] }
 0x53a   : > { %3115 = vrot.lane.b32.xlu0 %v2759_v36, %s4731_s28  ;;  %v3574_v4 = vsel %vm1541_vm8, %v3542_v1, %v3100_v63  ;;  %v2245_v59 = vmul.f32 %v6546_v12, %v8693_v50 }
 0x53b   : > { %2819 = vrot.lane.b32.xlu1 %v2757_v27, %s4728_s25  ;;  %v3606_v30 = vsel %vm1574_vm9, %v3574_v4, %v3196_v58  ;;  %v2762_v49 = vsel %vm677_vm2, %v2760_v43, %v2761_v13 }
 0x53c   : > { %v7464_v44 = vpop.permute.xlu0 %3000  ;;  %v2277_v0 = vmax.f32 %v2245_v59, 0.0 }
 0x53d   : > { %v7469_v18 = vpop.permute.xlu1 %2900 }
 0x53e   : > { %2821 = vrot.lane.b32.xlu0 %v2759_v36, %s4728_s25  ;;  %v2244_v36 = vmul.f32 %v6546_v12, %v8692_v33  ;;  %v2386_v60 = vrot.slane %v2277_v0, 7 }
 0x53f   : > { %3209 = vrot.lane.b32.xlu1 %v7474_v55, %s4732_s8 }
 0x540   : > { %v3374_v38 = vpop.permute.xlu0 %3373  ;;  %v2276_v57 = vmax.f32 %v2244_v36, 0.0 }
 0x541   : > { %v3669_v2 = vsel %vm1640_vm11, %v3637_v17, %v3374_v38  ;;  %v3286_v40 = vpop.permute.xlu1 %3285  ;;  %v3449_v17 = vsel %vm1413_vm4, %v6740_v20, %v8694_v6 }
 0x542   : > { %3211 = vrot.lane.b32.xlu0 %v7477_v23, %s4732_s8  ;;  %4624 = vmatprep.mubr.msk.f32.mxu1 %vm1685_vm12, %v3669_v2  ;;  %v3638_v16 = vsel %vm1607_vm10, %v3606_v30, %v3286_v40  ;;  %v2311_v48 = vrot.slane %v2276_v57, 1  ;;  %v2385_v56 = vrot.slane %v2276_v57, 7  ;;  %v3479_v2 = vsel %vm1444_vm5, %v3449_v17, %v7433_v41  ;;  %v8695_v30 = vld [vmem:[#allocation24_spill] sm:$0xff] }
 0x543   : > { %2914 = vrot.lane.b32.xlu1 %v7474_v55, %s4729_s26  ;;  %v2454_v40 = vrot.slane %v2277_v0, 5  ;;  %v3511_v42 = vsel %vm1475_vm6, %v3479_v2, %v7448_v24 }
 0x544   : > { %v3102_v45 = vpop.permute.xlu0 %3101  ;;  %v3543_v15 = vsel %vm1508_vm7, %v3511_v42, %v7464_v44  ;;  %v7555_v20 = vsel %vm321_vm0, %v2311_v48, %v2385_v56  ;;  %v7558_v21 = vsel %vm321_vm0, %v2385_v56, %v2386_v60 }
 0x545   : > { %v7498_v9 = vpop.permute.xlu1 %3002  ;;  %v3575_v41 = vsel %vm1541_vm8, %v3543_v15, %v3102_v45  ;;  %v2502_v1 = vsel %vm321_vm0, %v2386_v60, %v2454_v40  ;;  %v2600_v45 = vrot.slane %v7555_v20, 1  ;;  %v2601_v4 = vrot.slane %v7558_v21, 1  ;;  %v8697_v60 = vld [vmem:[#allocation3_spill] sm:$0xff] }
 0x546   : > { %2916 = vrot.lane.b32.xlu0 %v7477_v23, %s4729_s26  ;;  %v2766_v59 = vrot.slane %v7558_v21, 2  ;;  %v2768_v56 = vrot.slane %v2502_v1, 2  ;;  %v2247_v6 = vmul.f32 %v6546_v12, %v8697_v60 }
 0x547   : > { %3299 = vrot.lane.b32.xlu1 %v2597_v7, %s4733_s13 }
 0x548   : > { %v7507_v22 = vpop.permute.xlu0 %2644  ;;  %v2769_v42 = vsel %vm677_vm2, %v2766_v59, %v2768_v56  ;;  %v2279_v15 = vmax.f32 %v2247_v6, 0.0 }
 0x549   : > { %v3376_v27 = vpop.permute.xlu1 %3375 }
 0x54a   : > { %3301 = vrot.lane.b32.xlu0 %v2599_v62, %s4733_s13  ;;  %v3670_v26 = vsel %vm1640_vm11, %v3638_v16, %v3376_v27 }
 0x54b   : > { %3016 = vrot.lane.b32.xlu1 %v2597_v7, %s4730_s27  ;;  %4625 = vmatmul.mubr.msk.f32.gmra.mrb[14].mxu1 %vm1685_vm12, %v3670_v26  ;;  %v2603_v26 = vrot.slane %v2502_v1, 1 }
 0x54c   : > { %v3104_v63 = vpop.permute.xlu0 %3103 }
 0x54d   : > { %v7518_v54 = vpop.permute.xlu1 %2807 }
 0x54e   : > { %2658 = vrot.lane.b32.xlu0 %v2597_v7, %s4727_s24 }
 0x54f   : > { %3389 = vrot.lane.b32.xlu1 %v2762_v49, %s4734_s16 }
 0x550   : > { %v7523_v37 = vpop.permute.xlu0 %2809 }
 0x551   : > { %v3198_v25 = vpop.permute.xlu1 %3197 }
 0x552   : > { %3117 = vrot.lane.b32.xlu0 %v2762_v49, %s4731_s28  ;;  %v3607_v47 = vsel %vm1574_vm9, %v3575_v41, %v3198_v25 }
 0x553   : > { %3018 = vrot.lane.b32.xlu1 %v2599_v62, %s4730_s27 }
 0x554   : > { %v3200_v53 = vpop.permute.xlu0 %3199 }
 0x555   : > { %v7531_v58 = vpop.permute.xlu1 %2902 }
 0x556   : > { %2660 = vrot.lane.b32.xlu0 %v2599_v62, %s4727_s24  ;;  %v3450_v62 = vsel %vm1413_vm4, %v6737_v31, %v8695_v30 }
 0x557   : > { %3391 = vrot.lane.b32.xlu1 %v2764_v10, %s4734_s16  ;;  %v3480_v27 = vsel %vm1444_vm5, %v3450_v62, %v7450_v39 }
 0x558   : > { %v7536_v11 = vpop.permute.xlu0 %2904  ;;  %v3512_v43 = vsel %vm1475_vm6, %v3480_v27, %v7469_v18  ;;  %v2604_v18 = vsel %vm511_vm1, %v2601_v4, %v2603_v26  ;;  %v2455_v27 = vrot.slane %v2279_v15, 5 }
 0x559   : > { %v3288_v52 = vpop.permute.xlu1 %3287  ;;  %v3544_v31 = vsel %vm1508_vm7, %v3512_v43, %v7498_v9  ;;  %v2765_v9 = vrot.slane %v7555_v20, 2 }
 0x55a   : > { %3119 = vrot.lane.b32.xlu0 %v2764_v10, %s4731_s28  ;;  %v3639_v44 = vsel %vm1607_vm10, %v3607_v47, %v3288_v52  ;;  %v3576_v25 = vsel %vm1541_vm8, %v3544_v31, %v3104_v63  ;;  %v8696_v52 = vld [vmem:[#allocation11_spill] sm:$0xff] }
 0x55b   : > { %2823 = vrot.lane.b32.xlu1 %v2762_v49, %s4728_s25  ;;  %v2602_v49 = vsel %vm511_vm1, %v2600_v45, %v2601_v4  ;;  %v3608_v39 = vsel %vm1574_vm9, %v3576_v25, %v3200_v53  ;;  %v2767_v53 = vsel %vm677_vm2, %v2765_v9, %v2766_v59  ;;  %v2246_v48 = vmul.f32 %v6546_v12, %v8696_v52  ;;  %v8698_v45 = vld [vmem:[#allocation32_spill] sm:$0xff] }
 0x55c   : > { %v3290_v38 = vpop.permute.xlu0 %3289  ;;  %v3451_v4 = vsel %vm1413_vm4, %v6764_v51, %v8698_v45 }
 0x55d   : > { %v7547_v3 = vpop.permute.xlu1 %3004  ;;  %v3640_v36 = vsel %vm1607_vm10, %v3608_v39, %v3290_v38  ;;  %v2278_v2 = vmax.f32 %v2246_v48, 0.0  ;;  %v3481_v62 = vsel %vm1444_vm5, %v3451_v4, %v7518_v54 }
 0x55e   : > { %2825 = vrot.lane.b32.xlu0 %v2764_v10, %s4728_s25  ;;  %v7552_v14 = vpop.f32.mrb[0].mxu1  ;;  %v3513_v26 = vsel %vm1475_vm6, %v3481_v62, %v7531_v58 }
 0x55f   : > { %3213 = vrot.lane.b32.xlu1 %v7555_v20, %s4732_s8  ;;  %v7563_v24 = vpop.f32.mrb[1].mxu1  ;;  %v2388_v1 = vrot.slane %v2278_v2, 7  ;;  %v3545_v31 = vsel %vm1508_vm7, %v3513_v26, %v7547_v3 }
 0x560   : > { %v7565_v34 = vpop.permute.xlu0 %2646 }
 0x561   : > { %v3378_v32 = vpop.permute.xlu1 %3377 }
 0x562   : > { %3215 = vrot.lane.b32.xlu0 %v7558_v21, %s4732_s8  ;;  %v3671_v7 = vsel %vm1640_vm11, %v3639_v44, %v3378_v32  ;;  %v2312_v32 = vrot.slane %v2278_v2, 1 }
 0x563   : > { %2918 = vrot.lane.b32.xlu1 %v7555_v20, %s4729_s26  ;;  %4627 = vmatprep.mubr.msk.f32.mxu1 %vm1685_vm12, %v3671_v7  ;;  %v2389_v7 = vrot.slane %v2279_v15, 7 }
 0x564   : > { %v3106_v16 = vpop.permute.xlu0 %3105 }
 0x565   : > { %v7585_v13 = vpop.permute.xlu1 %3006  ;;  %v7647_v51 = vsel %vm321_vm0, %v2388_v1, %v2389_v7  ;;  %v3577_v25 = vsel %vm1541_vm8, %v3545_v31, %v3106_v16  ;;  %v2503_v3 = vsel %vm321_vm0, %v2389_v7, %v2455_v27 }
 0x566   : > { %2920 = vrot.lane.b32.xlu0 %v7558_v21, %s4729_s26  ;;  %v2606_v16 = vrot.slane %v7647_v51, 1  ;;  %v2773_v4 = vrot.slane %v2503_v3, 2 }
 0x567   : > { %3303 = vrot.lane.b32.xlu1 %v2602_v49, %s4733_s13 }
 0x568   : > { %v7594_v33 = vpop.permute.xlu0 %2648 }
 0x569   : > { %v3380_v19 = vpop.permute.xlu1 %3379 }
 0x56a   : > { %3305 = vrot.lane.b32.xlu0 %v2604_v18, %s4733_s13  ;;  %v3672_v50 = vsel %vm1640_vm11, %v3640_v36, %v3380_v19 }
 0x56b   : > { %3020 = vrot.lane.b32.xlu1 %v2602_v49, %s4730_s27  ;;  %4628 = vmatmul.mubr.msk.f32.gmra.mrb[16].mxu1 %vm1685_vm12, %v3672_v50  ;;  %v3452_v50 = vsel %vm1413_vm4, %v6724_v61, %v7507_v22 }
 0x56c   : > { %v3108_v63 = vpop.permute.xlu0 %3107  ;;  %v3482_v59 = vsel %vm1444_vm5, %v3452_v50, %v7523_v37 }
 0x56d   : > { %v7605_v57 = vpop.permute.xlu1 %2811 }
 0x56e   : > { %2662 = vrot.lane.b32.xlu0 %v2602_v49, %s4727_s24  ;;  %v7644_v49 = vsel %vm321_vm0, %v2312_v32, %v2388_v1  ;;  %v8699_v1 = vld [vmem:[#allocation5_spill] sm:$0xff] }
 0x56f   : > { %3393 = vrot.lane.b32.xlu1 %v2767_v53, %s4734_s16  ;;  %v2605_v19 = vrot.slane %v7644_v49, 1  ;;  %v2248_v7 = vmul.f32 %v6546_v12, %v8699_v1 }
 0x570   : > { %v7610_v10 = vpop.permute.xlu0 %2813 }
 0x571   : > { %v3202_v0 = vpop.permute.xlu1 %3201  ;;  %v2607_v22 = vsel %vm511_vm1, %v2605_v19, %v2606_v16 }
 0x572   : > { %3121 = vrot.lane.b32.xlu0 %v2767_v53, %s4731_s28  ;;  %v3609_v58 = vsel %vm1574_vm9, %v3577_v25, %v3202_v0  ;;  %v3514_v0 = vsel %vm1475_vm6, %v3482_v59, %v7536_v11  ;;  %v2280_v25 = vmax.f32 %v2248_v7, 0.0 }
 0x573   : > { %3022 = vrot.lane.b32.xlu1 %v2604_v18, %s4730_s27  ;;  %v3546_v61 = vsel %vm1508_vm7, %v3514_v0, %v7585_v13  ;;  %v2770_v13 = vrot.slane %v7644_v49, 2 }
 0x574   : > { %v3204_v17 = vpop.permute.xlu0 %3203  ;;  %v3578_v48 = vsel %vm1541_vm8, %v3546_v61, %v3108_v63 }
 0x575   : > { %v7618_v38 = vpop.permute.xlu1 %2906  ;;  %v3610_v37 = vsel %vm1574_vm9, %v3578_v48, %v3204_v17 }
 0x576   : > { %2664 = vrot.lane.b32.xlu0 %v2604_v18, %s4727_s24  ;;  %v7621_v40 = vpop.f32.mrb[2].mxu1 }
 0x577   : > { %3395 = vrot.lane.b32.xlu1 %v2769_v42, %s4734_s16  ;;  %v7625_v41 = vpop.f32.mrb[3].mxu1 }
 0x578   : > { %v7627_v47 = vpop.permute.xlu0 %2908 }
 0x579   : > { %v3292_v44 = vpop.permute.xlu1 %3291 }
 0x57a   : > { %3123 = vrot.lane.b32.xlu0 %v2769_v42, %s4731_s28  ;;  %v3641_v39 = vsel %vm1607_vm10, %v3609_v58, %v3292_v44 }
 0x57b   : > { %2827 = vrot.lane.b32.xlu1 %v2767_v53, %s4728_s25  ;;  %v2608_v53 = vrot.slane %v2503_v3, 1 }
 0x57c   : > { %v3294_v30 = vpop.permute.xlu0 %3293 }
 0x57d   : > { %v7638_v43 = vpop.permute.xlu1 %3008  ;;  %v2609_v11 = vsel %vm511_vm1, %v2606_v16, %v2608_v53  ;;  %v3642_v60 = vsel %vm1607_vm10, %v3610_v37, %v3294_v30  ;;  %v8700_v30 = vld [vmem:[#allocation4_spill] sm:$0xff]  ;;  %v3453_v16 = vsel %vm1413_vm4, %v7218_v8, %v7565_v34 }
 0x57e   : > { %2829 = vrot.lane.b32.xlu0 %v2769_v42, %s4728_s25  ;;  %v2771_v42 = vrot.slane %v7647_v51, 2  ;;  %v2249_v62 = vmul.f32 %v6546_v12, %v8700_v30  ;;  %v2313_v12 = vrot.slane %v2280_v25, 1  ;;  %v3483_v59 = vsel %vm1444_vm5, %v3453_v16, %v7605_v57 }
 0x57f   : > { %3217 = vrot.lane.b32.xlu1 %v7644_v49, %s4732_s8  ;;  %v3515_v0 = vsel %vm1475_vm6, %v3483_v59, %v7618_v38 }
 0x580   : > { %v7652_v54 = vpop.permute.xlu0 %2650  ;;  %v2772_v17 = vsel %vm677_vm2, %v2770_v13, %v2771_v42  ;;  %v2774_v58 = vsel %vm677_vm2, %v2771_v42, %v2773_v4 }
 0x581   : > { %v3382_v18 = vpop.permute.xlu1 %3381 }
 0x582   : > { %3219 = vrot.lane.b32.xlu0 %v7647_v51, %s4732_s8  ;;  %v3673_v36 = vsel %vm1640_vm11, %v3641_v39, %v3382_v18  ;;  %v2281_v39 = vmax.f32 %v2249_v62, 0.0 }
 0x583   : > { %2922 = vrot.lane.b32.xlu1 %v7644_v49, %s4729_s26  ;;  %4630 = vmatprep.mubr.msk.f32.mxu1 %vm1685_vm12, %v3673_v36  ;;  %v2391_v36 = vrot.slane %v2280_v25, 7 }
 0x584   : > { %v3110_v9 = vpop.permute.xlu0 %3109  ;;  %v2392_v19 = vrot.slane %v2281_v39, 7  ;;  %v2456_v53 = vrot.slane %v2281_v39, 5 }
 0x585   : > { %v7672_v52 = vpop.permute.xlu1 %3010  ;;  %v2488_v48 = vsel %vm321_vm0, %v2313_v12, %v2391_v36 }
 0x586   : > { %2924 = vrot.lane.b32.xlu0 %v7647_v51, %s4729_s26  ;;  %v2393_v8 = vsel %vm321_vm0, %v2391_v36, %v2392_v19  ;;  %v3064_v25 = vrot.slane %v2488_v48, 2 }
 0x587   : > { %3307 = vrot.lane.b32.xlu1 %v2607_v22, %s4733_s13 }
 0x588   : > { %v7681_v56 = vpop.permute.xlu0 %2652 }
 0x589   : > { %v3384_v6 = vpop.permute.xlu1 %3383 }
 0x58a   : > { %3309 = vrot.lane.b32.xlu0 %v2609_v11, %s4733_s13  ;;  %v3674_v2 = vsel %vm1640_vm11, %v3642_v60, %v3384_v6  ;;  %v2504_v60 = vsel %vm321_vm0, %v2392_v19, %v2456_v53 }
 0x58b   : > { %3024 = vrot.lane.b32.xlu1 %v2607_v22, %s4730_s27  ;;  %4631 = vmatmul.mubr.msk.f32.gmra.mrb[18].mxu1 %vm1685_vm12, %v3674_v2  ;;  %v2964_v2 = vrot.slane %v2393_v8, 1  ;;  %v3067_v39 = vrot.slane %v2504_v60, 2 }
 0x58c   : > { %v3112_v63 = vpop.permute.xlu0 %3111 }
 0x58d   : > { %v7692_v15 = vpop.permute.xlu1 %2815 }
 0x58e   : > { %2666 = vrot.lane.b32.xlu0 %v2607_v22, %s4727_s24  ;;  %v3547_v22 = vsel %vm1508_vm7, %v3515_v0, %v7638_v43  ;;  %v2963_v43 = vrot.slane %v2488_v48, 1 }
 0x58f   : > { %3397 = vrot.lane.b32.xlu1 %v2772_v17, %s4734_s16  ;;  %v3579_v34 = vsel %vm1541_vm8, %v3547_v22, %v3110_v9  ;;  %v3454_v9 = vsel %vm1413_vm4, %v7221_v35, %v7594_v33 }
 0x590   : > { %v7697_v44 = vpop.permute.xlu0 %2817  ;;  %v3484_v42 = vsel %vm1444_vm5, %v3454_v9, %v7610_v10  ;;  %v2965_v35 = vsel %vm511_vm1, %v2963_v43, %v2964_v2 }
 0x591   : > { %v3206_v32 = vpop.permute.xlu1 %3205 }
 0x592   : > { %3125 = vrot.lane.b32.xlu0 %v2772_v17, %s4731_s28  ;;  %v7702_v45 = vpop.f32.mrb[4].mxu1  ;;  %v3611_v37 = vsel %vm1574_vm9, %v3579_v34, %v3206_v32  ;;  %v3516_v32 = vsel %vm1475_vm6, %v3484_v42, %v7627_v47 }
 0x593   : > { %3026 = vrot.lane.b32.xlu1 %v2609_v11, %s4730_s27  ;;  %v7707_v27 = vpop.f32.mrb[5].mxu1  ;;  %v3548_v7 = vsel %vm1508_vm7, %v3516_v32, %v7672_v52 }
 0x594   : > { %v3208_v26 = vpop.permute.xlu0 %3207  ;;  %v3580_v33 = vsel %vm1541_vm8, %v3548_v7, %v3112_v63 }
 0x595   : > { %v7709_v31 = vpop.permute.xlu1 %2910  ;;  %v3612_v10 = vsel %vm1574_vm9, %v3580_v33, %v3208_v26 }
 0x596   : > { %2668 = vrot.lane.b32.xlu0 %v2609_v11, %s4727_s24 }
 0x597   : > { %3399 = vrot.lane.b32.xlu1 %v2774_v58, %s4734_s16 }
 0x598   : > { %v7714_v18 = vpop.permute.xlu0 %2912 }
 0x599   : > { %v3296_v3 = vpop.permute.xlu1 %3295 }
 0x59a   : > { %3127 = vrot.lane.b32.xlu0 %v2774_v58, %s4731_s28  ;;  %v3643_v38 = vsel %vm1607_vm10, %v3611_v37, %v3296_v3 }
 0x59b   : > { %2831 = vrot.lane.b32.xlu1 %v2772_v17, %s4728_s25  ;;  %v2966_v17 = vrot.slane %v2504_v60, 1 }
 0x59c   : > { %v3298_v50 = vpop.permute.xlu0 %3297 }
 0x59d   : > { %v7725_v61 = vpop.permute.xlu1 %3012  ;;  %v2967_v30 = vsel %vm511_vm1, %v2964_v2, %v2966_v17  ;;  %v3644_v47 = vsel %vm1607_vm10, %v3612_v10, %v3298_v50 }
 0x59e   : > { %2833 = vrot.lane.b32.xlu0 %v2774_v58, %s4728_s25  ;;  %v3065_v58 = vrot.slane %v2393_v8, 2 }
 0x59f   : > { %3221 = vrot.lane.b32.xlu1 %v2488_v48, %s4732_s8 }
 0x5a0   : > { %v7734_v57 = vpop.permute.xlu0 %2654  ;;  %v3066_v12 = vsel %vm677_vm2, %v3064_v25, %v3065_v58  ;;  %v3068_v16 = vsel %vm677_vm2, %v3065_v58, %v3067_v39 }
 0x5a1   : > { %v3386_v11 = vpop.permute.xlu1 %3385  ;;  %v3457_v58 = vsel %vm1413_vm4, %v7385_v28, %v7734_v57 }
 0x5a2   : > { %3223 = vrot.lane.b32.xlu0 %v2393_v8, %s4732_s8  ;;  %v3675_v6 = vsel %vm1640_vm11, %v3643_v38, %v3386_v11 }
 0x5a3   : > { %2926 = vrot.lane.b32.xlu1 %v2488_v48, %s4729_s26  ;;  %4633 = vmatprep.mubr.msk.f32.mxu1 %vm1685_vm12, %v3675_v6  ;;  %v3455_v48 = vsel %vm1413_vm4, %v7301_v29, %v7652_v54 }
 0x5a4   : > { %v3114_v13 = vpop.permute.xlu0 %3113  ;;  %v3485_v34 = vsel %vm1444_vm5, %v3455_v48, %v7692_v15  ;;  %v3456_v15 = vsel %vm1413_vm4, %v7304_v5, %v7681_v56 }
 0x5a5   : > { %v3015_v1 = vpop.permute.xlu1 %3014  ;;  %v3517_v37 = vsel %vm1475_vm6, %v3485_v34, %v7709_v31 }
 0x5a6   : > { %2928 = vrot.lane.b32.xlu0 %v2393_v8, %s4729_s26  ;;  %v3549_v11 = vsel %vm1508_vm7, %v3517_v37, %v7725_v61  ;;  %v3486_v61 = vsel %vm1444_vm5, %v3456_v15, %v7697_v44 }
 0x5a7   : > { %3311 = vrot.lane.b32.xlu1 %v2965_v35, %s4733_s13  ;;  %v3581_v60 = vsel %vm1541_vm8, %v3549_v11, %v3114_v13  ;;  %v3518_v9 = vsel %vm1475_vm6, %v3486_v61, %v7714_v18 }
 0x5a8   : > { %v7756_v4 = vpop.permute.xlu0 %2656  ;;  %v3550_v42 = vsel %vm1508_vm7, %v3518_v9, %v3015_v1 }
 0x5a9   : > { %v3388_v62 = vpop.permute.xlu1 %3387  ;;  %v3458_v28 = vsel %vm1413_vm4, %v7388_v46, %v7756_v4 }
 0x5aa   : > { %3313 = vrot.lane.b32.xlu0 %v2967_v30, %s4733_s13  ;;  %v3676_v52 = vsel %vm1640_vm11, %v3644_v47, %v3388_v62 }
 0x5ab   : > { %3028 = vrot.lane.b32.xlu1 %v2965_v35, %s4730_s27  ;;  %4634 = vmatmul.mubr.msk.f32.gmra.mrb[20].mxu1 %vm1685_vm12, %v3676_v52 }
 0x5ac   : > { %v3116_v63 = vpop.permute.xlu0 %3115 }
 0x5ad   : > { %v2820_v3 = vpop.permute.xlu1 %2819  ;;  %v3582_v17 = vsel %vm1541_vm8, %v3550_v42, %v3116_v63 }
 0x5ae   : > { %3030 = vrot.lane.b32.xlu0 %v2967_v30, %s4730_s27  ;;  %v7766_v26 = vpop.f32.mrb[6].mxu1  ;;  %v3487_v39 = vsel %vm1444_vm5, %v3457_v58, %v2820_v3 }
 0x5af   : > { %3401 = vrot.lane.b32.xlu1 %v3066_v12, %s4734_s16  ;;  %v7770_v36 = vpop.f32.mrb[7].mxu1 }
 0x5b0   : > { %v2822_v19 = vpop.permute.xlu0 %2821 }
 0x5b1   : > { %v3210_v50 = vpop.permute.xlu1 %3209  ;;  %v3488_v3 = vsel %vm1444_vm5, %v3458_v28, %v2822_v19 }
 0x5b2   : > { %3403 = vrot.lane.b32.xlu0 %v3068_v16, %s4734_s16  ;;  %v3613_v6 = vsel %vm1574_vm9, %v3581_v60, %v3210_v50 }
 0x5b3   : > { %3129 = vrot.lane.b32.xlu1 %v3066_v12, %s4731_s28 }
 0x5b4   : > { %v3212_v59 = vpop.permute.xlu0 %3211 }
 0x5b5   : > { %v2915_v53 = vpop.permute.xlu1 %2914  ;;  %v3614_v7 = vsel %vm1574_vm9, %v3582_v17, %v3212_v59 }
 0x5b6   : > { %v3519_v12 = vsel %vm1475_vm6, %v3487_v39, %v2915_v53 }
 0x5b7   : > { %3131 = vrot.lane.b32.xlu1 %v3068_v16, %s4731_s28  ;;  %s8368_s28 = scalar_lea.vmem %s8498_s5, %s4459_s20 }
 0x5b8   : > { %v2917_v0 = vpop.permute.xlu0 %2916 }
 0x5b9   : > { %v3300_v22 = vpop.permute.xlu1 %3299  ;;  %v3520_v53 = vsel %vm1475_vm6, %v3488_v3, %v2917_v0 }
 0x5ba   : > { %v3645_v2 = vsel %vm1607_vm10, %v3613_v6, %v3300_v22 }
 0x5bc   : > { %v3302_v8 = vpop.permute.xlu0 %3301 }
 0x5bd   : > { %v3017_v38 = vpop.permute.xlu1 %3016  ;;  %v3646_v5 = vsel %vm1607_vm10, %v3614_v7, %v3302_v8 }
 0x5be   : > { %v3551_v50 = vsel %vm1508_vm7, %v3519_v12, %v3017_v38 }
 0x5c0   : > { %v7786_v43 = vpop.permute.xlu0 %2658 }
 0x5c1   : > { %v3390_v29 = vpop.permute.xlu1 %3389  ;;  %v3459_v7 = vsel %vm1413_vm4, %v7474_v55, %v7786_v43 }
 0x5c2   : > { %v3677_v54 = vsel %vm1640_vm11, %v3645_v2, %v3390_v29 }
 0x5c3   : > { %4636 = vmatprep.mubr.msk.f32.mxu1 %vm1685_vm12, %v3677_v54 }
 0x5c4   : > { %v3118_v31 = vpop.permute.xlu0 %3117 }
 0x5c5   : > { %v3019_v13 = vpop.permute.xlu1 %3018  ;;  %v3583_v59 = vsel %vm1541_vm8, %v3551_v50, %v3118_v31 }
 0x5c6   : > { %v3552_v11 = vsel %vm1508_vm7, %v3520_v53, %v3019_v13 }
 0x5c8   : > { %v7801_v32 = vpop.permute.xlu0 %2660 }
 0x5c9   : > { %v3392_v56 = vpop.permute.xlu1 %3391 }
 0x5ca   : > { %v3678_v35 = vsel %vm1640_vm11, %v3646_v5, %v3392_v56  ;;  %v7806_v33 = vpop.f32.mrb[8].mxu1 }
 0x5cb   : > { %v7808_v44 = vpop.f32.mrb[9].mxu1  ;;  %4637 = vmatmul.mubr.msk.f32.gmra.mrb[22].mxu1 %vm1685_vm12, %v3678_v35 }
 0x5cc   : > { %v3120_v18 = vpop.permute.xlu0 %3119 }
 0x5cd   : > { %v2824_v10 = vpop.permute.xlu1 %2823  ;;  %v3584_v6 = vsel %vm1541_vm8, %v3552_v11, %v3120_v18 }
 0x5ce   : > { %v3489_v56 = vsel %vm1444_vm5, %v3459_v7, %v2824_v10  ;;  %v3460_v10 = vsel %vm1413_vm4, %v7477_v23, %v7801_v32 }
 0x5d0   : > { %v2826_v1 = vpop.permute.xlu0 %2825 }
 0x5d1   : > { %v3214_v30 = vpop.permute.xlu1 %3213 }
 0x5d2   : > { %v3615_v48 = vsel %vm1574_vm9, %v3583_v59, %v3214_v30 }
 0x5d4   : > { %v3216_v47 = vpop.permute.xlu0 %3215 }
 0x5d5   : > { %v2919_v62 = vpop.permute.xlu1 %2918  ;;  %v3616_v54 = vsel %vm1574_vm9, %v3584_v6, %v3216_v47 }
 0x5d6   : > { %v3521_v35 = vsel %vm1475_vm6, %v3489_v56, %v2919_v62 }
 0x5d8   : > { %v2921_v25 = vpop.permute.xlu0 %2920 }
 0x5d9   : > { %v3304_v52 = vpop.permute.xlu1 %3303 }
 0x5da   : > { %v3647_v8 = vsel %vm1607_vm10, %v3615_v48, %v3304_v52 }
 0x5dc   : > { %v3306_v63 = vpop.permute.xlu0 %3305 }
 0x5dd   : > { %v3021_v16 = vpop.permute.xlu1 %3020  ;;  %v3648_v46 = vsel %vm1607_vm10, %v3616_v54, %v3306_v63 }
 0x5de   : > { %v3553_v30 = vsel %vm1508_vm7, %v3521_v35, %v3021_v16  ;;  %v3490_v16 = vsel %vm1444_vm5, %v3460_v10, %v2826_v1 }
 0x5df   : > { %v3522_v50 = vsel %vm1475_vm6, %v3490_v16, %v2921_v25 }
 0x5e0   : > { %v7818_v22 = vpop.permute.xlu0 %2662 }
 0x5e1   : > { %v3394_v34 = vpop.permute.xlu1 %3393  ;;  %v3461_v54 = vsel %vm1413_vm4, %v7555_v20, %v7818_v22 }
 0x5e2   : > { %v3679_v37 = vsel %vm1640_vm11, %v3647_v8, %v3394_v34 }
 0x5e3   : > { %4639 = vmatprep.mubr.msk.f32.mxu1 %vm1685_vm12, %v3679_v37 }
 0x5e4   : > { %v3122_v57 = vpop.permute.xlu0 %3121 }
 0x5e5   : > { %v3023_v38 = vpop.permute.xlu1 %3022  ;;  %v3585_v47 = vsel %vm1541_vm8, %v3553_v30, %v3122_v57 }
 0x5e6   : > { %v7830_v60 = vpop.f32.mrb[10].mxu1  ;;  %v3554_v48 = vsel %vm1508_vm7, %v3522_v50, %v3023_v38 }
 0x5e7   : > { %v7833_v2 = vpop.f32.mrb[11].mxu1 }
 0x5e8   : > { %v2665_v29 = vpop.permute.xlu0 %2664 }
 0x5e9   : > { %v3396_v4 = vpop.permute.xlu1 %3395 }
 0x5ea   : > { %v3680_v15 = vsel %vm1640_vm11, %v3648_v46, %v3396_v4 }
 0x5eb   : > { %4640 = vmatmul.mubr.msk.f32.gmra.mrb[24].mxu1 %vm1685_vm12, %v3680_v15  ;;  %v3462_v15 = vsel %vm1413_vm4, %v7558_v21, %v2665_v29 }
 0x5ec   : > { %v3124_v19 = vpop.permute.xlu0 %3123 }
 0x5ed   : > { %v2828_v0 = vpop.permute.xlu1 %2827  ;;  %v3586_v8 = vsel %vm1541_vm8, %v3554_v48, %v3124_v19 }
 0x5ee   : > { %v3491_v4 = vsel %vm1444_vm5, %v3461_v54, %v2828_v0  ;;  %v7937_v54 = vld [vmem:[%s8497_s4] ss:$0 sm:$0xff] }
 0x5f0   : > { %v2830_v31 = vpop.permute.xlu0 %2829 }
 0x5f1   : > { %v7839_v61 = vpop.permute.xlu1 %3217  ;;  %v3492_v56 = vsel %vm1444_vm5, %v3462_v15, %v2830_v31 }
 0x5f2   : > { %v3617_v58 = vsel %vm1574_vm9, %v3585_v47, %v7839_v61 }
 0x5f4   : > { %v7841_v9 = vpop.permute.xlu0 %3219 }
 0x5f5   : > { %v2923_v13 = vpop.permute.xlu1 %2922  ;;  %v3618_v37 = vsel %vm1574_vm9, %v3586_v8, %v7841_v9 }
 0x5f6   : > { %v3523_v19 = vsel %vm1475_vm6, %v3491_v4, %v2923_v13 }
 0x5f8   : > { %v2925_v42 = vpop.permute.xlu0 %2924 }
 0x5f9   : > { %v7843_v17 = vpop.permute.xlu1 %3307  ;;  %v3524_v47 = vsel %vm1475_vm6, %v3492_v56, %v2925_v42 }
 0x5fa   : > { %v3649_v63 = vsel %vm1607_vm10, %v3617_v58, %v7843_v17 }
 0x5fc   : > { %v7848_v5 = vpop.permute.xlu0 %3309 }
 0x5fd   : > { %v3025_v18 = vpop.permute.xlu1 %3024  ;;  %v3650_v23 = vsel %vm1607_vm10, %v3618_v37, %v7848_v5 }
 0x5fe   : > { %v3555_v35 = vsel %vm1508_vm7, %v3523_v19, %v3025_v18 }
 0x600   : > { %v2667_v52 = vpop.permute.xlu0 %2666 }
 0x601   : > { %v7858_v39 = vpop.permute.xlu1 %3397  ;;  %v3463_v18 = vsel %vm1413_vm4, %v7644_v49, %v2667_v52 }
 0x602   : > { %v3681_v55 = vsel %vm1640_vm11, %v3649_v63, %v7858_v39  ;;  %v7862_v43 = vpop.f32.mrb[12].mxu1 }
 0x603   : > { %v7867_v62 = vpop.f32.mrb[13].mxu1  ;;  %4642 = vmatprep.mubr.msk.f32.mxu1 %vm1685_vm12, %v3681_v55 }
 0x604   : > { %v3126_v12 = vpop.permute.xlu0 %3125 }
 0x605   : > { %v3027_v59 = vpop.permute.xlu1 %3026  ;;  %v3587_v58 = vsel %vm1541_vm8, %v3555_v35, %v3126_v12 }
 0x606   : > { %v3556_v0 = vsel %vm1508_vm7, %v3524_v47, %v3027_v59 }
 0x608   : > { %v2669_v34 = vpop.permute.xlu0 %2668 }
 0x609   : > { %v3400_v32 = vpop.permute.xlu1 %3399  ;;  %v3464_v49 = vsel %vm1413_vm4, %v7647_v51, %v2669_v34 }
 0x60a   : > { %v3682_v28 = vsel %vm1640_vm11, %v3650_v23, %v3400_v32 }
 0x60b   : > { %4643 = vmatmul.mubr.msk.f32.gmra.mrb[26].mxu1 %vm1685_vm12, %v3682_v28 }
 0x60c   : > { %v3128_v1 = vpop.permute.xlu0 %3127 }
 0x60d   : > { %v2832_v57 = vpop.permute.xlu1 %2831  ;;  %v3588_v29 = vsel %vm1541_vm8, %v3556_v0, %v3128_v1 }
 0x60e   : > { %v3493_v55 = vsel %vm1444_vm5, %v3463_v18, %v2832_v57 }
 0x610   : > { %v2834_v25 = vpop.permute.xlu0 %2833 }
 0x611   : > { %v3222_v3 = vpop.permute.xlu1 %3221  ;;  %v3494_v8 = vsel %vm1444_vm5, %v3464_v49, %v2834_v25  ;;  %v8019_v49 = vadd.f32 %v7862_v43, %v7937_v54 }
 0x612   : > { %v3619_v21 = vsel %vm1574_vm9, %v3587_v58, %v3222_v3 }
 0x614   : > { %v3224_v53 = vpop.permute.xlu0 %3223 }
 0x615   : > { %v2927_v38 = vpop.permute.xlu1 %2926  ;;  %v3620_v63 = vsel %vm1574_vm9, %v3588_v29, %v3224_v53 }
 0x616   : > { %v3525_v16 = vsel %vm1475_vm6, %v3493_v55, %v2927_v38 }
 0x618   : > { %v2929_v11 = vpop.permute.xlu0 %2928 }
 0x619   : > { %v3312_v6 = vpop.permute.xlu1 %3311  ;;  %v3526_v23 = vsel %vm1475_vm6, %v3494_v8, %v2929_v11 }
 0x61a   : > { %v3651_v13 = vsel %vm1607_vm10, %v3619_v21, %v3312_v6 }
 0x61c   : > { %v3314_v46 = vpop.permute.xlu0 %3313 }
 0x61d   : > { %v3029_v7 = vpop.permute.xlu1 %3028  ;;  %v3652_v10 = vsel %vm1607_vm10, %v3620_v63, %v3314_v46 }
 0x61e   : > { %v7889_v30 = vpop.f32.mrb[14].mxu1  ;;  %v3557_v59 = vsel %vm1508_vm7, %v3525_v16, %v3029_v7  ;;  %v8007_v16 = vadd.f32 %v7830_v60, %v7937_v54 }
 0x61f   : > { %v7893_v20 = vpop.f32.mrb[15].mxu1 }
 0x620   : > { %v3031_v22 = vpop.permute.xlu0 %3030  ;;  %v8023_v60 = vadd.f32 %v7937_v54, %v7893_v20 }
 0x621   : > { %v3402_v31 = vpop.permute.xlu1 %3401  ;;  %v3558_v1 = vsel %vm1508_vm7, %v3526_v23, %v3031_v22  ;;  %v7971_v22 = vadd.f32 %v7702_v45, %v7937_v54  ;;  %v7987_v45 = vadd.f32 %v7937_v54, %v7808_v44  ;;  %v8031_v23 = vadd.f32 %v7889_v30, %v7937_v54 }
 0x622   : > { %v3683_v42 = vsel %vm1640_vm11, %v3651_v13, %v3402_v31  ;;  %v7983_v13 = vadd.f32 %v7766_v26, %v7937_v54  ;;  %v7999_v26 = vadd.f32 %v7937_v54, %v7833_v2  ;;  %v4044_v2 = vsel %vm1413_vm4, %v8007_v16, 0.0 }
 0x623   : > { %4645 = vmatprep.mubr.msk.f32.mxu1 %vm1685_vm12, %v3683_v42  ;;  %v4032_v0 = vsel %vm1413_vm4, %v7971_v22, 0.0  ;;  %v4038_v18 = vsel %vm1413_vm4, %v7987_v45, 0.0  ;;  %v7995_v42 = vadd.f32 %v7806_v33, %v7937_v54  ;;  %v8011_v33 = vadd.f32 %v7937_v54, %v7867_v62 }
 0x624   : > { %v3404_v12 = vpop.permute.xlu0 %3403  ;;  %v4048_v62 = vsel %vm1413_vm4, %v8019_v49, 0.0  ;;  %v4050_v8 = vsel %vm1413_vm4, %v8023_v60, 0.0  ;;  %v4052_v20 = vsel %vm1413_vm4, %v8031_v23, 0.0 }
 0x625   : > { %v3684_v50 = vsel %vm1640_vm11, %v3652_v10, %v3404_v12  ;;  %v3130_v48 = vpop.permute.xlu1 %3129  ;;  %v4040_v44 = vsel %vm1413_vm4, %v7995_v42, 0.0  ;;  %v4042_v10 = vsel %vm1413_vm4, %v7999_v26, 0.0 }
 0x626   : > { %4646 = vmatmul.mubr.msk.f32.gmra.mrb[28].mxu1 %vm1685_vm12, %v3684_v50  ;;  %v3589_v52 = vsel %vm1541_vm8, %v3557_v59, %v3130_v48  ;;  %v4046_v59 = vsel %vm1413_vm4, %v8011_v33, 0.0 }
 0x627   : > { %v3621_v37 = vsel %vm1574_vm9, %v3589_v52, %v7839_v61 }
 0x628   : > { %v3653_v28 = vsel %vm1607_vm10, %v3621_v37, %v7843_v17 }
 0x629   : > { %v3132_v57 = vpop.permute.xlu1 %3131  ;;  %v3685_v3 = vsel %vm1640_vm11, %v3653_v28, %v7858_v39 }
 0x62a   : > { %v3590_v51 = vsel %vm1541_vm8, %v3558_v1, %v3132_v57  ;;  %4648 = vmatprep.mubr.msk.f32.mxu1 %vm1685_vm12, %v3685_v3 }
 0x62b   : > { %v3622_v34 = vsel %vm1574_vm9, %v3590_v51, %v7841_v9  ;;  %v7941_v9 = vadd.f32 %v7552_v14, %v7937_v54  ;;  %v7959_v14 = vadd.f32 %v7621_v40, %v7937_v54  ;;  %v7975_v40 = vadd.f32 %v7937_v54, %v7770_v36 }
 0x62c   : > { %v3654_v61 = vsel %vm1607_vm10, %v3622_v34, %v7848_v5  ;;  %v7945_v5 = vadd.f32 %v7937_v54, %v7563_v24  ;;  %v7963_v24 = vadd.f32 %v7937_v54, %v7707_v27  ;;  %v4036_v36 = vsel %vm1413_vm4, %v7983_v13, 0.0 }
 0x62d   : > { %v3686_v25 = vsel %vm1640_vm11, %v3654_v61, %v3400_v32  ;;  %v7949_v32 = vadd.f32 %v7937_v54, %v7625_v41  ;;  %v4024_v46 = vsel %vm1413_vm4, %v7941_v9, 0.0  ;;  %v4028_v7 = vsel %vm1413_vm4, %v7959_v14, 0.0 }
 0x62e   : > { %4649 = vmatmul.mubr.msk.f32.gmra.mrb[30].mxu1 %vm1685_vm12, %v3686_v25  ;;  %v4023_v4 = vsel %vm1413_vm4, %v7945_v5, 0.0  ;;  %v4030_v56 = vsel %vm1413_vm4, %v7963_v24, 0.0  ;;  %v4034_v21 = vsel %vm1413_vm4, %v7975_v40, 0.0 }
 0x62f   : > { %v4026_v15 = vsel %vm1413_vm4, %v7949_v32, 0.0  ;;  %v4025_v19 = vadd.f32 %v4024_v46, %v4023_v4 }
 0x631   : > { %v4027_v41 = vadd.f32 %v4026_v15, %v4025_v19 }
 0x633   : > { %v4029_v47 = vadd.f32 %v4028_v7, %v4027_v41 }
 0x635   : > { %v4031_v27 = vadd.f32 %v4030_v56, %v4029_v47 }
 0x637   : > { %v4033_v29 = vadd.f32 %v4032_v0, %v4031_v27 }
 0x639   : > { %v4035_v31 = vadd.f32 %v4034_v21, %v4033_v29 }
 0x63b   : > { %v4037_v63 = vadd.f32 %v4036_v36, %v4035_v31 }
 0x63d   : > { %v4039_v55 = vadd.f32 %v4038_v18, %v4037_v63 }
 0x63e   : > { %v4629_v17 = vpop.f32.mrb[16].mxu1 }
 0x63f   : > { %v3944_v53 = vpop.f32.mrb[17].mxu1  ;;  %v4041_v12 = vadd.f32 %v4040_v44, %v4039_v55  ;;  %v8041_v34 = vadd.f32 %v4629_v17, %v7937_v54 }
 0x640   : > { %v8034_v28 = vadd.f32 %v7937_v54, %v3944_v53 }
 0x641   : > { %v4043_v50 = vadd.f32 %v4042_v10, %v4041_v12  ;;  %v4056_v25 = vsel %vm1413_vm4, %v8041_v34, 0.0 }
 0x642   : > { %v4054_v3 = vsel %vm1413_vm4, %v8034_v28, 0.0 }
 0x643   : > { %v4045_v48 = vadd.f32 %v4044_v2, %v4043_v50 }
 0x645   : > { %v4047_v52 = vadd.f32 %v4046_v59, %v4045_v48 }
 0x647   : > { %v4049_v37 = vadd.f32 %v4048_v62, %v4047_v52 }
 0x649   : > { %v4051_v1 = vadd.f32 %v4050_v8, %v4049_v37 }
 0x64b   : > { %v4053_v51 = vadd.f32 %v4052_v20, %v4051_v1 }
 0x64d   : > { %v4055_v30 = vadd.f32 %v4054_v3, %v4053_v51 }
 0x64f   : > { %v4057_v46 = vadd.f32 %v4056_v25, %v4055_v30 }
 0x65e   : > { %v7930_v38 = vpop.f32.mrb[18].mxu1 }
 0x65f   : > { %v3954_v11 = vpop.f32.mrb[19].mxu1  ;;  %v8052_v4 = vadd.f32 %v7930_v38, %v7937_v54 }
 0x660   : > { %v8044_v61 = vadd.f32 %v7937_v54, %v3954_v11 }
 0x661   : > { %v4060_v11 = vsel %vm1413_vm4, %v8052_v4, 0.0 }
 0x662   : > { %v4058_v53 = vsel %vm1413_vm4, %v8044_v61, 0.0 }
 0x663   : > { %v4059_v17 = vadd.f32 %v4058_v53, %v4057_v46 }
 0x665   : > { %v4061_v41 = vadd.f32 %v4060_v11, %v4059_v17 }
 0x67e   : > { %v7932_v39 = vpop.f32.mrb[20].mxu1 }
 0x67f   : > { %v3964_v6 = vpop.f32.mrb[21].mxu1  ;;  %v8063_v7 = vadd.f32 %v7932_v39, %v7937_v54 }
 0x680   : > { %v8055_v15 = vadd.f32 %v7937_v54, %v3964_v6 }
 0x681   : > { %v4064_v6 = vsel %vm1413_vm4, %v8063_v7, 0.0 }
 0x682   : > { %v4062_v19 = vsel %vm1413_vm4, %v8055_v15, 0.0 }
 0x683   : > { %v4063_v38 = vadd.f32 %v4062_v19, %v4061_v41 }
 0x685   : > { %v4065_v27 = vadd.f32 %v4064_v6, %v4063_v38 }
 0x69e   : > { %v4638_v35 = vpop.f32.mrb[22].mxu1 }
 0x69f   : > { %v3974_v58 = vpop.f32.mrb[23].mxu1  ;;  %v8073_v0 = vadd.f32 %v4638_v35, %v7937_v54 }
 0x6a0   : > { %v8066_v56 = vadd.f32 %v7937_v54, %v3974_v58 }
 0x6a1   : > { %v4068_v39 = vsel %vm1413_vm4, %v8073_v0, 0.0 }
 0x6a2   : > { %v4066_v47 = vsel %vm1413_vm4, %v8066_v56, 0.0 }
 0x6a3   : > { %v4067_v29 = vadd.f32 %v4066_v47, %v4065_v27 }
 0x6a5   : > { %v4069_v31 = vadd.f32 %v4068_v39, %v4067_v29 }
 0x6be   : > { %v4641_v43 = vpop.f32.mrb[24].mxu1 }
 0x6bf   : > { %v3984_v57 = vpop.f32.mrb[25].mxu1  ;;  %v8083_v36 = vadd.f32 %v4641_v43, %v7937_v54 }
 0x6c0   : > { %v8076_v21 = vadd.f32 %v7937_v54, %v3984_v57 }
 0x6c1   : > { %v4072_v35 = vsel %vm1413_vm4, %v8083_v36, 0.0 }
 0x6c2   : > { %v4070_v58 = vsel %vm1413_vm4, %v8076_v21, 0.0 }
 0x6c3   : > { %v4071_v18 = vadd.f32 %v4070_v58, %v4069_v31 }
 0x6c5   : > { %v4073_v12 = vadd.f32 %v4072_v35, %v4071_v18 }
 0x6de   : > { %v4644_v63 = vpop.f32.mrb[26].mxu1 }
 0x6df   : > { %v3994_v55 = vpop.f32.mrb[27].mxu1  ;;  %v4000_v44 = vadd.f32 %v4644_v63, %v7937_v54 }
 0x6e0   : > { %v3995_v10 = vadd.f32 %v7937_v54, %v3994_v55 }
 0x6e1   : > { %v4076_v59 = vsel %vm1413_vm4, %v4000_v44, 0.0 }
 0x6e2   : > { %v4074_v50 = vsel %vm1413_vm4, %v3995_v10, 0.0 }
 0x6e3   : > { %v4075_v2 = vadd.f32 %v4074_v50, %v4073_v12 }
 0x6e5   : > { %v4077_v48 = vadd.f32 %v4076_v59, %v4075_v2 }
 0x6f9   : > { %v4647_v52 = vpop.f32.mrb[28].mxu1 }
 0x6fa   : > { %v4004_v62 = vpop.f32.mrb[29].mxu1  ;;  %v4010_v8 = vadd.f32 %v4647_v52, %v7937_v54 }
 0x6fb   : > { %v4005_v37 = vadd.f32 %v7937_v54, %v4004_v62 }
 0x6fc   : > { %v4080_v57 = vsel %vm1413_vm4, %v4010_v8, 0.0 }
 0x6fd   : > { %v4078_v43 = vsel %vm1413_vm4, %v4005_v37, 0.0 }
 0x6fe   : > { %v4079_v1 = vadd.f32 %v4078_v43, %v4077_v48 }
 0x700   : > { %v4081_v20 = vadd.f32 %v4080_v57, %v4079_v1 }
 0x701   : > { %v4650_v3 = vpop.f32.mrb[30].mxu1 }
 0x702   : > { %v4014_v51 = vpop.f32.mrb[31].mxu1  ;;  %v4020_v30 = vadd.f32 %v4650_v3, %v7937_v54 }
 0x703   : > { %v4015_v25 = vadd.f32 %v7937_v54, %v4014_v51 }
 0x704   : > { %v4084_v17 = vsel %vm1413_vm4, %v4020_v30, 0.0 }
 0x705   : > { %v4082_v53 = vsel %vm1413_vm4, %v4015_v25, 0.0 }
 0x706   : > { %v4083_v46 = vadd.f32 %v4082_v53, %v4081_v20 }
 0x708   : > { %v4085_v11 = vadd.f32 %v4084_v17, %v4083_v46 }
 0x70a   : > { %v4086_v19 = vrot.slane %v4085_v11, 4 }
 0x70c   : > { %v4087_v41 = vadd.f32 %v4086_v19, %v4085_v11 }
 0x70e   : > { %v4088_v38 = vrot.slane %v4087_v41, 2 }
 0x710   : > { %v4089_v6 = vadd.f32 %v4088_v38, %v4087_v41 }
 0x712   : > { %v4090_v47 = vrot.slane %v4089_v6, 1 }
 0x714   : > { %v4091_v27 = vadd.f32 %v4090_v47, %v4089_v6 }
 0x716   : > { %v8099_v29 = vmul.f32 0.00390625, %v4091_v27 }
 0x718   : > { %v8102_v39 = vsub.f32 %v3995_v10, %v8099_v29  ;;  %v8105_v58 = vsub.f32 %v4000_v44, %v8099_v29  ;;  %v8108_v54 = vsub.f32 %v4005_v37, %v8099_v29  ;;  %v8111_v31 = vsub.f32 %v4010_v8, %v8099_v29 }
 0x719   : > { %v8114_v18 = vsub.f32 %v4015_v25, %v8099_v29  ;;  %v8117_v63 = vsub.f32 %v4020_v30, %v8099_v29  ;;  %v8121_v55 = vsub.f32 %v7945_v5, %v8099_v29  ;;  %v8125_v35 = vsub.f32 %v7941_v9, %v8099_v29 }
 0x71a   : > { %v8129_v44 = vsub.f32 %v7949_v32, %v8099_v29  ;;  %v8133_v10 = vsub.f32 %v7959_v14, %v8099_v29  ;;  %v8141_v5 = vsub.f32 %v7963_v24, %v8099_v29  ;;  %v8147_v32 = vsub.f32 %v7971_v22, %v8099_v29 }
 0x71b   : > { %v4125_v12 = vmul.f32 %v8121_v55, %v8121_v55  ;;  %v4126_v50 = vmul.f32 %v8125_v35, %v8125_v35  ;;  %v8155_v52 = vsub.f32 %v7975_v40, %v8099_v29  ;;  %v8162_v22 = vsub.f32 %v7983_v13, %v8099_v29 }
 0x71c   : > { %v4127_v9 = vmul.f32 %v8129_v44, %v8129_v44  ;;  %v4128_v14 = vmul.f32 %v8133_v10, %v8133_v10  ;;  %v4129_v24 = vmul.f32 %v8141_v5, %v8141_v5  ;;  %v4130_v37 = vmul.f32 %v8147_v32, %v8147_v32 }
 0x71d   : > { %v4157_v2 = vsel %vm1413_vm4, %v4125_v12, 0.0  ;;  %v4158_v59 = vsel %vm1413_vm4, %v4126_v50, 0.0  ;;  %v8169_v40 = vsub.f32 %v7987_v45, %v8099_v29  ;;  %v4131_v57 = vmul.f32 %v8155_v52, %v8155_v52 }
 0x71e   : > { %v4159_v48 = vadd.f32 %v4158_v59, %v4157_v2  ;;  %v4160_v62 = vsel %vm1413_vm4, %v4127_v9, 0.0  ;;  %v4162_v43 = vsel %vm1413_vm4, %v4128_v14, 0.0  ;;  %v4164_v20 = vsel %vm1413_vm4, %v4129_v24, 0.0 }
 0x71f   : > { %v8176_v13 = vsub.f32 %v7995_v42, %v8099_v29  ;;  %v4132_v51 = vmul.f32 %v8162_v22, %v8162_v22  ;;  %v4166_v30 = vsel %vm1413_vm4, %v4130_v37, 0.0  ;;  %v8183_v45 = vsub.f32 %v7999_v26, %v8099_v29 }
 0x720   : > { %v4161_v8 = vadd.f32 %v4160_v62, %v4159_v48  ;;  %v4133_v53 = vmul.f32 %v8169_v40, %v8169_v40  ;;  %v4168_v46 = vsel %vm1413_vm4, %v4131_v57, 0.0  ;;  %v8190_v42 = vsub.f32 %v8007_v16, %v8099_v29 }
 0x721   : > { %v4134_v11 = vmul.f32 %v8176_v13, %v8176_v13  ;;  %v4170_v19 = vsel %vm1413_vm4, %v4132_v51, 0.0  ;;  %v8197_v26 = vsub.f32 %v8011_v33, %v8099_v29  ;;  %v4135_v38 = vmul.f32 %v8183_v45, %v8183_v45 }
 0x722   : > { %v4163_v1 = vadd.f32 %v4162_v43, %v4161_v8  ;;  %v4172_v6 = vsel %vm1413_vm4, %v4133_v53, 0.0  ;;  %v8204_v16 = vsub.f32 %v8019_v49, %v8099_v29  ;;  %v4136_v27 = vmul.f32 %v8190_v42, %v8190_v42 }
 0x723   : > { %v4174_v12 = vsel %vm1413_vm4, %v4134_v11, 0.0  ;;  %v8211_v33 = vsub.f32 %v8023_v60, %v8099_v29  ;;  %v4137_v9 = vmul.f32 %v8197_v26, %v8197_v26  ;;  %v4176_v14 = vsel %vm1413_vm4, %v4135_v38, 0.0 }
 0x724   : > { %v4165_v3 = vadd.f32 %v4164_v20, %v4163_v1  ;;  %v8218_v49 = vsub.f32 %v8031_v23, %v8099_v29  ;;  %v4138_v59 = vmul.f32 %v8204_v16, %v8204_v16  ;;  %v4178_v48 = vsel %vm1413_vm4, %v4136_v27, 0.0 }
 0x725   : > { %v8225_v60 = vsub.f32 %v8034_v28, %v8099_v29  ;;  %v4139_v62 = vmul.f32 %v8211_v33, %v8211_v33  ;;  %v4180_v8 = vsel %vm1413_vm4, %v4137_v9, 0.0  ;;  %v8232_v23 = vsub.f32 %v8041_v34, %v8099_v29 }
 0x726   : > { %v4167_v25 = vadd.f32 %v4166_v30, %v4165_v3  ;;  %v4140_v43 = vmul.f32 %v8218_v49, %v8218_v49  ;;  %v4182_v1 = vsel %vm1413_vm4, %v4138_v59, 0.0  ;;  %v8239_v28 = vsub.f32 %v8044_v61, %v8099_v29 }
 0x727   : > { %v4141_v20 = vmul.f32 %v8225_v60, %v8225_v60  ;;  %v4184_v3 = vsel %vm1413_vm4, %v4139_v62, 0.0  ;;  %v8246_v34 = vsub.f32 %v8052_v4, %v8099_v29  ;;  %v4142_v30 = vmul.f32 %v8232_v23, %v8232_v23 }
 0x728   : > { %v4169_v17 = vadd.f32 %v4168_v46, %v4167_v25  ;;  %v4186_v25 = vsel %vm1413_vm4, %v4140_v43, 0.0  ;;  %v8253_v61 = vsub.f32 %v8055_v15, %v8099_v29  ;;  %v4143_v46 = vmul.f32 %v8239_v28, %v8239_v28 }
 0x729   : > { %v8260_v4 = vsub.f32 %v8063_v7, %v8099_v29  ;;  %v8267_v15 = vsub.f32 %v8066_v56, %v8099_v29  ;;  %v8274_v7 = vsub.f32 %v8073_v0, %v8099_v29  ;;  %v8281_v56 = vsub.f32 %v8076_v21, %v8099_v29 }
 0x72a   : > { %v4171_v41 = vadd.f32 %v4170_v19, %v4169_v17  ;;  %v4188_v17 = vsel %vm1413_vm4, %v4141_v20, 0.0  ;;  %v4144_v19 = vmul.f32 %v8246_v34, %v8246_v34  ;;  %v8288_v0 = vsub.f32 %v8083_v36, %v8099_v29 }
 0x72b   : > { %v4149_v21 = vmul.f32 %v8281_v56, %v8281_v56  ;;  %v4151_v36 = vmul.f32 %v8102_v39, %v8102_v39 }
 0x72c   : > { %v4173_v47 = vadd.f32 %v4172_v6, %v4171_v41  ;;  %v4190_v41 = vsel %vm1413_vm4, %v4142_v30, 0.0  ;;  %v4145_v6 = vmul.f32 %v8253_v61, %v8253_v61  ;;  %v4150_v43 = vmul.f32 %v8288_v0, %v8288_v0 }
 0x72d   : > { %v4204_v29 = vsel %vm1413_vm4, %v4149_v21, 0.0 }
 0x72e   : > { %v4175_v50 = vadd.f32 %v4174_v12, %v4173_v47  ;;  %v4192_v47 = vsel %vm1413_vm4, %v4143_v46, 0.0  ;;  %v4146_v12 = vmul.f32 %v8260_v4, %v8260_v4 }
 0x730   : > { %v4177_v2 = vadd.f32 %v4176_v14, %v4175_v50  ;;  %v4194_v50 = vsel %vm1413_vm4, %v4144_v19, 0.0  ;;  %v4147_v14 = vmul.f32 %v8267_v15, %v8267_v15 }
 0x732   : > { %v4179_v24 = vadd.f32 %v4178_v48, %v4177_v2  ;;  %v4196_v2 = vsel %vm1413_vm4, %v4145_v6, 0.0  ;;  %v4148_v48 = vmul.f32 %v8274_v7, %v8274_v7 }
 0x734   : > { %v4181_v37 = vadd.f32 %v4180_v8, %v4179_v24  ;;  %v4198_v24 = vsel %vm1413_vm4, %v4146_v12, 0.0  ;;  %v4200_v8 = vsel %vm1413_vm4, %v4147_v14, 0.0 }
 0x736   : > { %v4183_v57 = vadd.f32 %v4182_v1, %v4181_v37  ;;  %v4202_v1 = vsel %vm1413_vm4, %v4148_v48, 0.0 }
 0x738   : > { %v4185_v51 = vadd.f32 %v4184_v3, %v4183_v57  ;;  %v4152_v3 = vmul.f32 %v8105_v58, %v8105_v58 }
 0x73a   : > { %v4187_v53 = vadd.f32 %v4186_v25, %v4185_v51  ;;  %v4206_v51 = vsel %vm1413_vm4, %v4150_v43, 0.0  ;;  %v4153_v25 = vmul.f32 %v8108_v54, %v8108_v54 }
 0x73c   : > { %v4189_v11 = vadd.f32 %v4188_v17, %v4187_v53  ;;  %v4208_v53 = vsel %vm1413_vm4, %v4151_v36, 0.0  ;;  %v4154_v17 = vmul.f32 %v8111_v31, %v8111_v31 }
 0x73e   : > { %v4191_v38 = vadd.f32 %v4190_v41, %v4189_v11  ;;  %v4210_v11 = vsel %vm1413_vm4, %v4152_v3, 0.0  ;;  %v4155_v41 = vmul.f32 %v8114_v18, %v8114_v18 }
 0x740   : > { %v4193_v27 = vadd.f32 %v4192_v47, %v4191_v38  ;;  %v4212_v38 = vsel %vm1413_vm4, %v4153_v25, 0.0  ;;  %v4156_v47 = vmul.f32 %v8117_v63, %v8117_v63 }
 0x742   : > { %v4195_v9 = vadd.f32 %v4194_v50, %v4193_v27  ;;  %v4214_v27 = vsel %vm1413_vm4, %v4154_v17, 0.0  ;;  %v4216_v50 = vsel %vm1413_vm4, %v4155_v41, 0.0  ;;  %v4218_v14 = vsel %vm1413_vm4, %v4156_v47, 0.0  ;;  %v4691_v17 = vld [vmem:[%s4781_s23 + $0x20] sm:$0xff] }
 0x743   : > { %v4695_v47 = vld [vmem:[%s4781_s23 + $0x40] sm:$0xff] }
 0x744   : > { %v4197_v59 = vadd.f32 %v4196_v2, %v4195_v9 }
 0x746   : > { %v4199_v62 = vadd.f32 %v4198_v24, %v4197_v59 }
 0x748   : > { %v4201_v37 = vadd.f32 %v4200_v8, %v4199_v62 }
 0x74a   : > { %v4203_v57 = vadd.f32 %v4202_v1, %v4201_v37 }
 0x74c   : > { %v4205_v20 = vadd.f32 %v4204_v29, %v4203_v57 }
 0x74e   : > { %v4207_v30 = vadd.f32 %v4206_v51, %v4205_v20 }
 0x750   : > { %v4209_v46 = vadd.f32 %v4208_v53, %v4207_v30 }
 0x752   : > { %v4211_v19 = vadd.f32 %v4210_v11, %v4209_v46  ;;  %v4692_v11 = vld [vmem:[%s4781_s23 + $0x28] sm:$0xff] }
 0x754   : > { %v4213_v6 = vadd.f32 %v4212_v38, %v4211_v19  ;;  %v4693_v19 = vld [vmem:[%s4781_s23 + $0x30] sm:$0xff]  ;;  %v4694_v38 = vld [vmem:[%s4781_s23 + $0x38] sm:$0xff] }
 0x756   : > { %v4215_v12 = vadd.f32 %v4214_v27, %v4213_v6 }
 0x758   : > { %v4217_v9 = vadd.f32 %v4216_v50, %v4215_v12  ;;  %v4696_v12 = vld [vmem:[%s4781_s23 + $0x48] sm:$0xff] }
 0x75a   : > { %v4219_v2 = vadd.f32 %v4218_v14, %v4217_v9  ;;  %v4697_v9 = vld [vmem:[%s4781_s23 + $0x50] sm:$0xff] }
 0x75c   : > { %v4220_v59 = vrot.slane %v4219_v2, 4 }
 0x75e   : > { %v4221_v48 = vadd.f32 %v4220_v59, %v4219_v2  ;;  %v4698_v2 = vld [vmem:[%s4781_s23 + $0x58] sm:$0xff] }
 0x760   : > { %v4222_v24 = vrot.slane %v4221_v48, 2 }
 0x762   : > { %v4223_v62 = vadd.f32 %v4222_v24, %v4221_v48  ;;  %v4699_v48 = vld [vmem:[%s4781_s23 + $0x60] sm:$0xff] }
 0x764   : > { %v4224_v21 = vrot.slane %v4223_v62, 1 }
 0x766   : > { %v4225_v8 = vadd.f32 %v4224_v21, %v4223_v62  ;;  %v4700_v62 = vld [vmem:[%s4781_s23 + $0x68] sm:$0xff] }
 0x768   : > { %v4226_v37 = vmul.f32 0.00390625, %v4225_v8  ;;  %v4701_v8 = vld [vmem:[%s4781_s23 + $0x70] sm:$0xff] }
 0x76a   : > { %v4227_v43 = vadd.f32 1e-05, %v4226_v37 }
 0x76c   : > { %4685 = vrsqrt.f32 %v4227_v43  ;;  %v4702_v43 = vld [vmem:[%s4781_s23 + $0x78] sm:$0xff] }
 0x776   : > { %v4686_v1 = vpop.eup %4685 }
 0x777   : > { %v4229_v57 = vmul.f32 %v4686_v1, %v8121_v55  ;;  %v4230_v36 = vmul.f32 %v4686_v1, %v8125_v35  ;;  %v4231_v29 = vmul.f32 %v4686_v1, %v8129_v44  ;;  %v4232_v20 = vmul.f32 %v4686_v1, %v8133_v10 }
 0x778   : > { %v4233_v3 = vmul.f32 %v4686_v1, %v8141_v5  ;;  %v4234_v51 = vmul.f32 %v4686_v1, %v8147_v32  ;;  %v4235_v30 = vmul.f32 %v4686_v1, %v8155_v52  ;;  %v4236_v25 = vmul.f32 %v4686_v1, %v8162_v22 }
 0x779   : > { %v4237_v53 = vmul.f32 %v4686_v1, %v8169_v40  ;;  %v4238_v46 = vmul.f32 %v4686_v1, %v8176_v13  ;;  %v4239_v55 = vmul.f32 %v4686_v1, %v8183_v45  ;;  %v4240_v35 = vmul.f32 %v4686_v1, %v8190_v42 }
 0x77a   : > { %v4241_v44 = vmul.f32 %v4686_v1, %v8197_v26  ;;  %v4242_v10 = vmul.f32 %v4686_v1, %v8204_v16  ;;  %v4243_v5 = vmul.f32 %v4686_v1, %v8211_v33  ;;  %v4244_v32 = vmul.f32 %v4686_v1, %v8218_v49 }
 0x77b   : > { %v4245_v52 = vmul.f32 %v4686_v1, %v8225_v60  ;;  %v4246_v22 = vmul.f32 %v4686_v1, %v8232_v23  ;;  %v4247_v40 = vmul.f32 %v4686_v1, %v8239_v28  ;;  %v4248_v13 = vmul.f32 %v4686_v1, %v8246_v34 }
 0x77c   : > { %v8340_v45 = vmul.f32 %v4686_v1, %v8253_v61  ;;  %v8343_v42 = vmul.f32 %v4686_v1, %v8260_v4  ;;  %v8346_v26 = vmul.f32 %v4686_v1, %v8267_v15  ;;  %v8349_v16 = vmul.f32 %v4686_v1, %v8274_v7  ;;  %v4687_v61 = vld [vmem:[%s4781_s23] sm:$0xff]  ;;  %v4688_v15 = vld [vmem:[%s4781_s23 + $0x8] sm:$0xff] }
 0x77d   : > { %v8352_v33 = vmul.f32 %v4686_v1, %v8281_v56  ;;  %v8355_v49 = vmul.f32 %v4686_v1, %v8288_v0  ;;  %v8358_v60 = vmul.f32 %v4686_v1, %v8102_v39  ;;  %v8361_v23 = vmul.f32 %v4686_v1, %v8105_v58  ;;  %v4689_v56 = vld [vmem:[%s4781_s23 + $0x10] sm:$0xff]  ;;  %v4690_v0 = vld [vmem:[%s4781_s23 + $0x18] sm:$0xff] }
 0x77e   : > { %v8371_v28 = vmul.f32 %v4686_v1, %v8108_v54  ;;  %v8374_v34 = vmul.f32 %v4686_v1, %v8111_v31  ;;  %v8377_v39 = vmul.f32 %v4686_v1, %v8114_v18  ;;  %v8380_v58 = vmul.f32 %v4686_v1, %v8117_v63 }
 0x77f   : > { %v4261_v4 = vadd.f32 %v4687_v61, %v4229_v57  ;;  %v4262_v7 = vadd.f32 %v4688_v15, %v4230_v36  ;;  %v4263_v54 = vadd.f32 %v4689_v56, %v4231_v29  ;;  %v4264_v31 = vadd.f32 %v4690_v0, %v4232_v20  ;;  %v4703_v57 = vld [vmem:[%s4781_s23 + $0x80] sm:$0xff]  ;;  %v4704_v29 = vld [vmem:[%s4781_s23 + $0x88] sm:$0xff]  ;;  %v4717_v61 = vld [vmem:[%s4781_s23 + $0xf0] sm:$0xff] }
 0x780   : > { %v4265_v18 = vadd.f32 %v4691_v17, %v4233_v3  ;;  %v4266_v63 = vadd.f32 %v4692_v11, %v4234_v51  ;;  %v4267_v41 = vadd.f32 %v4693_v19, %v4235_v30  ;;  %v4268_v6 = vadd.f32 %v4694_v38, %v4236_v25  ;;  %v4705_v3 = vld [vmem:[%s4781_s23 + $0x90] sm:$0xff]  ;;  %v4706_v30 = vld [vmem:[%s4781_s23 + $0x98] sm:$0xff] }
 0x781   : > { %v4269_v27 = vadd.f32 %v4695_v47, %v4237_v53  ;;  %v4270_v50 = vadd.f32 %v4696_v12, %v4238_v46  ;;  %v4271_v14 = vadd.f32 %v4697_v9, %v4239_v55  ;;  %v4272_v59 = vadd.f32 %v4698_v2, %v4240_v35  ;;  %4293 = vst.msk [vmem:[%s8368_s28] sm:$0xff] %vm1413_vm4, %v4261_v4  ;;  %v4707_v53 = vld [vmem:[%s4781_s23 + $0xa0] sm:$0xff]  ;;  %v4708_v55 = vld [vmem:[%s4781_s23 + $0xa8] sm:$0xff]  ;;  %v4718_v15 = vld [vmem:[%s4781_s23 + $0xf8] sm:$0xff] }
 0x782   : > { %4294 = vst.msk [vmem:[%s8368_s28 + $0x8] sm:$0xff] %vm1413_vm4, %v4262_v7  ;;  %4295 = vst.msk [vmem:[%s8368_s28 + $0x10] sm:$0xff] %vm1413_vm4, %v4263_v54  ;;  %v4273_v24 = vadd.f32 %v4699_v48, %v4241_v44  ;;  %v4274_v21 = vadd.f32 %v4700_v62, %v4242_v10  ;;  %v4275_v37 = vadd.f32 %v4701_v8, %v4243_v5  ;;  %v4709_v44 = vld [vmem:[%s4781_s23 + $0xb0] sm:$0xff]  ;;  %v4710_v5 = vld [vmem:[%s4781_s23 + $0xb8] sm:$0xff] }
 0x783   : > { %4296 = vst.msk [vmem:[%s8368_s28 + $0x18] sm:$0xff] %vm1413_vm4, %v4264_v31  ;;  %v4276_v1 = vadd.f32 %v4702_v43, %v4244_v32  ;;  %4297 = vst.msk [vmem:[%s8368_s28 + $0x20] sm:$0xff] %vm1413_vm4, %v4265_v18  ;;  %v4277_v36 = vadd.f32 %v4703_v57, %v4245_v52  ;;  %v4278_v20 = vadd.f32 %v4704_v29, %v4246_v22  ;;  %v4711_v52 = vld [vmem:[%s4781_s23 + $0xc0] sm:$0xff] }
 0x784   : > { %4298 = vst.msk [vmem:[%s8368_s28 + $0x28] sm:$0xff] %vm1413_vm4, %v4266_v63  ;;  %4299 = vst.msk [vmem:[%s8368_s28 + $0x30] sm:$0xff] %vm1413_vm4, %v4267_v41  ;;  %v4279_v51 = vadd.f32 %v4705_v3, %v4247_v40  ;;  %v4280_v25 = vadd.f32 %v4706_v30, %v4248_v13  ;;  %v4281_v46 = vadd.f32 %v4707_v53, %v8340_v45  ;;  %v4712_v40 = vld [vmem:[%s4781_s23 + $0xc8] sm:$0xff]  ;;  %v4713_v45 = vld [vmem:[%s4781_s23 + $0xd0] sm:$0xff] }
 0x785   : > { %4300 = vst.msk [vmem:[%s8368_s28 + $0x38] sm:$0xff] %vm1413_vm4, %v4268_v6  ;;  %4301 = vst.msk [vmem:[%s8368_s28 + $0x40] sm:$0xff] %vm1413_vm4, %v4269_v27  ;;  %v4282_v35 = vadd.f32 %v4708_v55, %v8343_v42  ;;  %v4283_v10 = vadd.f32 %v4709_v44, %v8346_v26  ;;  %v4284_v32 = vadd.f32 %v4710_v5, %v8349_v16  ;;  %v4714_v26 = vld [vmem:[%s4781_s23 + $0xd8] sm:$0xff] }
 0x786   : > { %4302 = vst.msk [vmem:[%s8368_s28 + $0x48] sm:$0xff] %vm1413_vm4, %v4270_v50  ;;  %4303 = vst.msk [vmem:[%s8368_s28 + $0x50] sm:$0xff] %vm1413_vm4, %v4271_v14  ;;  %v4285_v22 = vadd.f32 %v4711_v52, %v8352_v33  ;;  %v4286_v13 = vadd.f32 %v4712_v40, %v8355_v49  ;;  %v4287_v42 = vadd.f32 %v4713_v45, %v8358_v60  ;;  %v4715_v33 = vld [vmem:[%s4781_s23 + $0xe0] sm:$0xff]  ;;  %v4716_v60 = vld [vmem:[%s4781_s23 + $0xe8] sm:$0xff] }
 0x787   : > { %4304 = vst.msk [vmem:[%s8368_s28 + $0x58] sm:$0xff] %vm1413_vm4, %v4272_v59  ;;  %4305 = vst.msk [vmem:[%s8368_s28 + $0x60] sm:$0xff] %vm1413_vm4, %v4273_v24  ;;  %v4288_v16 = vadd.f32 %v4714_v26, %v8361_v23  ;;  %v4289_v49 = vadd.f32 %v4715_v33, %v8371_v28  ;;  %v4290_v23 = vadd.f32 %v4716_v60, %v8374_v34 }
 0x788   : > { %4306 = vst.msk [vmem:[%s8368_s28 + $0x68] sm:$0xff] %vm1413_vm4, %v4274_v21  ;;  %4307 = vst.msk [vmem:[%s8368_s28 + $0x70] sm:$0xff] %vm1413_vm4, %v4275_v37  ;;  %v4291_v4 = vadd.f32 %v4717_v61, %v8377_v39  ;;  %v4292_v7 = vadd.f32 %v4718_v15, %v8380_v58 }
 0x789   : > { %4308 = vst.msk [vmem:[%s8368_s28 + $0x78] sm:$0xff] %vm1413_vm4, %v4276_v1  ;;  %4309 = vst.msk [vmem:[%s8368_s28 + $0x80] sm:$0xff] %vm1413_vm4, %v4277_v36 }
 0x78a   : > { %4310 = vst.msk [vmem:[%s8368_s28 + $0x88] sm:$0xff] %vm1413_vm4, %v4278_v20  ;;  %4311 = vst.msk [vmem:[%s8368_s28 + $0x90] sm:$0xff] %vm1413_vm4, %v4279_v51 }
 0x78b   : > { %4312 = vst.msk [vmem:[%s8368_s28 + $0x98] sm:$0xff] %vm1413_vm4, %v4280_v25  ;;  %4313 = vst.msk [vmem:[%s8368_s28 + $0xa0] sm:$0xff] %vm1413_vm4, %v4281_v46 }
 0x78c   : > { %4314 = vst.msk [vmem:[%s8368_s28 + $0xa8] sm:$0xff] %vm1413_vm4, %v4282_v35  ;;  %4315 = vst.msk [vmem:[%s8368_s28 + $0xb0] sm:$0xff] %vm1413_vm4, %v4283_v10 }
 0x78d   : > { %4316 = vst.msk [vmem:[%s8368_s28 + $0xb8] sm:$0xff] %vm1413_vm4, %v4284_v32  ;;  %4317 = vst.msk [vmem:[%s8368_s28 + $0xc0] sm:$0xff] %vm1413_vm4, %v4285_v22 }
 0x78e   : > { %4318 = vst.msk [vmem:[%s8368_s28 + $0xc8] sm:$0xff] %vm1413_vm4, %v4286_v13  ;;  %4319 = vst.msk [vmem:[%s8368_s28 + $0xd0] sm:$0xff] %vm1413_vm4, %v4287_v42 }
 0x78f   : > { %4320 = vst.msk [vmem:[%s8368_s28 + $0xd8] sm:$0xff] %vm1413_vm4, %v4288_v16  ;;  %4321 = vst.msk [vmem:[%s8368_s28 + $0xe0] sm:$0xff] %vm1413_vm4, %v4289_v49 }
 0x790   : > { %4322 = vst.msk [vmem:[%s8368_s28 + $0xe8] sm:$0xff] %vm1413_vm4, %v4290_v23  ;;  %4323 = vst.msk [vmem:[%s8368_s28 + $0xf0] sm:$0xff] %vm1413_vm4, %v4291_v4 }
 0x791   : > { %4324 = vst.msk [vmem:[%s8368_s28 + $0xf8] sm:$0xff] %vm1413_vm4, %v4292_v7 }
 0x792 PF: > { %s15_s18 = sadd.s32 1, %s4725_s18  }
 0x793   : > { %p12_p4 = scmp.ge.s32.totalorder %s15_s18, 4  }
 0x795   :  { %14 = sbr.rel (!%p12_p4) target bundleno = 1 (0x1), region = 70 }

</bundles_post_ra>
